<compile_context>
chip_gen: v6e
topology: v6e:2x2x1
jax: 0.10.0
libtpu: 0.0.40
codegen_flags: <defaults>
</compile_context>

<pallas_src>
import functools

import jax
import jax.numpy as jnp
from jax.experimental import pallas as pl
from jax.experimental.pallas import tpu as pltpu

BN_EPS = 1e-5


# ---------------------------------------------------------------------------
# VMEM budgeting
# ---------------------------------------------------------------------------
def _vmem_capacity_bytes():
    try:
        info = pltpu.get_tpu_info()
        for attr in ("vmem_capacity_bytes", "vmem_size_bytes", "vmem_bytes"):
            v = getattr(info, attr, None)
            if v:
                return int(v)
    except Exception:
        pass
    return 64 * 1024 * 1024  # conservative fallback (v7x per-TC VMEM)


def _vmem_budget():
    cap = _vmem_capacity_bytes()
    vmem_limit = min((cap * 4) // 5, 100 * 1024 * 1024)   # ~80%, capped
    tile_budget = vmem_limit // 3                          # live-buffer budget
    return vmem_limit, tile_budget


def _pick_tile(n, target):
    """Largest divisor of n <= target, preferring MXU/lane-friendly alignment."""
    if n <= target:
        return n
    for align in (256, 128, 64, 32, 16, 8, 1):
        for t in range(min(target, n), 0, -1):
            if n % t == 0 and t % align == 0:
                return t
    return n


# ---------------------------------------------------------------------------
# Kernel 1: fused phi/g 1x1-conv projection + (optional) fused 2x2 max-pool.
# The "quad" axis (size 4 when sub_sample=True) enumerates the 4 pixels of
# each pooling window; pooling == max over that axis of the linear projection
# (the bias is constant over the window, so it is added after the max).
# Output is a single lane-dense (TNs, 2*ic) bf16 slab: [phi | g].
# ---------------------------------------------------------------------------
def _phi_g_pool_kernel(x_ref, w_ref, b_ref, pg_ref, *, num_quads, flat):
    # x_ref: (1, Q, TNs, C) bf16   w_ref: (C, 2*ic) bf16   b_ref: (1, 2*ic) f32
    # pg_ref: (1, TNs, 2*ic) bf16
    w = w_ref[...]
    x = x_ref[0]                                          # (Q, TNs, C) bf16
    q, tns, c = x.shape
    if flat:
        # One long MXU stream over all Q sub-pixels, then a VPU max.
        acc = jnp.dot(x.reshape(q * tns, c), w,
                      preferred_element_type=jnp.float32).reshape(q, tns, -1)
        pooled = jnp.max(acc, axis=0)                     # (TNs, 2*ic) f32
    else:
        # Fallback for tile sizes where the sublane-merge reshape isn't clean:
        # issue all Q independent dots first, then a tree-max (keeps the MXU
        # cadence uninterrupted vs. the old dot->max->dot chain).
        parts = [jnp.dot(x[i], w, preferred_element_type=jnp.float32)
                 for i in range(num_quads)]
        pooled = parts[0]
        for i in range(1, num_quads):
            pooled = jnp.maximum(pooled, parts[i])
    pg_ref[0] = (pooled + b_ref[...]).astype(pg_ref.dtype)


# ---------------------------------------------------------------------------
# Kernel 2: theta projection (fused) + flash-style online-softmax attention
# over Ns tiles + output 1x1 conv (eval-mode BN folded) + residual.
# Grid = (B, N//tq, Ns//tkv); the kv axis is "arbitrary" (running m/l/acc).
# ---------------------------------------------------------------------------
def _attn_kernel(x_ref, wt_ref, bt_ref, pg_ref, w_ref, b_ref, out_ref,
                 theta_sc, m_sc, l_sc, acc_sc, *, ic):
    # x_ref: (1, TQ, C) f32    wt: (C, ic) bf16   bt: (1, ic) f32
    # pg_ref: (1, TKV, 2*ic) bf16 ([phi | g])
    # w: (ic, C) bf16          b: (1, C) f32      out: (1, TQ, C) f32
    k = pl.program_id(2)

    @pl.when(k == 0)
    def _():
        theta = jnp.dot(x_ref[0].astype(jnp.bfloat16), wt_ref[...],
                        preferred_element_type=jnp.float32) + bt_ref[...]
        theta_sc[...] = theta.astype(theta_sc.dtype)
        m_sc[...] = jnp.full_like(m_sc, -jnp.inf)
        l_sc[...] = jnp.zeros_like(l_sc)
        acc_sc[...] = jnp.zeros_like(acc_sc)

    pg = pg_ref[0]                                          # (TKV, 2*ic) bf16
    # scores = theta @ phi^T (contract the inter-channel dim directly)
    s = jax.lax.dot_general(theta_sc[...], pg[:, :ic],
                            (((1,), (1,)), ((), ())),
                            preferred_element_type=jnp.float32)   # (TQ, TKV)
    m_prev = m_sc[...]
    m_new = jnp.maximum(m_prev, jnp.max(s, axis=-1, keepdims=True))
    alpha = jnp.exp(m_prev - m_new)
    p = jnp.exp(s - m_new)                                  # reuse of s; no extra copies
    l_sc[...] = alpha * l_sc[...] + jnp.sum(p, axis=-1, keepdims=True)
    acc_sc[...] = alpha * acc_sc[...] + jnp.dot(
        p.astype(jnp.bfloat16), pg[:, ic:], preferred_element_type=jnp.float32)
    m_sc[...] = m_new

    @pl.when(k == pl.num_programs(2) - 1)
    def _():
        y = acc_sc[...] * pl.reciprocal(l_sc[...], approx=True)   # (TQ, ic) f32
        wy = jnp.dot(y.astype(jnp.bfloat16), w_ref[...],
                     preferred_element_type=jnp.float32) + b_ref[...]
        out_ref[0] = (wy + x_ref[0]).astype(out_ref.dtype)


# ---------------------------------------------------------------------------
# Wrapper
# ---------------------------------------------------------------------------
def non_local_block(x_nchw, params, sub_sample=True, tq=None, tns=None, tkv=None):
    B, C, H, W = x_nchw.shape
    ic = params["theta_w"].shape[0]
    N = H * W
    f32, bf16 = jnp.float32, jnp.bfloat16

    x_nhwc = jnp.transpose(x_nchw, (0, 2, 3, 1))
    # Raster-order query tokens (kept f32 for the exact residual add).  The
    # attention mixes only along Ns, which is permutation invariant, so no
    # quad-order round trip is needed for kernel 2's input or output.
    x_tok = x_nhwc.reshape(B, N, C)

    # bf16 quad layout for kernel 1 (cast folded into the transpose copy).
    if sub_sample:
        assert H % 2 == 0 and W % 2 == 0
        Ns, Q = (H // 2) * (W // 2), 4
        xq = x_nhwc.astype(bf16).reshape(B, H // 2, 2, W // 2, 2, C)
        x_quad = jnp.transpose(xq, (0, 2, 4, 1, 3, 5)).reshape(B, Q, Ns, C)
    else:
        Ns, Q = N, 1
        x_quad = x_nhwc.astype(bf16).reshape(B, 1, N, C)

    # Weights: phi|g fused into one matmul; theta separate (fused into kernel 2).
    w_pg = jnp.concatenate([params["phi_w"].T, params["g_w"].T], axis=1).astype(bf16)
    b_pg = jnp.concatenate([params["phi_b"], params["g_b"]])[None, :].astype(f32)
    w_t = params["theta_w"].T.astype(bf16)                  # (C, ic)
    b_t = params["theta_b"][None, :].astype(f32)            # (1, ic)

    # Fold eval-mode BatchNorm2d into the output 1x1 conv W.
    # TODO(synk): training-mode BN (batch statistics) is not implemented.
    scale = params["bn_gamma"] / jnp.sqrt(params["bn_var"] + BN_EPS)     # (C,)
    w_eff = (params["W_w"] * scale[:, None]).T.astype(bf16)              # (ic, C)
    b_eff = (scale * (params["W_b"] - params["bn_mean"])
             + params["bn_beta"])[None, :].astype(f32)                   # (1, C)

    vmem_limit, budget = _vmem_budget()

    # --- tile sizing against the device VMEM budget -------------------------
    if tns is None:
        t = 2048
        while t > 16 and 2 * (Q * t * C * 2 + t * 2 * ic * 2) > budget:
            t //= 2
        tns = _pick_tile(Ns, t)
    assert Ns % tns == 0
    if tkv is None:
        tkv = _pick_tile(Ns, 512)
    assert Ns % tkv == 0
    if tq is None:
        def _live(t):
            return (4 * t * C * 4            # x + out tiles, double-buffered
                    + 2 * tkv * 2 * ic * 2   # pg tile, double-buffered
                    + 6 * t * ic             # acc (f32) + theta (bf16) scratch
                    + 2 * t * tkv * 4        # score / exp transients
                    + 8 * t)                 # m, l scratch
        t = 1024
        while t > 16 and _live(t) > budget:
            t //= 2
        tq = _pick_tile(N, t)
    assert N % tq == 0

    cp1 = pltpu.CompilerParams(dimension_semantics=("parallel", "parallel"),
                               vmem_limit_bytes=vmem_limit)
    cp2 = pltpu.CompilerParams(
        dimension_semantics=("parallel", "parallel", "arbitrary"),
        vmem_limit_bytes=vmem_limit)

    # --- Kernel 1: fused phi/g projection (+ 2x2 max-pool), one bf16 output --
    flat = (Q == 1) or (tns % 16 == 0)
    pg_x = pl.pallas_call(
        functools.partial(_phi_g_pool_kernel, num_quads=Q, flat=flat),
        out_shape=jax.ShapeDtypeStruct((B, Ns, 2 * ic), bf16),
        grid=(B, Ns // tns),
        in_specs=[
            pl.BlockSpec((1, Q, tns, C), lambda b, j: (b, 0, j, 0)),
            pl.BlockSpec((C, 2 * ic), lambda b, j: (0, 0)),
            pl.BlockSpec((1, 2 * ic), lambda b, j: (0, 0)),
        ],
        out_specs=pl.BlockSpec((1, tns, 2 * ic), lambda b, j: (b, j, 0)),
        compiler_params=cp1,
    )(x_quad, w_pg, b_pg)

    # --- Kernel 2: theta + flash attention + output conv + residual ---------
    z_tok = pl.pallas_call(
        functools.partial(_attn_kernel, ic=ic),
        out_shape=jax.ShapeDtypeStruct((B, N, C), f32),
        grid=(B, N // tq, Ns // tkv),
        in_specs=[
            pl.BlockSpec((1, tq, C), lambda b, i, k: (b, i, 0)),
            pl.BlockSpec((C, ic), lambda b, i, k: (0, 0)),
            pl.BlockSpec((1, ic), lambda b, i, k: (0, 0)),
            pl.BlockSpec((1, tkv, 2 * ic), lambda b, i, k: (b, k, 0)),
            pl.BlockSpec((ic, C), lambda b, i, k: (0, 0)),
            pl.BlockSpec((1, C), lambda b, i, k: (0, 0)),
        ],
        out_specs=pl.BlockSpec((1, tq, C), lambda b, i, k: (b, i, 0)),
        scratch_shapes=[
            pltpu.VMEM((tq, ic), bf16),    # theta
            pltpu.VMEM((tq, 1), f32),      # running max m
            pltpu.VMEM((tq, 1), f32),      # running sum l
            pltpu.VMEM((tq, ic), f32),     # running accumulator
        ],
        compiler_params=cp2,
    )(x_tok, w_t, b_t, pg_x, w_eff, b_eff)

    z = z_tok.reshape(B, H, W, C)
    return jnp.transpose(z, (0, 3, 1, 2))


# ---------------------------------------------------------------------------
# Pure-JAX reference (mirrors the PyTorch forward, NCHW, eval-mode BN, f32)
# ---------------------------------------------------------------------------
def ref_forward(x, params, sub_sample=True):
    B, C, H, W = x.shape
    ic = params["theta_w"].shape[0]

    def conv1x1(v, w, b):
        return jnp.einsum("bchw,oc->bohw", v, w) + b[None, :, None, None]

    def maxpool(v):
        b_, c_, h_, w_ = v.shape
        return jnp.max(v.reshape(b_, c_, h_ // 2, 2, w_ // 2, 2), axis=(3, 5))

    g_x = conv1x1(x, params["g_w"], params["g_b"])
    phi_x = conv1x1(x, params["phi_w"], params["phi_b"])
    theta_x = conv1x1(x, params["theta_w"], params["theta_b"])
    if sub_sample:
        g_x = maxpool(g_x)
        phi_x = maxpool(phi_x)

    g_x = g_x.reshape(B, ic, -1).transpose(0, 2, 1)          # (B, Ns, ic)
    theta_x = theta_x.reshape(B, ic, -1).transpose(0, 2, 1)  # (B, N, ic)
    phi_x = phi_x.reshape(B, ic, -1)                         # (B, ic, Ns)

    f = jnp.einsum("bnc,bcm->bnm", theta_x, phi_x)
    f_div_c = jax.nn.softmax(f, axis=-1)
    y = jnp.einsum("bnm,bmc->bnc", f_div_c, g_x)             # (B, N, ic)
    y = y.transpose(0, 2, 1).reshape(B, ic, H, W)

    w_y = conv1x1(y, params["W_w"], params["W_b"])
    scale = params["bn_gamma"] / jnp.sqrt(params["bn_var"] + BN_EPS)
    w_y = (w_y - params["bn_mean"][None, :, None, None]) * scale[None, :, None, None] \
          + params["bn_beta"][None, :, None, None]
    return w_y + x


def make_params(key, C, ic, wscale=0.2, bscale=0.1, gspread=0.3):
    ks = jax.random.split(key, 10)
    # NOTE: the PyTorch __init__ zero-inits the BN affine params (identity
    # block); we use nonzero deterministic values so the full path is exercised.
    return {
        "g_w": wscale * jax.random.normal(ks[0], (ic, C), jnp.float32),
        "g_b": bscale * jax.random.normal(ks[1], (ic,), jnp.float32),
        "theta_w": wscale * jax.random.normal(ks[2], (ic, C), jnp.float32),
        "theta_b": bscale * jax.random.normal(ks[3], (ic,), jnp.float32),
        "phi_w": wscale * jax.random.normal(ks[4], (ic, C), jnp.float32),
        "phi_b": bscale * jax.random.normal(ks[5], (ic,), jnp.float32),
        "W_w": wscale * jax.random.normal(ks[6], (C, ic), jnp.float32),
        "W_b": bscale * jax.random.normal(ks[7], (C,), jnp.float32),
        "bn_gamma": 1.0 + gspread * jax.random.normal(ks[8], (C,), jnp.float32),
        "bn_beta": bscale * jax.random.normal(ks[9], (C,), jnp.float32),
        "bn_mean": jnp.zeros((C,), jnp.float32),
        "bn_var": jnp.ones((C,), jnp.float32),
    }


if __name__ == "__main__":
    key = jax.random.PRNGKey(0)
    k_small, k_big, kx1, kx2 = jax.random.split(key, 4)

    # ----- small-shape tests (module default-ish sizes) ---------------------
    B, C, H, W = 2, 4, 16, 16
    ic = max(C // 2, 1)
    params = make_params(k_small, C, ic)
    x = jax.random.normal(kx1, (B, C, H, W), jnp.float32)

    # Tolerance for bf16 MXU inputs (f32 accumulation) + approx reciprocal.
    TOL = 3e-2

    # 1) default (auto) tiles, sub_sample=True (the PyTorch default path)
    z1 = jax.block_until_ready(
        jax.jit(lambda xx: non_local_block(xx, params, sub_sample=True))(x))
    ref1 = ref_forward(x, params, sub_sample=True)
    assert z1.shape == x.shape
    err1 = float(jnp.max(jnp.abs(z1 - ref1)))
    assert err1 < TOL, f"sub_sample=True mismatch vs reference: {err1}"

    # 2) force multiple query/kv/pool tiles (exercises the online-softmax loop)
    z2 = jax.block_until_ready(
        jax.jit(lambda xx: non_local_block(xx, params, sub_sample=True,
                                           tq=64, tns=32, tkv=32))(x))
    err2 = float(jnp.max(jnp.abs(z2 - ref1)))
    assert err2 < TOL, f"tiled (tq=64,tns=32,tkv=32) mismatch vs reference: {err2}"

    # 3) sub_sample=False path (no pooling, quad axis of size 1)
    z3 = jax.block_until_ready(
        jax.jit(lambda xx: non_local_block(xx, params, sub_sample=False))(x))
    ref3 = ref_forward(x, params, sub_sample=False)
    err3 = float(jnp.max(jnp.abs(z3 - ref3)))
    assert err3 < TOL, f"sub_sample=False mismatch vs reference: {err3}"

    # ----- larger-channel test: exercises >=128-lane layouts + real tiling --
    Bb, Cb, Hb, Wb = 1, 256, 32, 32
    icb = Cb // 2
    params_b = make_params(k_big, Cb, icb, wscale=0.02, bscale=0.05, gspread=0.1)
    xb = jax.random.normal(kx2, (Bb, Cb, Hb, Wb), jnp.float32)
    z4 = jax.block_until_ready(
        jax.jit(lambda xx: non_local_block(xx, params_b, sub_sample=True,
                                           tq=256, tns=128, tkv=128))(xb))
    ref4 = ref_forward(xb, params_b, sub_sample=True)
    err4 = float(jnp.max(jnp.abs(z4 - ref4)))
    assert err4 < 5e-2, f"large-channel tiled mismatch vs reference: {err4}"

    print("KERNEL_OK")
</pallas_src>

<mosaic_0001>
module attributes {stable_mosaic.version = 11 : i64} {
  func.func @_phi_g_pool_kernel(%arg0: i32, %arg1: i32, %arg2: memref<1x4x64x4xbf16, #tpu.memory_space<vmem>>, %arg3: memref<4x4xbf16, #tpu.memory_space<vmem>>, %arg4: memref<1x4xf32, #tpu.memory_space<vmem>>, %arg5: memref<1x64x4xbf16, #tpu.memory_space<vmem>>) attributes {dimension_semantics = [#tpu.dimension_semantics<parallel>, #tpu.dimension_semantics<parallel>], iteration_bounds = array<i64: 2, 1>, scalar_prefetch = 0 : i64, scratch_operands = 0 : i64, tpu.core_type = #tpu.core_type<tc>, window_params = [{transform_indices = @transform_0, window_bounds = array<i64: 1, 4, 64, 4>}, {pipeline_mode = #tpu.pipeline_mode<synchronous>, transform_indices = @transform_1, window_bounds = array<i64: 4, 4>}, {pipeline_mode = #tpu.pipeline_mode<synchronous>, transform_indices = @transform_2, window_bounds = array<i64: 1, 4>}, {transform_indices = @transform_3, window_bounds = array<i64: 1, 64, 4>}]} {
    %c0 = arith.constant 0 : index
    %c0_0 = arith.constant 0 : index
    %0 = vector.load %arg3[%c0, %c0_0] : memref<4x4xbf16, #tpu.memory_space<vmem>>, vector<4x4xbf16>
    %c0_1 = arith.constant 0 : index
    %c0_2 = arith.constant 0 : index
    %c0_3 = arith.constant 0 : index
    %c0_4 = arith.constant 0 : index
    %1 = vector.load %arg2[%c0_1, %c0_2, %c0_3, %c0_4] : memref<1x4x64x4xbf16, #tpu.memory_space<vmem>>, vector<1x4x64x4xbf16>
    %2 = vector.shape_cast %1 : vector<1x4x64x4xbf16> to vector<4x64x4xbf16>
    %3 = vector.shape_cast %2 : vector<4x64x4xbf16> to vector<256x4xbf16>
    %cst = arith.constant dense<0.000000e+00> : vector<256x4xf32>
    %4 = tpu.matmul %3, %0, %cst {dimension_numbers = #tpu.dot_dimension_numbers<[1], [0], [0], [1], [0, 0, 1, 1], [], []>} : vector<256x4xbf16>, vector<4x4xbf16>, vector<256x4xf32> -> vector<256x4xf32>
    %5 = vector.shape_cast %4 : vector<256x4xf32> to vector<4x64x4xf32>
    %cst_5 = arith.constant dense<0xFF800000> : vector<64x4xf32>
    %6 = vector.multi_reduction <maximumf>, %5, %cst_5 [0] : vector<4x64x4xf32> to vector<64x4xf32>
    %c0_6 = arith.constant 0 : index
    %c0_7 = arith.constant 0 : index
    %7 = vector.load %arg4[%c0_6, %c0_7] : memref<1x4xf32, #tpu.memory_space<vmem>>, vector<1x4xf32>
    %8 = vector.broadcast %7 : vector<1x4xf32> to vector<64x4xf32>
    %9 = arith.addf %6, %8 : vector<64x4xf32>
    %10 = arith.truncf %9 : vector<64x4xf32> to vector<64x4xbf16>
    %c0_8 = arith.constant 0 : index
    %c0_9 = arith.constant 0 : index
    %c0_10 = arith.constant 0 : index
    %11 = vector.load %arg5[%c0_8, %c0_9, %c0_10] : memref<1x64x4xbf16, #tpu.memory_space<vmem>>, vector<1x64x4xbf16>
    %12 = vector.shape_cast %11 : vector<1x64x4xbf16> to vector<64x4xbf16>
    %13 = vector.shape_cast %10 : vector<64x4xbf16> to vector<1x64x4xbf16>
    tpu.vector_store %arg5[%c0_8, %c0_9, %c0_10], %13 {strides = array<i32>} : memref<1x64x4xbf16, #tpu.memory_space<vmem>>, vector<1x64x4xbf16>,
    return
  }
  func.func @transform_0(%arg0: i32, %arg1: i32) -> (i32, i32, i32, i32) {
    %c0_i32 = arith.constant 0 : i32
    %c0_i32_0 = arith.constant 0 : i32
    %c0_i32_1 = arith.constant 0 : i32
    return %arg0, %c0_i32, %arg1, %c0_i32_0 : i32, i32, i32, i32
  }
  func.func @transform_1(%arg0: i32, %arg1: i32) -> (i32, i32) {
    %c0_i32 = arith.constant 0 : i32
    %c0_i32_0 = arith.constant 0 : i32
    %c0_i32_1 = arith.constant 0 : i32
    return %c0_i32, %c0_i32_0 : i32, i32
  }
  func.func @transform_2(%arg0: i32, %arg1: i32) -> (i32, i32) {
    %c0_i32 = arith.constant 0 : i32
    %c0_i32_0 = arith.constant 0 : i32
    %c0_i32_1 = arith.constant 0 : i32
    return %c0_i32, %c0_i32_0 : i32, i32
  }
  func.func @transform_3(%arg0: i32, %arg1: i32) -> (i32, i32, i32) {
    %c0_i32 = arith.constant 0 : i32
    %c0_i32_0 = arith.constant 0 : i32
    return %arg0, %arg1, %c0_i32 : i32, i32, i32
  }
}

module attributes {stable_mosaic.version = 11 : i64} {
  func.func @_attn_kernel(%arg0: i32, %arg1: i32, %arg2: i32, %arg3: memref<1x256x4xf32, #tpu.memory_space<vmem>>, %arg4: memref<4x2xbf16, #tpu.memory_space<vmem>>, %arg5: memref<1x2xf32, #tpu.memory_space<vmem>>, %arg6: memref<1x64x4xbf16, #tpu.memory_space<vmem>>, %arg7: memref<2x4xbf16, #tpu.memory_space<vmem>>, %arg8: memref<1x4xf32, #tpu.memory_space<vmem>>, %arg9: memref<1x256x4xf32, #tpu.memory_space<vmem>>, %arg10: memref<256x2xbf16, #tpu.memory_space<vmem>>, %arg11: memref<256x1xf32, #tpu.memory_space<vmem>>, %arg12: memref<256x1xf32, #tpu.memory_space<vmem>>, %arg13: memref<256x2xf32, #tpu.memory_space<vmem>>) attributes {dimension_semantics = [#tpu.dimension_semantics<parallel>, #tpu.dimension_semantics<parallel>, #tpu.dimension_semantics<arbitrary>], iteration_bounds = array<i64: 2, 1, 1>, scalar_prefetch = 0 : i64, scratch_operands = 4 : i64, tpu.core_type = #tpu.core_type<tc>, window_params = [{transform_indices = @transform_0, window_bounds = array<i64: 1, 256, 4>}, {pipeline_mode = #tpu.pipeline_mode<synchronous>, transform_indices = @transform_1, window_bounds = array<i64: 4, 2>}, {pipeline_mode = #tpu.pipeline_mode<synchronous>, transform_indices = @transform_2, window_bounds = array<i64: 1, 2>}, {transform_indices = @transform_3, window_bounds = array<i64: 1, 64, 4>}, {pipeline_mode = #tpu.pipeline_mode<synchronous>, transform_indices = @transform_4, window_bounds = array<i64: 2, 4>}, {pipeline_mode = #tpu.pipeline_mode<synchronous>, transform_indices = @transform_5, window_bounds = array<i64: 1, 4>}, {transform_indices = @transform_6, window_bounds = array<i64: 1, 256, 4>}]} {
    %c0_i32 = arith.constant 0 : i32
    %0 = arith.cmpi eq, %arg2, %c0_i32 : i32
    %1 = arith.extui %0 : i1 to i32
    %c0_i32_0 = arith.constant 0 : i32
    %2 = arith.cmpi ne, %1, %c0_i32_0 : i32
    scf.if %2 {
      %c0_22 = arith.constant 0 : index
      %c0_23 = arith.constant 0 : index
      %c0_24 = arith.constant 0 : index
      %35 = vector.load %arg3[%c0_22, %c0_23, %c0_24] : memref<1x256x4xf32, #tpu.memory_space<vmem>>, vector<1x256x4xf32>
      %36 = vector.shape_cast %35 : vector<1x256x4xf32> to vector<256x4xf32>
      %37 = arith.truncf %36 : vector<256x4xf32> to vector<256x4xbf16>
      %c0_25 = arith.constant 0 : index
      %c0_26 = arith.constant 0 : index
      %38 = vector.load %arg4[%c0_25, %c0_26] : memref<4x2xbf16, #tpu.memory_space<vmem>>, vector<4x2xbf16>
      %cst_27 = arith.constant dense<0.000000e+00> : vector<256x2xf32>
      %39 = tpu.matmul %37, %38, %cst_27 {dimension_numbers = #tpu.dot_dimension_numbers<[1], [0], [0], [1], [0, 0, 1, 1], [], []>} : vector<256x4xbf16>, vector<4x2xbf16>, vector<256x2xf32> -> vector<256x2xf32>
      %c0_28 = arith.constant 0 : index
      %c0_29 = arith.constant 0 : index
      %40 = vector.load %arg5[%c0_28, %c0_29] : memref<1x2xf32, #tpu.memory_space<vmem>>, vector<1x2xf32>
      %41 = vector.broadcast %40 : vector<1x2xf32> to vector<256x2xf32>
      %42 = arith.addf %39, %41 : vector<256x2xf32>
      %43 = arith.truncf %42 : vector<256x2xf32> to vector<256x2xbf16>
      %c0_30 = arith.constant 0 : index
      %c0_31 = arith.constant 0 : index
      %44 = vector.load %arg10[%c0_30, %c0_31] : memref<256x2xbf16, #tpu.memory_space<vmem>>, vector<256x2xbf16>
      tpu.vector_store %arg10[%c0_30, %c0_31], %43 {strides = array<i32>} : memref<256x2xbf16, #tpu.memory_space<vmem>>, vector<256x2xbf16>,
      %cst_32 = arith.constant 0xFF800000 : f32
      %45 = vector.broadcast %cst_32 : f32 to vector<256x1xf32>
      %c0_33 = arith.constant 0 : index
      %c0_34 = arith.constant 0 : index
      %46 = vector.load %arg11[%c0_33, %c0_34] : memref<256x1xf32, #tpu.memory_space<vmem>>, vector<256x1xf32>
      tpu.vector_store %arg11[%c0_33, %c0_34], %45 {strides = array<i32>} : memref<256x1xf32, #tpu.memory_space<vmem>>, vector<256x1xf32>,
      %cst_35 = arith.constant 0.000000e+00 : f32
      %47 = vector.broadcast %cst_35 : f32 to vector<256x1xf32>
      %c0_36 = arith.constant 0 : index
      %c0_37 = arith.constant 0 : index
      %48 = vector.load %arg12[%c0_36, %c0_37] : memref<256x1xf32, #tpu.memory_space<vmem>>, vector<256x1xf32>
      tpu.vector_store %arg12[%c0_36, %c0_37], %47 {strides = array<i32>} : memref<256x1xf32, #tpu.memory_space<vmem>>, vector<256x1xf32>,
      %cst_38 = arith.constant 0.000000e+00 : f32
      %49 = vector.broadcast %cst_38 : f32 to vector<256x2xf32>
      %c0_39 = arith.constant 0 : index
      %c0_40 = arith.constant 0 : index
      %50 = vector.load %arg13[%c0_39, %c0_40] : memref<256x2xf32, #tpu.memory_space<vmem>>, vector<256x2xf32>
      tpu.vector_store %arg13[%c0_39, %c0_40], %49 {strides = array<i32>} : memref<256x2xf32, #tpu.memory_space<vmem>>, vector<256x2xf32>,
    } else {
    }
    %c0 = arith.constant 0 : index
    %c0_1 = arith.constant 0 : index
    %c0_2 = arith.constant 0 : index
    %3 = vector.load %arg6[%c0, %c0_1, %c0_2] : memref<1x64x4xbf16, #tpu.memory_space<vmem>>, vector<1x64x4xbf16>
    %4 = vector.shape_cast %3 : vector<1x64x4xbf16> to vector<64x4xbf16>
    %c0_3 = arith.constant 0 : index
    %c0_4 = arith.constant 0 : index
    %5 = vector.load %arg10[%c0_3, %c0_4] : memref<256x2xbf16, #tpu.memory_space<vmem>>, vector<256x2xbf16>
    %6 = vector.extract_strided_slice %4 {offsets = [0, 0], sizes = [64, 2], strides = [1, 1]} : vector<64x4xbf16> to vector<64x2xbf16>
    %cst = arith.constant dense<0.000000e+00> : vector<256x64xf32>
    %7 = tpu.matmul %5, %6, %cst {dimension_numbers = #tpu.dot_dimension_numbers<[1], [1], [0], [0], [0, 0, 1, 0], [], []>} : vector<256x2xbf16>, vector<64x2xbf16>, vector<256x64xf32> -> vector<256x64xf32>
    %c0_5 = arith.constant 0 : index
    %c0_6 = arith.constant 0 : index
    %8 = vector.load %arg11[%c0_5, %c0_6] : memref<256x1xf32, #tpu.memory_space<vmem>>, vector<256x1xf32>
    %cst_7 = arith.constant dense<0xFF800000> : vector<256xf32>
    %9 = vector.multi_reduction <maximumf>, %7, %cst_7 [1] : vector<256x64xf32> to vector<256xf32>
    %10 = vector.shape_cast %9 : vector<256xf32> to vector<256x1xf32>
    %11 = arith.maximumf %8, %10 : vector<256x1xf32>
    %12 = arith.subf %8, %11 : vector<256x1xf32>
    %13 = math.exp %12 : vector<256x1xf32>
    %14 = vector.broadcast %11 : vector<256x1xf32> to vector<256x64xf32>
    %15 = arith.subf %7, %14 : vector<256x64xf32>
    %16 = math.exp %15 : vector<256x64xf32>
    %c0_8 = arith.constant 0 : index
    %c0_9 = arith.constant 0 : index
    %17 = vector.load %arg12[%c0_8, %c0_9] : memref<256x1xf32, #tpu.memory_space<vmem>>, vector<256x1xf32>
    %18 = arith.mulf %13, %17 : vector<256x1xf32>
    %cst_10 = arith.constant dense<0.000000e+00> : vector<256xf32>
    %19 = vector.multi_reduction <add>, %16, %cst_10 [1] : vector<256x64xf32> to vector<256xf32>
    %20 = vector.shape_cast %19 : vector<256xf32> to vector<256x1xf32>
    %21 = arith.addf %18, %20 : vector<256x1xf32>
    %c0_11 = arith.constant 0 : index
    %c0_12 = arith.constant 0 : index
    %22 = vector.load %arg12[%c0_11, %c0_12] : memref<256x1xf32, #tpu.memory_space<vmem>>, vector<256x1xf32>
    tpu.vector_store %arg12[%c0_11, %c0_12], %21 {strides = array<i32>} : memref<256x1xf32, #tpu.memory_space<vmem>>, vector<256x1xf32>,
    %c0_13 = arith.constant 0 : index
    %c0_14 = arith.constant 0 : index
    %23 = vector.load %arg13[%c0_13, %c0_14] : memref<256x2xf32, #tpu.memory_space<vmem>>, vector<256x2xf32>
    %24 = vector.broadcast %13 : vector<256x1xf32> to vector<256x2xf32>
    %25 = arith.mulf %24, %23 : vector<256x2xf32>
    %26 = arith.truncf %16 : vector<256x64xf32> to vector<256x64xbf16>
    %27 = vector.extract_strided_slice %4 {offsets = [0, 2], sizes = [64, 2], strides = [1, 1]} : vector<64x4xbf16> to vector<64x2xbf16>
    %cst_15 = arith.constant dense<0.000000e+00> : vector<256x2xf32>
    %28 = tpu.matmul %26, %27, %cst_15 {dimension_numbers = #tpu.dot_dimension_numbers<[1], [0], [0], [1], [0, 0, 1, 1], [], []>} : vector<256x64xbf16>, vector<64x2xbf16>, vector<256x2xf32> -> vector<256x2xf32>
    %29 = arith.addf %25, %28 : vector<256x2xf32>
    %c0_16 = arith.constant 0 : index
    %c0_17 = arith.constant 0 : index
    %30 = vector.load %arg13[%c0_16, %c0_17] : memref<256x2xf32, #tpu.memory_space<vmem>>, vector<256x2xf32>
    tpu.vector_store %arg13[%c0_16, %c0_17], %29 {strides = array<i32>} : memref<256x2xf32, #tpu.memory_space<vmem>>, vector<256x2xf32>,
    %c0_18 = arith.constant 0 : index
    %c0_19 = arith.constant 0 : index
    %31 = vector.load %arg11[%c0_18, %c0_19] : memref<256x1xf32, #tpu.memory_space<vmem>>, vector<256x1xf32>
    tpu.vector_store %arg11[%c0_18, %c0_19], %11 {strides = array<i32>} : memref<256x1xf32, #tpu.memory_space<vmem>>, vector<256x1xf32>,
    %c0_i32_20 = arith.constant 0 : i32
    %32 = arith.cmpi eq, %arg2, %c0_i32_20 : i32
    %33 = arith.extui %32 : i1 to i32
    %c0_i32_21 = arith.constant 0 : i32
    %34 = arith.cmpi ne, %33, %c0_i32_21 : i32
    scf.if %34 {
      %c0_22 = arith.constant 0 : index
      %c0_23 = arith.constant 0 : index
      %35 = vector.load %arg13[%c0_22, %c0_23] : memref<256x2xf32, #tpu.memory_space<vmem>>, vector<256x2xf32>
      %c0_24 = arith.constant 0 : index
      %c0_25 = arith.constant 0 : index
      %36 = vector.load %arg12[%c0_24, %c0_25] : memref<256x1xf32, #tpu.memory_space<vmem>>, vector<256x1xf32>
      %37 = tpu.reciprocal %36 {approx = true} : vector<256x1xf32> -> vector<256x1xf32>
      %38 = vector.broadcast %37 : vector<256x1xf32> to vector<256x2xf32>
      %39 = arith.mulf %35, %38 : vector<256x2xf32>
      %40 = arith.truncf %39 : vector<256x2xf32> to vector<256x2xbf16>
      %c0_26 = arith.constant 0 : index
      %c0_27 = arith.constant 0 : index
      %41 = vector.load %arg7[%c0_26, %c0_27] : memref<2x4xbf16, #tpu.memory_space<vmem>>, vector<2x4xbf16>
      %cst_28 = arith.constant dense<0.000000e+00> : vector<256x4xf32>
      %42 = tpu.matmul %40, %41, %cst_28 {dimension_numbers = #tpu.dot_dimension_numbers<[1], [0], [0], [1], [0, 0, 1, 1], [], []>} : vector<256x2xbf16>, vector<2x4xbf16>, vector<256x4xf32> -> vector<256x4xf32>
      %c0_29 = arith.constant 0 : index
      %c0_30 = arith.constant 0 : index
      %43 = vector.load %arg8[%c0_29, %c0_30] : memref<1x4xf32, #tpu.memory_space<vmem>>, vector<1x4xf32>
      %44 = vector.broadcast %43 : vector<1x4xf32> to vector<256x4xf32>
      %45 = arith.addf %42, %44 : vector<256x4xf32>
      %c0_31 = arith.constant 0 : index
      %c0_32 = arith.constant 0 : index
      %c0_33 = arith.constant 0 : index
      %46 = vector.load %arg3[%c0_31, %c0_32, %c0_33] : memref<1x256x4xf32, #tpu.memory_space<vmem>>, vector<1x256x4xf32>
      %47 = vector.shape_cast %46 : vector<1x256x4xf32> to vector<256x4xf32>
      %48 = arith.addf %45, %47 : vector<256x4xf32>
      %c0_34 = arith.constant 0 : index
      %c0_35 = arith.constant 0 : index
      %c0_36 = arith.constant 0 : index
      %49 = vector.load %arg9[%c0_34, %c0_35, %c0_36] : memref<1x256x4xf32, #tpu.memory_space<vmem>>, vector<1x256x4xf32>
      %50 = vector.shape_cast %49 : vector<1x256x4xf32> to vector<256x4xf32>
      %51 = vector.shape_cast %48 : vector<256x4xf32> to vector<1x256x4xf32>
      tpu.vector_store %arg9[%c0_34, %c0_35, %c0_36], %51 {strides = array<i32>} : memref<1x256x4xf32, #tpu.memory_space<vmem>>, vector<1x256x4xf32>,
    } else {
    }
    return
  }
  func.func @transform_0(%arg0: i32, %arg1: i32, %arg2: i32) -> (i32, i32, i32) {
    %c0_i32 = arith.constant 0 : i32
    %c0_i32_0 = arith.constant 0 : i32
    return %arg0, %arg1, %c0_i32 : i32, i32, i32
  }
  func.func @transform_1(%arg0: i32, %arg1: i32, %arg2: i32) -> (i32, i32) {
    %c0_i32 = arith.constant 0 : i32
    %c0_i32_0 = arith.constant 0 : i32
    %c0_i32_1 = arith.constant 0 : i32
    return %c0_i32, %c0_i32_0 : i32, i32
  }
  func.func @transform_2(%arg0: i32, %arg1: i32, %arg2: i32) -> (i32, i32) {
    %c0_i32 = arith.constant 0 : i32
    %c0_i32_0 = arith.constant 0 : i32
    %c0_i32_1 = arith.constant 0 : i32
    return %c0_i32, %c0_i32_0 : i32, i32
  }
  func.func @transform_3(%arg0: i32, %arg1: i32, %arg2: i32) -> (i32, i32, i32) {
    %c0_i32 = arith.constant 0 : i32
    %c0_i32_0 = arith.constant 0 : i32
    return %arg0, %arg2, %c0_i32 : i32, i32, i32
  }
  func.func @transform_4(%arg0: i32, %arg1: i32, %arg2: i32) -> (i32, i32) {
    %c0_i32 = arith.constant 0 : i32
    %c0_i32_0 = arith.constant 0 : i32
    %c0_i32_1 = arith.constant 0 : i32
    return %c0_i32, %c0_i32_0 : i32, i32
  }
  func.func @transform_5(%arg0: i32, %arg1: i32, %arg2: i32) -> (i32, i32) {
    %c0_i32 = arith.constant 0 : i32
    %c0_i32_0 = arith.constant 0 : i32
    %c0_i32_1 = arith.constant 0 : i32
    return %c0_i32, %c0_i32_0 : i32, i32
  }
  func.func @transform_6(%arg0: i32, %arg1: i32, %arg2: i32) -> (i32, i32, i32) {
    %c0_i32 = arith.constant 0 : i32
    %c0_i32_0 = arith.constant 0 : i32
    return %arg0, %arg1, %c0_i32 : i32, i32, i32
  }
}

</mosaic_0001>

<bundles_post_ra>
// kernel: _lambda_.2
= control target key start
LH: loop header
LB: loop body
LE: loop exit
PB: predicated region body
PF: predicated region fallthrough
CT: control target
= control target key end

     0   :  { %s938_s12 = smov 0   ;;  %s940_s13 = smov 0   ;;  %s1087_s0 = inlined_call_operand.vmem [shape: bf16[2,4,64,4], index: 0, kind: input, shape index: {}]   ;;  %s1088_s1 = inlined_call_operand.vmem [shape: bf16[4,4], index: 1, kind: input, shape index: {}]   ;;  %s1089_s2 = inlined_call_operand.vmem [shape: f32[1,4], index: 2, kind: input, shape index: {}]   ;;  %s1090_s3 = inlined_call_operand.vmem [shape: bf16[2,64,4], index: 3, kind: output, shape index: {}]  }
   0x1   :  { %s942_s14 = smov 0  }
   0x2 LB: > { %s25_s15 = sadd.s32 1, %s912_s13  ;;  %p741_p0 = scmp.ge.s32.totalorder %s916_s14, 1  ;;  %s916_s14 = sphi %s942_s14, %s13_s14   ;;  %s912_s13 = sphi %s940_s13, %s1092_s13   ;;  %s908_s12 = sphi %s938_s12, %s1091_s12  }
   0x3   : > { %p27_p1 = scmp.ge.s32.totalorder %s25_s15, 2  ;;  %p158_p2 = scmp.lt.s32.totalorder %s916_s14, 3 }
   0x5   : > { %s1094_s15 = smov (%p27_p1, %s25_s15), 0  ;;  %p159_p3 = pnand %p741_p0, %p158_p2 }
   0x6   : > { %p191_p4 = scmp.lt.s32.totalorder (!%p159_p3), %s908_s12, 1 }
   0x7   : > { %162 = sbr.rel (%p159_p3) target bundleno = 252 (0xfc), region = 32 }
   0xc   : > { %v211_v0 = vld [vmem:[%s1088_s1] sm:$0x3]  ;;  %vm373_vm0 = vcmask 1041408   ;;  %s1096_s12 = smov (!%p191_p4, %s908_s12), 1  ;;  %vm324_vm1 = vcmask 31744   ;;  %vm641_vm2 = vcmask 27648  }
   0xd   : > { %852 = vmatprep.subr.msk.bf16.mxu0 %vm373_vm0, %v211_v0  ;;  %853 = vmatprep.subr.msk.bf16.mxu1 %vm373_vm0, %v211_v0  ;;  %v375_v1 = vsel %vm373_vm0, %v211_v0, 0  ;;  %s789_s18 = sshll.u32 %s1096_s12, 7  ;;  %v1020_v52 = vld [vmem:[%s1089_s2] ss:$0 sm:$0xff]  ;;  %s790_s24 = sshll.u32 %s1096_s12, 5 }
   0xe   : > { %817 = vmatpush3.bf16.msra.mxu0 %v375_v1  ;;  %851 = vmatpush3.bf16.msra.mxu1 %v375_v1  ;;  %s965_s21 = scalar_lea.vmem %s1087_s0, %s789_s18  ;;  %s1035_s27 = scalar_lea.vmem %s1090_s3, %s790_s24 }
   0xf   : > { %v878_v2 = vld [vmem:[%s965_s21] sm:$0xff]   ;;  %v880_v4 = vld [vmem:[%s965_s21 + $0x8] sm:$0xff]   ;;  %v882_v6 = vld [vmem:[%s965_s21 + $0x10] sm:$0xff]  }
  0x10   : > { %v879_v3 = vld [vmem:[%s965_s21 + $0x40] sm:$0xff]   ;;  %818 = vmatprep.mubr.msk.bf16.mxu0 %vm324_vm1, %v878_v2  ;;  %v881_v5 = vld [vmem:[%s965_s21 + $0x48] sm:$0xff]   ;;  %v883_v7 = vld [vmem:[%s965_s21 + $0x50] sm:$0xff]  }
  0x11   : > { %834 = vmatprep.mubr.msk.bf16.mxu1 %vm324_vm1, %v879_v3  ;;  %819 = vmatmul.mubr.msk.bf16.vlgmr.msra.gmra.mxu0 %vm324_vm1, %v880_v4  ;;  %v884_v8 = vld [vmem:[%s965_s21 + $0x18] sm:$0xff]   ;;  %v886_v10 = vld [vmem:[%s965_s21 + $0x20] sm:$0xff]   ;;  %v888_v12 = vld [vmem:[%s965_s21 + $0x28] sm:$0xff]  }
  0x12   : > { %835 = vmatmul.mubr.msk.bf16.vlgmr.msra.gmra.mxu1 %vm324_vm1, %v881_v5  ;;  %822 = vmatprep.mubr.msk.bf16.mxu0 %vm324_vm1, %v882_v6  ;;  %v885_v9 = vld [vmem:[%s965_s21 + $0x58] sm:$0xff]   ;;  %v887_v11 = vld [vmem:[%s965_s21 + $0x60] sm:$0xff]   ;;  %v889_v13 = vld [vmem:[%s965_s21 + $0x68] sm:$0xff]  }
  0x13   : > { %838 = vmatprep.mubr.msk.bf16.mxu1 %vm324_vm1, %v883_v7  ;;  %v890_v14 = vld [vmem:[%s965_s21 + $0x30] sm:$0xff]   ;;  %v892_v16 = vld [vmem:[%s965_s21 + $0x38] sm:$0xff]  }
  0x14   : > { %v891_v15 = vld [vmem:[%s965_s21 + $0x70] sm:$0xff]   ;;  %v893_v17 = vld [vmem:[%s965_s21 + $0x78] sm:$0xff]  }
  0x19   : > { %823 = vmatmul.mubr.msk.bf16.gmra.mxu0 %vm324_vm1, %v884_v8 }
  0x1a   : > { %839 = vmatmul.mubr.msk.bf16.gmra.mxu1 %vm324_vm1, %v885_v9  ;;  %826 = vmatprep.mubr.msk.bf16.mxu0 %vm324_vm1, %v886_v10 }
  0x1b   : > { %842 = vmatprep.mubr.msk.bf16.mxu1 %vm324_vm1, %v887_v11 }
  0x21   : > { %827 = vmatmul.mubr.msk.bf16.gmra.mxu0 %vm324_vm1, %v888_v12 }
  0x22   : > { %843 = vmatmul.mubr.msk.bf16.gmra.mxu1 %vm324_vm1, %v889_v13  ;;  %830 = vmatprep.mubr.msk.bf16.mxu0 %vm324_vm1, %v890_v14 }
  0x23   : > { %846 = vmatprep.mubr.msk.bf16.mxu1 %vm324_vm1, %v891_v15 }
  0x29   : > { %831 = vmatmul.mubr.msk.bf16.gmra.mxu0 %vm324_vm1, %v892_v16 }
  0x2a   : > { %847 = vmatmul.mubr.msk.bf16.gmra.mxu1 %vm324_vm1, %v893_v17 }
  0xd1   : > { %v820_v18 = vpop.f32.mrf.mxu0 }
  0xd2   : > { %v836_v19 = vpop.f32.mrf.mxu1  ;;  %v552_v35 = vsel %vm324_vm1, %v820_v18, -inf }
  0xd3   : > { %v411_v20 = vpop.f32.mrf.mxu0  ;;  %v555_v40 = vsel %vm324_vm1, %v836_v19, -inf }
  0xd4   : > { %v475_v21 = vpop.f32.mrf.mxu1  ;;  %v538_v41 = vsel %vm324_vm1, %v411_v20, -inf }
  0xd5   : > { %v821_v22 = vpop.f32.mrf.mxu0  ;;  %v541_v45 = vsel %vm324_vm1, %v475_v21, -inf }
  0xd6   : > { %v837_v23 = vpop.f32.mrf.mxu1  ;;  %v559_v49 = vsel %vm324_vm1, %v821_v22, -inf }
  0xd7   : > { %v414_v24 = vpop.f32.mrf.mxu0  ;;  %v562_v50 = vsel %vm324_vm1, %v837_v23, -inf }
  0xd8   : > { %v478_v25 = vpop.f32.mrf.mxu1  ;;  %v545_v51 = vsel %vm324_vm1, %v414_v24, -inf }
  0xd9   : > { %v824_v26 = vpop.f32.mrf.mxu0  ;;  %v548_v55 = vsel %vm324_vm1, %v478_v25, -inf }
  0xda   : > { %v840_v27 = vpop.f32.mrf.mxu1  ;;  %v580_v60 = vsel %vm324_vm1, %v824_v26, -inf }
  0xdb   : > { %v427_v28 = vpop.f32.mrf.mxu0  ;;  %v583_v61 = vsel %vm324_vm1, %v840_v27, -inf }
  0xdc   : > { %v491_v29 = vpop.f32.mrf.mxu1  ;;  %v566_v6 = vsel %vm324_vm1, %v427_v28, -inf }
  0xdd   : > { %v999_v30 = vpop.f32.mrf.mxu0  ;;  %v569_v7 = vsel %vm324_vm1, %v491_v29, -inf }
  0xde   : > { %v1001_v31 = vpop.f32.mrf.mxu1  ;;  %v587_v26 = vsel %vm324_vm1, %v999_v30, -inf }
  0xdf   : > { %v1003_v32 = vpop.f32.mrf.mxu0  ;;  %v590_v27 = vsel %vm324_vm1, %v1001_v31, -inf }
  0xe0   : > { %v1005_v33 = vpop.f32.mrf.mxu1 }
  0xe1   : > { %v828_v34 = vpop.f32.mrf.mxu0 }
  0xe2   : > { %v553_v36 = vsel %vm324_vm1, %v828_v34, -inf  ;;  %v844_v37 = vpop.f32.mrf.mxu1 }
  0xe3   : > { %v554_v38 = vmax.f32 %v552_v35, %v553_v36  ;;  %v443_v39 = vpop.f32.mrf.mxu0  ;;  %v557_v42 = vsel %vm324_vm1, %v844_v37, -inf }
  0xe4   : > { %v539_v43 = vsel %vm324_vm1, %v443_v39, -inf  ;;  %v507_v44 = vpop.f32.mrf.mxu1 }
  0xe5   : > { %v556_v46 = vmax.f32 %v554_v38, %v555_v40  ;;  %v540_v47 = vmax.f32 %v538_v41, %v539_v43  ;;  %v829_v48 = vpop.f32.mrf.mxu0  ;;  %v543_v62 = vsel %vm324_vm1, %v507_v44, -inf  ;;  %v573_v40 = vsel %vm324_vm1, %v1003_v32, -inf }
  0xe6   : > { %v560_v53 = vsel %vm324_vm1, %v829_v48, -inf  ;;  %v845_v54 = vpop.f32.mrf.mxu1 }
  0xe7   : > { %v558_v56 = vmax.f32 %v556_v46, %v557_v42  ;;  %v542_v57 = vmax.f32 %v540_v47, %v541_v45  ;;  %v561_v58 = vmax.f32 %v559_v49, %v560_v53  ;;  %v446_v59 = vpop.f32.mrf.mxu0  ;;  %v564_v8 = vsel %vm324_vm1, %v845_v54, -inf }
  0xe8   : > { %v546_v63 = vsel %vm324_vm1, %v446_v59, -inf  ;;  %v510_v0 = vpop.f32.mrf.mxu1  ;;  %v576_v47 = vsel %vm324_vm1, %v1005_v33, -inf }
  0xe9   : > { %v603_v1 = vadd.f32 %v1020_v52, %v558_v56  ;;  %v544_v2 = vmax.f32 %v542_v57, %v543_v62  ;;  %v563_v3 = vmax.f32 %v561_v58, %v562_v50  ;;  %v547_v4 = vmax.f32 %v545_v51, %v546_v63  ;;  %v832_v5 = vpop.f32.mrf.mxu0 }
  0xea   : > { %v581_v9 = vsel %vm324_vm1, %v832_v5, -inf  ;;  %v848_v10 = vpop.f32.mrf.mxu1  ;;  %v550_v16 = vsel %vm324_vm1, %v510_v0, -inf }
  0xeb   : > { %v793_v11 = vpack.c.bf16 %v603_v1, %v603_v1  ;;  %v601_v12 = vadd.f32 %v1020_v52, %v544_v2  ;;  %v565_v13 = vmax.f32 %v563_v3, %v564_v8  ;;  %v549_v14 = vmax.f32 %v547_v4, %v548_v55  ;;  %v459_v15 = vpop.f32.mrf.mxu0 }
  0xec   : > { %v582_v17 = vmax.f32 %v580_v60, %v581_v9  ;;  %v585_v18 = vsel %vm324_vm1, %v848_v10, -inf  ;;  %v567_v19 = vsel %vm324_vm1, %v459_v15, -inf  ;;  %v523_v20 = vpop.f32.mrf.mxu1 }
  0xed   : > { %644 = vst.msk [vmem:[%s1035_s27 + $0x8] sm:$0xf] %vm641_vm2, %v793_v11  ;;  %v791_v21 = vpack.c.bf16 %v601_v12, %v601_v12  ;;  %v604_v22 = vadd.f32 %v1020_v52, %v565_v13  ;;  %v551_v23 = vmax.f32 %v549_v14, %v550_v16  ;;  %v568_v24 = vmax.f32 %v566_v6, %v567_v19  ;;  %v833_v25 = vpop.f32.mrf.mxu0 }
  0xee   : > { %v584_v28 = vmax.f32 %v582_v17, %v583_v61  ;;  %v588_v29 = vsel %vm324_vm1, %v833_v25, -inf  ;;  %v849_v34 = vpop.f32.mrf.mxu1  ;;  %v571_v41 = vsel %vm324_vm1, %v523_v20, -inf }
  0xef   : > { %642 = vst.msk [vmem:[%s1035_s27] sm:$0xf] %vm641_vm2, %v791_v21  ;;  %v794_v35 = vpack.c.bf16 %v604_v22, %v604_v22  ;;  %v602_v36 = vadd.f32 %v1020_v52, %v551_v23  ;;  %v570_v37 = vmax.f32 %v568_v24, %v569_v7  ;;  %v589_v38 = vmax.f32 %v587_v26, %v588_v29  ;;  %v462_v39 = vpop.f32.mrf.mxu0 }
  0xf0   : > { %v586_v30 = vmax.f32 %v584_v28, %v585_v18  ;;  %v574_v31 = vsel %vm324_vm1, %v462_v39, -inf  ;;  %v526_v46 = vpop.f32.mrf.mxu1  ;;  %v592_v48 = vsel %vm324_vm1, %v849_v34, -inf }
  0xf1   : > { %645 = vst.msk [vmem:[%s1035_s27 + $0xc] sm:$0xf] %vm641_vm2, %v794_v35  ;;  %v792_v42 = vpack.c.bf16 %v602_v36, %v602_v36  ;;  %v572_v43 = vmax.f32 %v570_v37, %v571_v41  ;;  %v591_v44 = vmax.f32 %v589_v38, %v590_v27  ;;  %v575_v45 = vmax.f32 %v573_v40, %v574_v31 }
  0xf2   : > { %v607_v32 = vadd.f32 %v1020_v52, %v586_v30  ;;  %v578_v54 = vsel %vm324_vm1, %v526_v46, -inf }
  0xf3   : > { %643 = vst.msk [vmem:[%s1035_s27 + $0x4] sm:$0xf] %vm641_vm2, %v792_v42  ;;  %v605_v49 = vadd.f32 %v1020_v52, %v572_v43  ;;  %v593_v50 = vmax.f32 %v591_v44, %v592_v48  ;;  %v577_v51 = vmax.f32 %v575_v45, %v576_v47 }
  0xf4   : > { %v797_v53 = vpack.c.bf16 %v607_v32, %v607_v32 }
  0xf5   : > { %v795_v55 = vpack.c.bf16 %v605_v49, %v605_v49  ;;  %v608_v56 = vadd.f32 %v1020_v52, %v593_v50  ;;  %v579_v57 = vmax.f32 %v577_v51, %v578_v54 }
  0xf6   : > { %648 = vst.msk [vmem:[%s1035_s27 + $0x18] sm:$0xf] %vm641_vm2, %v797_v53 }
  0xf7   : > { %646 = vst.msk [vmem:[%s1035_s27 + $0x10] sm:$0xf] %vm641_vm2, %v795_v55  ;;  %v798_v33 = vpack.c.bf16 %v608_v56, %v608_v56  ;;  %v606_v58 = vadd.f32 %v1020_v52, %v579_v57 }
  0xf9   : > { %649 = vst.msk [vmem:[%s1035_s27 + $0x1c] sm:$0xf] %vm641_vm2, %v798_v33  ;;  %v796_v59 = vpack.c.bf16 %v606_v58, %v606_v58 }
  0xfb   : > { %647 = vst.msk [vmem:[%s1035_s27 + $0x14] sm:$0xf] %vm641_vm2, %v796_v59 }
  0xfc PF: > { %s13_s14 = sadd.s32 1, %s916_s14   ;;  %s1091_s12 = smov %s912_s13 }
  0xfd   : > { %p10_p5 = scmp.ge.s32.totalorder %s13_s14, 4   ;;  %s1092_s13 = smov %s1094_s15 }
  0xff   :  { %12 = sbr.rel (!%p10_p5) target bundleno = 2 (0x2), region = 62 }

// kernel: _lambda_.3
= control target key start
LH: loop header
LB: loop body
LE: loop exit
PB: predicated region body
PF: predicated region fallthrough
CT: control target
= control target key end

     0   :  { %s3960_s21 = smov 0   ;;  %s3962_s22 = smov 0   ;;  %s5315_s0 = inlined_call_operand.vmem [shape: f32[2,256,4], index: 0, kind: input, shape index: {}]   ;;  %s5316_s1 = inlined_call_operand.vmem [shape: bf16[4,2], index: 1, kind: input, shape index: {}]   ;;  %s5317_s2 = inlined_call_operand.vmem [shape: f32[1,2], index: 2, kind: input, shape index: {}]   ;;  %s5318_s3 = inlined_call_operand.vmem [shape: bf16[2,64,4], index: 3, kind: input, shape index: {}]   ;;  %s5319_s4 = inlined_call_operand.vmem [shape: bf16[2,4], index: 4, kind: input, shape index: {}]   ;;  %s5320_s5 = inlined_call_operand.vmem [shape: f32[1,4], index: 5, kind: input, shape index: {}]   ;;  %s5321_s6 = inlined_call_operand.vmem [shape: f32[2,256,4], index: 6, kind: output, shape index: {}]  }
   0x1   :  { %s3964_s23 = smov 0  }
   0x2 LB: > { %s35_s24 = sadd.s32 1, %s3915_s22  ;;  %p3262_p0 = scmp.ge.s32.totalorder %s3919_s23, 1  ;;  %s3919_s23 = sphi %s3964_s23, %s16_s23   ;;  %s3915_s22 = sphi %s3962_s22, %s5439_s22   ;;  %s3911_s21 = sphi %s3960_s21, %s5438_s21  }
   0x3   : > { %p37_p1 = scmp.ge.s32.totalorder %s35_s24, 2  ;;  %p257_p2 = scmp.lt.s32.totalorder %s3919_s23, 3 }
   0x5   : > { %s5441_s24 = smov (%p37_p1, %s35_s24), 0  ;;  %p258_p3 = pnand %p3262_p0, %p257_p2 }
   0x7   : > { %261 = sbr.rel (%p258_p3) target bundleno = 1301 (0x515), region = 44 }
   0xc   : > { %v387_v0 = vld [vmem:[%s5316_s1] sm:$0x3]  ;;  %vm444_vm0 = vcmask 1041408   ;;  %p305_p4 = scmp.lt.s32.totalorder %s3911_s21, 1  ;;  %vm395_vm1 = vcmask 31744   ;;  %vm835_vm2 = vcmask 15360  }
   0xd   : > { %3648 = vmatprep.subr.msk.bf16.mxu0 %vm444_vm0, %v387_v0  ;;  %v446_v1 = vsel %vm444_vm0, %v387_v0, 0  ;;  %s3921_s11 = smov 126   ;;  %v4067_v58 = vld [vmem:[%s5317_s2] ss:$0 sm:$0xff]  ;;  %vm737_vm3 = vcmask 11264   ;;  %vm770_vm4 = vcmask 7168  }
   0xe   : > { %3499 = vmatpush3.bf16.msra.mxu0 %v446_v1  ;;  %s5443_s21 = smov (!%p305_p4, %s3911_s21), 1  ;;  %vm1262_vm5 = vcmask 523264   ;;  %vm2888_vm6 = vcmask 1040384  }
   0xf   : > { %s3389_s27 = sshll.u32 %s5443_s21, 8  ;;  %s3390_s7 = sshll.u32 %s5443_s21, 5 }
  0x10   : > { %s3989_s30 = scalar_lea.vmem %s5315_s0, %s3389_s27  ;;  %s4008_s10 = scalar_lea.vmem %s5318_s3, %s3390_s7 }
  0x11   : > { %v339_v2 = vld [vmem:[%s3989_s30] sm:$0xff]  ;;  %v340_v3 = vld [vmem:[%s3989_s30 + $0x8] sm:$0xff]  ;;  %v341_v4 = vld [vmem:[%s3989_s30 + $0x10] sm:$0xff]  ;;  %s5178_s20 = scalar_lea.vmem %s5321_s6, %s3389_s27 }
  0x12   : > { %v371_v5 = vpack.c.bf16 %v340_v3, %v339_v2  ;;  %v342_v6 = vld [vmem:[%s3989_s30 + $0x18] sm:$0xff]  ;;  %v343_v7 = vld [vmem:[%s3989_s30 + $0x20] sm:$0xff]  ;;  %v344_v8 = vld [vmem:[%s3989_s30 + $0x28] sm:$0xff] }
  0x13   : > { %v372_v9 = vpack.c.bf16 %v342_v6, %v341_v4  ;;  %v373_v10 = vpack.c.bf16 %v344_v8, %v343_v7  ;;  %v345_v11 = vld [vmem:[%s3989_s30 + $0x30] sm:$0xff]  ;;  %v346_v12 = vld [vmem:[%s3989_s30 + $0x38] sm:$0xff]  ;;  %v347_v13 = vld [vmem:[%s3989_s30 + $0x40] sm:$0xff] }
  0x14   : > { %3500 = vmatprep.mubr.msk.bf16.mxu0 %vm395_vm1, %v371_v5  ;;  %v348_v14 = vld [vmem:[%s3989_s30 + $0x48] sm:$0xff]  ;;  %v374_v15 = vpack.c.bf16 %v346_v12, %v345_v11  ;;  %v349_v17 = vld [vmem:[%s3989_s30 + $0x50] sm:$0xff]  ;;  %v3685_v18 = vld [vmem:[%s4008_s10 + $0x18] sm:$0xff]  }
  0x15   : > { %3501 = vmatmul.mubr.msk.bf16.vlgmr.msra.gmra.mxu0 %vm395_vm1, %v372_v9  ;;  %v375_v16 = vpack.c.bf16 %v348_v14, %v347_v13  ;;  %v3686_v19 = vld [vmem:[%s4008_s10 + $0x10] sm:$0xff]   ;;  %v350_v20 = vld [vmem:[%s3989_s30 + $0x58] sm:$0xff]  ;;  %3649 = vmatprep.subr.msk.bf16.mxu1 %vm835_vm2, %v3685_v18  ;;  %v1067_v21 = vsel %vm835_vm2, %v3685_v18, 0  ;;  %v351_v22 = vld [vmem:[%s3989_s30 + $0x60] sm:$0xff] }
  0x16   : > { %3504 = vmatprep.mubr.msk.bf16.mxu0 %vm395_vm1, %v373_v10  ;;  %v352_v23 = vld [vmem:[%s3989_s30 + $0x68] sm:$0xff]  ;;  %3533 = vmatpush3.bf16.xpose.msra.mxu1 %v1067_v21  ;;  %v376_v24 = vpack.c.bf16 %v350_v20, %v349_v17  ;;  %v1064_v26 = vsel %vm835_vm2, %v3686_v19, 0  ;;  %v353_v27 = vld [vmem:[%s3989_s30 + $0x70] sm:$0xff]  ;;  %v354_v28 = vld [vmem:[%s3989_s30 + $0x78] sm:$0xff] }
  0x17   : > { %3650 = vmatprep.subr.msk.bf16.mxu1 %vm835_vm2, %v3686_v19  ;;  %v377_v25 = vpack.c.bf16 %v352_v23, %v351_v22  ;;  %v355_v29 = vld [vmem:[%s3989_s30 + $0x80] sm:$0xff]  ;;  %v356_v30 = vld [vmem:[%s3989_s30 + $0x88] sm:$0xff]  ;;  %v378_v31 = vpack.c.bf16 %v354_v28, %v353_v27  ;;  %v357_v33 = vld [vmem:[%s3989_s30 + $0x90] sm:$0xff]  ;;  %2214 = vrot.lane.b32.xlu1 %v3685_v18, %s3921_s11 }
  0x18   : > { %v379_v32 = vpack.c.bf16 %v356_v30, %v355_v29  ;;  %v358_v34 = vld [vmem:[%s3989_s30 + $0x98] sm:$0xff]  ;;  %v359_v35 = vld [vmem:[%s3989_s30 + $0xa0] sm:$0xff]  ;;  %v360_v36 = vld [vmem:[%s3989_s30 + $0xa8] sm:$0xff]  ;;  %2212 = vrot.lane.b32.xlu0 %v3686_v19, %s3921_s11 }
  0x19   : > { %v380_v37 = vpack.c.bf16 %v358_v34, %v357_v33  ;;  %v381_v38 = vpack.c.bf16 %v360_v36, %v359_v35  ;;  %v361_v39 = vld [vmem:[%s3989_s30 + $0xb0] sm:$0xff]  ;;  %v362_v40 = vld [vmem:[%s3989_s30 + $0xb8] sm:$0xff]  ;;  %v363_v41 = vld [vmem:[%s3989_s30 + $0xc0] sm:$0xff] }
  0x1a   : > { %v364_v42 = vld [vmem:[%s3989_s30 + $0xc8] sm:$0xff]  ;;  %v382_v43 = vpack.c.bf16 %v362_v40, %v361_v39  ;;  %v365_v45 = vld [vmem:[%s3989_s30 + $0xd0] sm:$0xff]  ;;  %v366_v46 = vld [vmem:[%s3989_s30 + $0xd8] sm:$0xff] }
  0x1b   : > { %v383_v44 = vpack.c.bf16 %v364_v42, %v363_v41  ;;  %v367_v47 = vld [vmem:[%s3989_s30 + $0xe0] sm:$0xff]  ;;  %v368_v48 = vld [vmem:[%s3989_s30 + $0xe8] sm:$0xff]  ;;  %v384_v49 = vpack.c.bf16 %v366_v46, %v365_v45  ;;  %v369_v51 = vld [vmem:[%s3989_s30 + $0xf0] sm:$0xff] }
  0x1c   : > { %v385_v50 = vpack.c.bf16 %v368_v48, %v367_v47  ;;  %v370_v52 = vld [vmem:[%s3989_s30 + $0xf8] sm:$0xff]  ;;  %v3687_v54 = vld [vmem:[%s4008_s10 + $0x8] sm:$0xff]   ;;  %v4055_v56 = vld [vmem:[%s4008_s10] sm:$0xff]  }
  0x1d   : > { %3505 = vmatmul.mubr.msk.bf16.gmra.mxu0 %vm395_vm1, %v374_v15  ;;  %v386_v53 = vpack.c.bf16 %v370_v52, %v369_v51  ;;  %v1061_v55 = vsel %vm835_vm2, %v3687_v54, 0  ;;  %v1058_v57 = vsel %vm835_vm2, %v4055_v56, 0  ;;  %2210 = vrot.lane.b32.xlu1 %v3687_v54, %s3921_s11 }
  0x1e   : > { %3508 = vmatprep.mubr.msk.bf16.mxu0 %vm395_vm1, %v375_v16  ;;  %3535 = vmatpush3.bf16.xpose.msra.mxu1 %v1064_v26 }
  0x1f   : > { %3651 = vmatprep.subr.msk.bf16.mxu1 %vm835_vm2, %v3687_v54 }
  0x25   : > { %3509 = vmatmul.mubr.msk.bf16.gmra.mxu0 %vm395_vm1, %v376_v24 }
  0x26   : > { %3512 = vmatprep.mubr.msk.bf16.mxu0 %vm395_vm1, %v377_v25  ;;  %3537 = vmatpush3.bf16.xpose.msra.mxu1 %v1061_v55 }
  0x27   : > { %3652 = vmatprep.subr.msk.bf16.mxu1 %vm835_vm2, %v4055_v56 }
  0x2d   : > { %3513 = vmatmul.mubr.msk.bf16.gmra.mxu0 %vm395_vm1, %v378_v31 }
  0x2e   : > { %3516 = vmatprep.mubr.msk.bf16.mxu0 %vm395_vm1, %v379_v32  ;;  %3539 = vmatpush3.bf16.xpose.msra.mxu1 %v1058_v57 }
  0x35   : > { %3517 = vmatmul.mubr.msk.bf16.gmra.mxu0 %vm395_vm1, %v380_v37 }
  0x36   : > { %3520 = vmatprep.mubr.msk.bf16.mxu0 %vm395_vm1, %v381_v38 }
  0x3d   : > { %3521 = vmatmul.mubr.msk.bf16.gmra.mxu0 %vm395_vm1, %v382_v43 }
  0x3e   : > { %3524 = vmatprep.mubr.msk.bf16.mxu0 %vm395_vm1, %v383_v44 }
  0x45   : > { %3525 = vmatmul.mubr.msk.bf16.gmra.mxu0 %vm395_vm1, %v384_v49 }
  0x46   : > { %3528 = vmatprep.mubr.msk.bf16.mxu0 %vm395_vm1, %v385_v50 }
  0x4d   : > { %3529 = vmatmul.mubr.msk.bf16.gmra.mxu0 %vm395_vm1, %v386_v53 }
  0xd5   : > { %v3502_v59 = vpop.f32.mrf.mxu0 }
  0xd6   : > { %v491_v60 = vadd.f32 %v3502_v59, %v4067_v58 }
  0xd7   : > { %v482_v61 = vpop.f32.mrf.mxu0 }
  0xd8   : > { %v3394_v62 = vpack.c.bf16 %v491_v60, %v491_v60  ;;  %v483_v63 = vadd.f32 %v4067_v58, %v482_v61 }
  0xd9   : > { %v3503_v0 = vpop.f32.mrf.mxu0 }
  0xda   : > { %740 = vst.msk [vmem:[#allocation2 + $0x8] sm:$0xf] %vm737_vm3, %v3394_v62  ;;  %v3392_v1 = vpack.c.bf16 %v483_v63, %v483_v63  ;;  %v494_v2 = vadd.f32 %v3503_v0, %v4067_v58 }
  0xdb   : > { %v485_v3 = vpop.f32.mrf.mxu0 }
  0xdc   : > { %738 = vst.msk [vmem:[#allocation2] sm:$0xf] %vm737_vm3, %v3392_v1  ;;  %v3395_v4 = vpack.c.bf16 %v494_v2, %v494_v2  ;;  %v486_v5 = vadd.f32 %v4067_v58, %v485_v3 }
  0xdd   : > { %v3506_v6 = vpop.f32.mrf.mxu0 }
  0xde   : > { %741 = vst.msk [vmem:[#allocation2 + $0xc] sm:$0xf] %vm737_vm3, %v3395_v4  ;;  %v3393_v7 = vpack.c.bf16 %v486_v5, %v486_v5  ;;  %v507_v8 = vadd.f32 %v3506_v6, %v4067_v58 }
  0xdf   : > { %v498_v9 = vpop.f32.mrf.mxu0 }
  0xe0   : > { %739 = vst.msk [vmem:[#allocation2 + $0x4] sm:$0xf] %vm737_vm3, %v3393_v7  ;;  %v3398_v10 = vpack.c.bf16 %v507_v8, %v507_v8  ;;  %v499_v11 = vadd.f32 %v4067_v58, %v498_v9 }
  0xe1   : > { %v3507_v12 = vpop.f32.mrf.mxu0 }
  0xe2   : > { %744 = vst.msk [vmem:[#allocation2 + $0x18] sm:$0xf] %vm737_vm3, %v3398_v10  ;;  %v3396_v13 = vpack.c.bf16 %v499_v11, %v499_v11  ;;  %v510_v14 = vadd.f32 %v3507_v12, %v4067_v58 }
  0xe3   : > { %v501_v15 = vpop.f32.mrf.mxu0 }
  0xe4   : > { %742 = vst.msk [vmem:[#allocation2 + $0x10] sm:$0xf] %vm737_vm3, %v3396_v13  ;;  %v3399_v16 = vpack.c.bf16 %v510_v14, %v510_v14  ;;  %v502_v17 = vadd.f32 %v4067_v58, %v501_v15 }
  0xe5   : > { %v3510_v18 = vpop.f32.mrf.mxu0  ;;  %v3690_v25 = vld [vmem:[#allocation2 + $0x8] sm:$0xff]  }
  0xe6   : > { %745 = vst.msk [vmem:[#allocation2 + $0x1c] sm:$0xf] %vm737_vm3, %v3399_v16  ;;  %v3397_v19 = vpack.c.bf16 %v502_v17, %v502_v17  ;;  %v523_v20 = vadd.f32 %v3510_v18, %v4067_v58 }
  0xe7   : > { %v514_v21 = vpop.f32.mrf.mxu0  ;;  %v3689_v22 = vld [vmem:[#allocation2] sm:$0xff]  }
  0xe8   : > { %743 = vst.msk [vmem:[#allocation2 + $0x14] sm:$0xf] %vm737_vm3, %v3397_v19  ;;  %v3402_v23 = vpack.c.bf16 %v523_v20, %v523_v20  ;;  %v515_v24 = vadd.f32 %v4067_v58, %v514_v21  ;;  %3540 = vmatprep.mubr.msk.bf16.mxu1 %vm835_vm2, %v3689_v22 }
  0xe9   : > { %v3511_v26 = vpop.f32.mrf.mxu0  ;;  %3541 = vmatmul.mubr.msk.bf16.vlgmr.msra.gmra.mxu1 %vm835_vm2, %v3690_v25 }
  0xea   : > { %748 = vst.msk [vmem:[#allocation2 + $0x28] sm:$0xf] %vm737_vm3, %v3402_v23  ;;  %v3400_v27 = vpack.c.bf16 %v515_v24, %v515_v24  ;;  %v526_v28 = vadd.f32 %v3511_v26, %v4067_v58 }
  0xeb   : > { %v517_v29 = vpop.f32.mrf.mxu0 }
  0xec   : > { %746 = vst.msk [vmem:[#allocation2 + $0x20] sm:$0xf] %vm737_vm3, %v3400_v27  ;;  %v3403_v30 = vpack.c.bf16 %v526_v28, %v526_v28  ;;  %v518_v31 = vadd.f32 %v4067_v58, %v517_v29 }
  0xed   : > { %v3514_v32 = vpop.f32.mrf.mxu0  ;;  %v3692_v39 = vld [vmem:[#allocation2 + $0x18] sm:$0xff]  }
  0xee   : > { %749 = vst.msk [vmem:[#allocation2 + $0x2c] sm:$0xf] %vm737_vm3, %v3403_v30  ;;  %v3401_v33 = vpack.c.bf16 %v518_v31, %v518_v31  ;;  %v539_v34 = vadd.f32 %v3514_v32, %v4067_v58 }
  0xef   : > { %v530_v35 = vpop.f32.mrf.mxu0  ;;  %v3691_v36 = vld [vmem:[#allocation2 + $0x10] sm:$0xff]  }
  0xf0   : > { %747 = vst.msk [vmem:[#allocation2 + $0x24] sm:$0xf] %vm737_vm3, %v3401_v33  ;;  %v3406_v37 = vpack.c.bf16 %v539_v34, %v539_v34  ;;  %v531_v38 = vadd.f32 %v4067_v58, %v530_v35  ;;  %3544 = vmatprep.mubr.msk.bf16.mxu1 %vm835_vm2, %v3691_v36 }
  0xf1   : > { %v3515_v40 = vpop.f32.mrf.mxu0  ;;  %3545 = vmatmul.mubr.msk.bf16.gmra.mxu1 %vm835_vm2, %v3692_v39 }
  0xf2   : > { %752 = vst.msk [vmem:[#allocation2 + $0x38] sm:$0xf] %vm737_vm3, %v3406_v37  ;;  %v3404_v41 = vpack.c.bf16 %v531_v38, %v531_v38  ;;  %v542_v42 = vadd.f32 %v3515_v40, %v4067_v58 }
  0xf3   : > { %v533_v43 = vpop.f32.mrf.mxu0 }
  0xf4   : > { %750 = vst.msk [vmem:[#allocation2 + $0x30] sm:$0xf] %vm737_vm3, %v3404_v41  ;;  %v3407_v44 = vpack.c.bf16 %v542_v42, %v542_v42  ;;  %v534_v45 = vadd.f32 %v4067_v58, %v533_v43 }
  0xf5   : > { %v3518_v46 = vpop.f32.mrf.mxu0  ;;  %v3694_v49 = vld [vmem:[#allocation2 + $0x28] sm:$0xff]  }
  0xf6   : > { %753 = vst.msk [vmem:[#allocation2 + $0x3c] sm:$0xf] %vm737_vm3, %v3407_v44  ;;  %v3405_v47 = vpack.c.bf16 %v534_v45, %v534_v45  ;;  %v555_v48 = vadd.f32 %v3518_v46, %v4067_v58  ;;  %v2215_v45 = vpop.permute.xlu1 %2214  ;;  %v2213_v46 = vpop.permute.xlu0 %2212 }
  0xf7   : > { %v546_v50 = vpop.f32.mrf.mxu0  ;;  %v3693_v51 = vld [vmem:[#allocation2 + $0x20] sm:$0xff]   ;;  %3572 = vmatprep.subr.bf16.mxu0 %v2215_v45 }
  0xf8   : > { %751 = vst.msk [vmem:[#allocation2 + $0x34] sm:$0xf] %vm737_vm3, %v3405_v47  ;;  %v3410_v52 = vpack.c.bf16 %v555_v48, %v555_v48  ;;  %v547_v53 = vadd.f32 %v4067_v58, %v546_v50  ;;  %3548 = vmatprep.mubr.msk.bf16.mxu1 %vm835_vm2, %v3693_v51  ;;  %3573 = vmatpush3.bf16.msra.mxu0 %v2215_v45 }
  0xf9   : > { %v3519_v54 = vpop.f32.mrf.mxu0  ;;  %3549 = vmatmul.mubr.msk.bf16.gmra.mxu1 %vm835_vm2, %v3694_v49  ;;  %3574 = vmatprep.subr.bf16.mxu0 %v2213_v46 }
  0xfa   : > { %756 = vst.msk [vmem:[#allocation2 + $0x48] sm:$0xf] %vm737_vm3, %v3410_v52  ;;  %v3408_v55 = vpack.c.bf16 %v547_v53, %v547_v53  ;;  %v558_v57 = vadd.f32 %v3519_v54, %v4067_v58  ;;  %v2211_v47 = vpop.permute.xlu1 %2210 }
  0xfb   : > { %v549_v59 = vpop.f32.mrf.mxu0 }
  0xfc   : > { %754 = vst.msk [vmem:[#allocation2 + $0x40] sm:$0xf] %vm737_vm3, %v3408_v55  ;;  %v3411_v60 = vpack.c.bf16 %v558_v57, %v558_v57  ;;  %v550_v61 = vadd.f32 %v4067_v58, %v549_v59  ;;  %3575 = vmatpush3.bf16.msra.mxu0 %v2213_v46 }
  0xfd   : > { %v3522_v62 = vpop.f32.mrf.mxu0  ;;  %v3696_v1 = vld [vmem:[#allocation2 + $0x38] sm:$0xff]   ;;  %3576 = vmatprep.subr.bf16.mxu0 %v2211_v47 }
  0xfe   : > { %757 = vst.msk [vmem:[#allocation2 + $0x4c] sm:$0xf] %vm737_vm3, %v3411_v60  ;;  %v3409_v63 = vpack.c.bf16 %v550_v61, %v550_v61  ;;  %v571_v0 = vadd.f32 %v3522_v62, %v4067_v58 }
  0xff   : > { %v562_v2 = vpop.f32.mrf.mxu0  ;;  %v3695_v3 = vld [vmem:[#allocation2 + $0x30] sm:$0xff]  }
 0x100   : > { %755 = vst.msk [vmem:[#allocation2 + $0x44] sm:$0xf] %vm737_vm3, %v3409_v63  ;;  %v3414_v4 = vpack.c.bf16 %v571_v0, %v571_v0  ;;  %v563_v5 = vadd.f32 %v4067_v58, %v562_v2  ;;  %3552 = vmatprep.mubr.msk.bf16.mxu1 %vm835_vm2, %v3695_v3  ;;  %3577 = vmatpush3.bf16.msra.mxu0 %v2211_v47  ;;  %v3923_v63 = vmov 0  }
 0x101   : > { %v3523_v6 = vpop.f32.mrf.mxu0  ;;  %3553 = vmatmul.mubr.msk.bf16.gmra.mxu1 %vm835_vm2, %v3696_v1  ;;  %3683 = vset.pattern.permute.xlu1 %v3923_v63 }
 0x102   : > { %760 = vst.msk [vmem:[#allocation2 + $0x58] sm:$0xf] %vm737_vm3, %v3414_v4  ;;  %v3412_v7 = vpack.c.bf16 %v563_v5, %v563_v5  ;;  %v574_v8 = vadd.f32 %v3523_v6, %v4067_v58  ;;  %3684 = vset.pattern.permute.xlu0 %v3923_v63 }
 0x103   : > { %v565_v9 = vpop.f32.mrf.mxu0 }
 0x104   : > { %758 = vst.msk [vmem:[#allocation2 + $0x50] sm:$0xf] %vm737_vm3, %v3412_v7  ;;  %v3415_v10 = vpack.c.bf16 %v574_v8, %v574_v8  ;;  %v566_v11 = vadd.f32 %v4067_v58, %v565_v9 }
 0x105   : > { %v3526_v12 = vpop.f32.mrf.mxu0  ;;  %v3698_v15 = vld [vmem:[#allocation2 + $0x48] sm:$0xff]  }
 0x106   : > { %761 = vst.msk [vmem:[#allocation2 + $0x5c] sm:$0xf] %vm737_vm3, %v3415_v10  ;;  %v3413_v13 = vpack.c.bf16 %v566_v11, %v566_v11  ;;  %v587_v14 = vadd.f32 %v3526_v12, %v4067_v58 }
 0x107   : > { %v578_v16 = vpop.f32.mrf.mxu0  ;;  %v3697_v17 = vld [vmem:[#allocation2 + $0x40] sm:$0xff]  }
 0x108   : > { %759 = vst.msk [vmem:[#allocation2 + $0x54] sm:$0xf] %vm737_vm3, %v3413_v13  ;;  %v3418_v18 = vpack.c.bf16 %v587_v14, %v587_v14  ;;  %v579_v19 = vadd.f32 %v4067_v58, %v578_v16  ;;  %3556 = vmatprep.mubr.msk.bf16.mxu1 %vm835_vm2, %v3697_v17  ;;  %v3924_v13 = vmov 0.0  }
 0x109   : > { %v3527_v20 = vpop.f32.mrf.mxu0  ;;  %3557 = vmatmul.mubr.msk.bf16.gmra.mxu1 %vm835_vm2, %v3698_v15  ;;  %840 = vst.msk [vmem:[#allocation5 + $0x20] sm:$0xff] %vm835_vm2, %v3924_v13  ;;  %836 = vst.msk [vmem:[#allocation5] sm:$0xff] %vm835_vm2, %v3924_v13 }
 0x10a   : > { %764 = vst.msk [vmem:[#allocation2 + $0x68] sm:$0xf] %vm737_vm3, %v3418_v18  ;;  %v3416_v21 = vpack.c.bf16 %v579_v19, %v579_v19  ;;  %v590_v22 = vadd.f32 %v3527_v20, %v4067_v58 }
 0x10b   : > { %v581_v23 = vpop.f32.mrf.mxu0  ;;  %803 = vst.msk [vmem:[#allocation4] sm:$0xff] %vm770_vm4, %v3924_v13  ;;  %804 = vst.msk [vmem:[#allocation4 + $0x8] sm:$0xff] %vm770_vm4, %v3924_v13 }
 0x10c   : > { %762 = vst.msk [vmem:[#allocation2 + $0x60] sm:$0xf] %vm737_vm3, %v3416_v21  ;;  %v3419_v24 = vpack.c.bf16 %v590_v22, %v590_v22  ;;  %v582_v25 = vadd.f32 %v4067_v58, %v581_v23 }
 0x10d   : > { %v3530_v26 = vpop.f32.mrf.mxu0  ;;  %v3700_v29 = vld [vmem:[#allocation2 + $0x58] sm:$0xff]   ;;  %805 = vst.msk [vmem:[#allocation4 + $0x10] sm:$0xff] %vm770_vm4, %v3924_v13  ;;  %806 = vst.msk [vmem:[#allocation4 + $0x18] sm:$0xff] %vm770_vm4, %v3924_v13 }
 0x10e   : > { %765 = vst.msk [vmem:[#allocation2 + $0x6c] sm:$0xf] %vm737_vm3, %v3419_v24  ;;  %v3417_v27 = vpack.c.bf16 %v582_v25, %v582_v25  ;;  %v603_v28 = vadd.f32 %v3530_v26, %v4067_v58 }
 0x10f   : > { %v594_v30 = vpop.f32.mrf.mxu0  ;;  %v3699_v31 = vld [vmem:[#allocation2 + $0x50] sm:$0xff]   ;;  %807 = vst.msk [vmem:[#allocation4 + $0x20] sm:$0xff] %vm770_vm4, %v3924_v13  ;;  %808 = vst.msk [vmem:[#allocation4 + $0x28] sm:$0xff] %vm770_vm4, %v3924_v13 }
 0x110   : > { %763 = vst.msk [vmem:[#allocation2 + $0x64] sm:$0xf] %vm737_vm3, %v3417_v27  ;;  %v3422_v32 = vpack.c.bf16 %v603_v28, %v603_v28  ;;  %v595_v33 = vadd.f32 %v4067_v58, %v594_v30  ;;  %3560 = vmatprep.mubr.msk.bf16.mxu1 %vm835_vm2, %v3699_v31 }
 0x111   : > { %v3531_v34 = vpop.f32.mrf.mxu0  ;;  %3561 = vmatmul.mubr.msk.bf16.gmra.mxu1 %vm835_vm2, %v3700_v29  ;;  %809 = vst.msk [vmem:[#allocation4 + $0x30] sm:$0xff] %vm770_vm4, %v3924_v13  ;;  %810 = vst.msk [vmem:[#allocation4 + $0x38] sm:$0xff] %vm770_vm4, %v3924_v13 }
 0x112   : > { %768 = vst.msk [vmem:[#allocation2 + $0x78] sm:$0xf] %vm737_vm3, %v3422_v32  ;;  %v3420_v35 = vpack.c.bf16 %v595_v33, %v595_v33  ;;  %v606_v36 = vadd.f32 %v3531_v34, %v4067_v58 }
 0x113   : > { %v597_v37 = vpop.f32.mrf.mxu0  ;;  %811 = vst.msk [vmem:[#allocation4 + $0x40] sm:$0xff] %vm770_vm4, %v3924_v13  ;;  %812 = vst.msk [vmem:[#allocation4 + $0x48] sm:$0xff] %vm770_vm4, %v3924_v13 }
 0x114   : > { %766 = vst.msk [vmem:[#allocation2 + $0x70] sm:$0xf] %vm737_vm3, %v3420_v35  ;;  %v3423_v38 = vpack.c.bf16 %v606_v36, %v606_v36  ;;  %v598_v39 = vadd.f32 %v4067_v58, %v597_v37  ;;  %v3922_v58 = vmov -inf  }
 0x115   : > { %v3702_v41 = vld [vmem:[#allocation2 + $0x68] sm:$0xff]   ;;  %773 = vst.msk [vmem:[#allocation3 + $0x10] sm:$0xff] %vm770_vm4, %v3922_v58  ;;  %771 = vst.msk [vmem:[#allocation3] sm:$0xff] %vm770_vm4, %v3922_v58 }
 0x116   : > { %769 = vst.msk [vmem:[#allocation2 + $0x7c] sm:$0xf] %vm737_vm3, %v3423_v38  ;;  %v3421_v40 = vpack.c.bf16 %v598_v39, %v598_v39 }
 0x117   : > { %v3701_v42 = vld [vmem:[#allocation2 + $0x60] sm:$0xff]   ;;  %772 = vst.msk [vmem:[#allocation3 + $0x8] sm:$0xff] %vm770_vm4, %v3922_v58  ;;  %774 = vst.msk [vmem:[#allocation3 + $0x18] sm:$0xff] %vm770_vm4, %v3922_v58 }
 0x118   : > { %767 = vst.msk [vmem:[#allocation2 + $0x74] sm:$0xf] %vm737_vm3, %v3421_v40  ;;  %3564 = vmatprep.mubr.msk.bf16.mxu1 %vm835_vm2, %v3701_v42 }
 0x119   : > { %3565 = vmatmul.mubr.msk.bf16.gmra.mxu1 %vm835_vm2, %v3702_v41  ;;  %775 = vst.msk [vmem:[#allocation3 + $0x20] sm:$0xff] %vm770_vm4, %v3922_v58  ;;  %776 = vst.msk [vmem:[#allocation3 + $0x28] sm:$0xff] %vm770_vm4, %v3922_v58 }
 0x11a   : > { %777 = vst.msk [vmem:[#allocation3 + $0x30] sm:$0xff] %vm770_vm4, %v3922_v58  ;;  %778 = vst.msk [vmem:[#allocation3 + $0x38] sm:$0xff] %vm770_vm4, %v3922_v58 }
 0x11b   : > { %779 = vst.msk [vmem:[#allocation3 + $0x40] sm:$0xff] %vm770_vm4, %v3922_v58  ;;  %780 = vst.msk [vmem:[#allocation3 + $0x48] sm:$0xff] %vm770_vm4, %v3922_v58 }
 0x11c   : > { %781 = vst.msk [vmem:[#allocation3 + $0x50] sm:$0xff] %vm770_vm4, %v3922_v58  ;;  %782 = vst.msk [vmem:[#allocation3 + $0x58] sm:$0xff] %vm770_vm4, %v3922_v58 }
 0x11d   : > { %v3704_v43 = vld [vmem:[#allocation2 + $0x78] sm:$0xff]   ;;  %783 = vst.msk [vmem:[#allocation3 + $0x60] sm:$0xff] %vm770_vm4, %v3922_v58  ;;  %784 = vst.msk [vmem:[#allocation3 + $0x68] sm:$0xff] %vm770_vm4, %v3922_v58 }
 0x11e   : > { %785 = vst.msk [vmem:[#allocation3 + $0x70] sm:$0xff] %vm770_vm4, %v3922_v58  ;;  %786 = vst.msk [vmem:[#allocation3 + $0x78] sm:$0xff] %vm770_vm4, %v3922_v58 }
 0x11f   : > { %v3703_v44 = vld [vmem:[#allocation2 + $0x70] sm:$0xff]   ;;  %787 = vst.msk [vmem:[#allocation3 + $0x80] sm:$0xff] %vm770_vm4, %v3922_v58  ;;  %788 = vst.msk [vmem:[#allocation3 + $0x88] sm:$0xff] %vm770_vm4, %v3922_v58 }
 0x120   : > { %3568 = vmatprep.mubr.msk.bf16.mxu1 %vm835_vm2, %v3703_v44  ;;  %789 = vst.msk [vmem:[#allocation3 + $0x90] sm:$0xff] %vm770_vm4, %v3922_v58  ;;  %790 = vst.msk [vmem:[#allocation3 + $0x98] sm:$0xff] %vm770_vm4, %v3922_v58 }
 0x121   : > { %3569 = vmatmul.mubr.msk.bf16.gmra.mxu1 %vm835_vm2, %v3704_v43  ;;  %791 = vst.msk [vmem:[#allocation3 + $0xa0] sm:$0xff] %vm770_vm4, %v3922_v58  ;;  %792 = vst.msk [vmem:[#allocation3 + $0xa8] sm:$0xff] %vm770_vm4, %v3922_v58 }
 0x122   : > { %793 = vst.msk [vmem:[#allocation3 + $0xb0] sm:$0xff] %vm770_vm4, %v3922_v58  ;;  %794 = vst.msk [vmem:[#allocation3 + $0xb8] sm:$0xff] %vm770_vm4, %v3922_v58 }
 0x123   : > { %795 = vst.msk [vmem:[#allocation3 + $0xc0] sm:$0xff] %vm770_vm4, %v3922_v58  ;;  %796 = vst.msk [vmem:[#allocation3 + $0xc8] sm:$0xff] %vm770_vm4, %v3922_v58 }
 0x124   : > { %797 = vst.msk [vmem:[#allocation3 + $0xd0] sm:$0xff] %vm770_vm4, %v3922_v58  ;;  %798 = vst.msk [vmem:[#allocation3 + $0xd8] sm:$0xff] %vm770_vm4, %v3922_v58 }
 0x125   : > { %799 = vst.msk [vmem:[#allocation3 + $0xe0] sm:$0xff] %vm770_vm4, %v3922_v58  ;;  %800 = vst.msk [vmem:[#allocation3 + $0xe8] sm:$0xff] %vm770_vm4, %v3922_v58 }
 0x126   : > { %801 = vst.msk [vmem:[#allocation3 + $0xf0] sm:$0xff] %vm770_vm4, %v3922_v58  ;;  %802 = vst.msk [vmem:[#allocation3 + $0xf8] sm:$0xff] %vm770_vm4, %v3922_v58 }
 0x127   : > { %813 = vst.msk [vmem:[#allocation4 + $0x50] sm:$0xff] %vm770_vm4, %v3924_v13  ;;  %814 = vst.msk [vmem:[#allocation4 + $0x58] sm:$0xff] %vm770_vm4, %v3924_v13 }
 0x128   : > { %815 = vst.msk [vmem:[#allocation4 + $0x60] sm:$0xff] %vm770_vm4, %v3924_v13  ;;  %816 = vst.msk [vmem:[#allocation4 + $0x68] sm:$0xff] %vm770_vm4, %v3924_v13 }
 0x129   : > { %817 = vst.msk [vmem:[#allocation4 + $0x70] sm:$0xff] %vm770_vm4, %v3924_v13  ;;  %818 = vst.msk [vmem:[#allocation4 + $0x78] sm:$0xff] %vm770_vm4, %v3924_v13 }
 0x12a   : > { %819 = vst.msk [vmem:[#allocation4 + $0x80] sm:$0xff] %vm770_vm4, %v3924_v13  ;;  %820 = vst.msk [vmem:[#allocation4 + $0x88] sm:$0xff] %vm770_vm4, %v3924_v13 }
 0x12b   : > { %821 = vst.msk [vmem:[#allocation4 + $0x90] sm:$0xff] %vm770_vm4, %v3924_v13  ;;  %822 = vst.msk [vmem:[#allocation4 + $0x98] sm:$0xff] %vm770_vm4, %v3924_v13 }
 0x12c   : > { %823 = vst.msk [vmem:[#allocation4 + $0xa0] sm:$0xff] %vm770_vm4, %v3924_v13  ;;  %824 = vst.msk [vmem:[#allocation4 + $0xa8] sm:$0xff] %vm770_vm4, %v3924_v13 }
 0x12d   : > { %825 = vst.msk [vmem:[#allocation4 + $0xb0] sm:$0xff] %vm770_vm4, %v3924_v13  ;;  %826 = vst.msk [vmem:[#allocation4 + $0xb8] sm:$0xff] %vm770_vm4, %v3924_v13 }
 0x12e   : > { %827 = vst.msk [vmem:[#allocation4 + $0xc0] sm:$0xff] %vm770_vm4, %v3924_v13  ;;  %828 = vst.msk [vmem:[#allocation4 + $0xc8] sm:$0xff] %vm770_vm4, %v3924_v13 }
 0x12f   : > { %829 = vst.msk [vmem:[#allocation4 + $0xd0] sm:$0xff] %vm770_vm4, %v3924_v13  ;;  %830 = vst.msk [vmem:[#allocation4 + $0xd8] sm:$0xff] %vm770_vm4, %v3924_v13 }
 0x130   : > { %831 = vst.msk [vmem:[#allocation4 + $0xe0] sm:$0xff] %vm770_vm4, %v3924_v13  ;;  %832 = vst.msk [vmem:[#allocation4 + $0xe8] sm:$0xff] %vm770_vm4, %v3924_v13 }
 0x131   : > { %833 = vst.msk [vmem:[#allocation4 + $0xf0] sm:$0xff] %vm770_vm4, %v3924_v13  ;;  %834 = vst.msk [vmem:[#allocation4 + $0xf8] sm:$0xff] %vm770_vm4, %v3924_v13 }
 0x132   : > { %837 = vst.msk [vmem:[#allocation5 + $0x8] sm:$0xff] %vm835_vm2, %v3924_v13  ;;  %838 = vst.msk [vmem:[#allocation5 + $0x10] sm:$0xff] %vm835_vm2, %v3924_v13 }
 0x133   : > { %839 = vst.msk [vmem:[#allocation5 + $0x18] sm:$0xff] %vm835_vm2, %v3924_v13  ;;  %841 = vst.msk [vmem:[#allocation5 + $0x28] sm:$0xff] %vm835_vm2, %v3924_v13 }
 0x134   : > { %842 = vst.msk [vmem:[#allocation5 + $0x30] sm:$0xff] %vm835_vm2, %v3924_v13  ;;  %843 = vst.msk [vmem:[#allocation5 + $0x38] sm:$0xff] %vm835_vm2, %v3924_v13 }
 0x135   : > { %844 = vst.msk [vmem:[#allocation5 + $0x40] sm:$0xff] %vm835_vm2, %v3924_v13  ;;  %845 = vst.msk [vmem:[#allocation5 + $0x48] sm:$0xff] %vm835_vm2, %v3924_v13 }
 0x136   : > { %846 = vst.msk [vmem:[#allocation5 + $0x50] sm:$0xff] %vm835_vm2, %v3924_v13  ;;  %847 = vst.msk [vmem:[#allocation5 + $0x58] sm:$0xff] %vm835_vm2, %v3924_v13 }
 0x137   : > { %848 = vst.msk [vmem:[#allocation5 + $0x60] sm:$0xff] %vm835_vm2, %v3924_v13  ;;  %849 = vst.msk [vmem:[#allocation5 + $0x68] sm:$0xff] %vm835_vm2, %v3924_v13 }
 0x138   : > { %850 = vst.msk [vmem:[#allocation5 + $0x70] sm:$0xff] %vm835_vm2, %v3924_v13  ;;  %851 = vst.msk [vmem:[#allocation5 + $0x78] sm:$0xff] %vm835_vm2, %v3924_v13 }
 0x139   : > { %852 = vst.msk [vmem:[#allocation5 + $0x80] sm:$0xff] %vm835_vm2, %v3924_v13  ;;  %853 = vst.msk [vmem:[#allocation5 + $0x88] sm:$0xff] %vm835_vm2, %v3924_v13 }
 0x13a   : > { %854 = vst.msk [vmem:[#allocation5 + $0x90] sm:$0xff] %vm835_vm2, %v3924_v13  ;;  %855 = vst.msk [vmem:[#allocation5 + $0x98] sm:$0xff] %vm835_vm2, %v3924_v13 }
 0x13b   : > { %856 = vst.msk [vmem:[#allocation5 + $0xa0] sm:$0xff] %vm835_vm2, %v3924_v13  ;;  %857 = vst.msk [vmem:[#allocation5 + $0xa8] sm:$0xff] %vm835_vm2, %v3924_v13 }
 0x13c   : > { %858 = vst.msk [vmem:[#allocation5 + $0xb0] sm:$0xff] %vm835_vm2, %v3924_v13  ;;  %859 = vst.msk [vmem:[#allocation5 + $0xb8] sm:$0xff] %vm835_vm2, %v3924_v13 }
 0x13d   : > { %860 = vst.msk [vmem:[#allocation5 + $0xc0] sm:$0xff] %vm835_vm2, %v3924_v13  ;;  %861 = vst.msk [vmem:[#allocation5 + $0xc8] sm:$0xff] %vm835_vm2, %v3924_v13 }
 0x13e   : > { %862 = vst.msk [vmem:[#allocation5 + $0xd0] sm:$0xff] %vm835_vm2, %v3924_v13  ;;  %863 = vst.msk [vmem:[#allocation5 + $0xd8] sm:$0xff] %vm835_vm2, %v3924_v13 }
 0x13f   : > { %864 = vst.msk [vmem:[#allocation5 + $0xe0] sm:$0xff] %vm835_vm2, %v3924_v13  ;;  %865 = vst.msk [vmem:[#allocation5 + $0xe8] sm:$0xff] %vm835_vm2, %v3924_v13 }
 0x140   : > { %866 = vst.msk [vmem:[#allocation5 + $0xf0] sm:$0xff] %vm835_vm2, %v3924_v13  ;;  %867 = vst.msk [vmem:[#allocation5 + $0xf8] sm:$0xff] %vm835_vm2, %v3924_v13 }
 0x1a9   : > { %v4181_v48 = vpop.f32.mrf.mxu1 }
 0x1aa   : > { %v1269_v49 = vsel %vm1262_vm5, %v4181_v48, -inf }
 0x1ab   : > { %1270 = vmax.xlane.f32.xlu1 %v1269_v49  ;;  %v4185_v50 = vpop.f32.mrf.mxu1 }
 0x1ac   : > { %v1263_v51 = vsel %vm1262_vm5, %v4185_v50, -inf }
 0x1ad   : > { %1264 = vmax.xlane.f32.xlu0 %v1263_v51  ;;  %v4189_v52 = vpop.f32.mrf.mxu1 }
 0x1ae   : > { %v1272_v53 = vsel %vm1262_vm5, %v4189_v52, -inf }
 0x1af   : > { %1273 = vmax.xlane.f32.xlu1 %v1272_v53  ;;  %v4193_v54 = vpop.f32.mrf.mxu1 }
 0x1b0   : > { %5353 = vst [vmem:[#allocation6_spill] sm:$0xff] %v4193_v54  ;;  %v1266_v55 = vsel %vm1262_vm5, %v4193_v54, -inf }
 0x1b1   : > { %1267 = vmax.xlane.f32.xlu0 %v1266_v55  ;;  %v4197_v57 = vpop.f32.mrf.mxu1  ;;  %v4443_v55 = vld [vmem:[#allocation3 + $0x10] sm:$0xff] }
 0x1b2   : > { %5354 = vst [vmem:[#allocation7_spill] sm:$0xff] %v4197_v57  ;;  %v1281_v60 = vsel %vm1262_vm5, %v4197_v57, -inf }
 0x1b3   : > { %v4199_v59 = vpop.f32.mrf.mxu1 }
 0x1b4   : > { %5355 = vst [vmem:[#allocation8_spill] sm:$0xff] %v4199_v59  ;;  %v1275_v1 = vsel %vm1262_vm5, %v4199_v59, -inf }
 0x1b5   : > { %1282 = vmax.xlane.f32.xlu0 %v1281_v60  ;;  %v4203_v61 = vpop.f32.mrf.mxu1 }
 0x1b6   : > { %5356 = vst [vmem:[#allocation9_spill] sm:$0xff] %v4203_v61  ;;  %v1284_v62 = vsel %vm1262_vm5, %v4203_v61, -inf  ;;  %v4667_v61 = vld [vmem:[#allocation3 + $0xf8] sm:$0xff] }
 0x1b7   : > { %1285 = vmax.xlane.f32.xlu1 %v1284_v62  ;;  %v4207_v0 = vpop.f32.mrf.mxu1  ;;  %v4445_v62 = vld [vmem:[#allocation3] sm:$0xff] }
 0x1b8   : > { %5357 = vst [vmem:[#allocation10_spill] sm:$0xff] %v4207_v0  ;;  %v1278_v3 = vsel %vm1262_vm5, %v4207_v0, -inf }
 0x1b9   : > { %1276 = vmax.xlane.f32.xlu0 %v1275_v1  ;;  %v4211_v2 = vpop.f32.mrf.mxu1 }
 0x1ba   : > { %5358 = vst [vmem:[#allocation11_spill] sm:$0xff] %v4211_v2  ;;  %v1293_v4 = vsel %vm1262_vm5, %v4211_v2, -inf  ;;  %v4649_v2 = vld [vmem:[#allocation3 + $0xc8] sm:$0xff] }
 0x1bb   : > { %1279 = vmax.xlane.f32.xlu1 %v1278_v3  ;;  %v4217_v5 = vpop.f32.mrf.mxu1  ;;  %v4450_v3 = vld [vmem:[#allocation3 + $0x18] sm:$0xff] }
 0x1bc   : > { %5359 = vst [vmem:[#allocation12_spill] sm:$0xff] %v4217_v5  ;;  %v1287_v8 = vsel %vm1262_vm5, %v4217_v5, -inf }
 0x1bd   : > { %1294 = vmax.xlane.f32.xlu0 %v1293_v4  ;;  %v4219_v6 = vpop.f32.mrf.mxu1  ;;  %v4540_v4 = vld [vmem:[#allocation3 + $0x60] sm:$0xff] }
 0x1be   : > { %5360 = vst [vmem:[#allocation13_spill] sm:$0xff] %v4219_v6  ;;  %v1296_v7 = vsel %vm1262_vm5, %v4219_v6, -inf }
 0x1bf   : > { %1297 = vmax.xlane.f32.xlu1 %v1296_v7  ;;  %v4225_v9 = vpop.f32.mrf.mxu1 }
 0x1c0   : > { %5361 = vst [vmem:[#allocation14_spill] sm:$0xff] %v4225_v9  ;;  %v4231_v11 = vsel %vm1262_vm5, %v4225_v9, -inf }
 0x1c1   : > { %1288 = vmax.xlane.f32.xlu0 %v1287_v8  ;;  %v4227_v10 = vpop.f32.mrf.mxu1 }
 0x1c2   : > { %5362 = vst [vmem:[#allocation15_spill] sm:$0xff] %v4227_v10  ;;  %v4235_v12 = vsel %vm1262_vm5, %v4227_v10, -inf }
 0x1c3   : > { %1291 = vmax.xlane.f32.xlu1 %v4231_v11  ;;  %v4366_v14 = vpop.f32.mrf.mxu1  ;;  %v4460_v11 = vld [vmem:[#allocation3 + $0x8] sm:$0xff] }
 0x1c4   : > { %5363 = vst [vmem:[#allocation16_spill] sm:$0xff] %v4366_v14  ;;  %v1299_v17 = vsel %vm1262_vm5, %v4366_v14, -inf }
 0x1c5   : > { %1306 = vmax.xlane.f32.xlu0 %v4235_v12  ;;  %v4369_v15 = vpop.f32.mrf.mxu1 }
 0x1c6   : > { %5364 = vst [vmem:[#allocation17_spill] sm:$0xff] %v4369_v15  ;;  %v1308_v16 = vsel %vm1262_vm5, %v4369_v15, -inf  ;;  %v4631_v15 = vld [vmem:[#allocation3 + $0xd8] sm:$0xff] }
 0x1c7   : > { %1309 = vmax.xlane.f32.xlu1 %v1308_v16  ;;  %v4375_v18 = vpop.f32.mrf.mxu1 }
 0x1c8   : > { %5365 = vst [vmem:[#allocation18_spill] sm:$0xff] %v4375_v18  ;;  %v1302_v20 = vsel %vm1262_vm5, %v4375_v18, -inf  ;;  %v4640_v18 = vld [vmem:[#allocation3 + $0xc0] sm:$0xff] }
 0x1c9   : > { %1300 = vmax.xlane.f32.xlu0 %v1299_v17  ;;  %v4377_v19 = vpop.f32.mrf.mxu1 }
 0x1ca   : > { %5366 = vst [vmem:[#allocation19_spill] sm:$0xff] %v4377_v19  ;;  %v1317_v21 = vsel %vm1262_vm5, %v4377_v19, -inf }
 0x1cb   : > { %1303 = vmax.xlane.f32.xlu1 %v1302_v20  ;;  %v4383_v22 = vpop.f32.mrf.mxu1 }
 0x1cc   : > { %5367 = vst [vmem:[#allocation20_spill] sm:$0xff] %v4383_v22  ;;  %v1311_v25 = vsel %vm1262_vm5, %v4383_v22, -inf  ;;  %v4613_v22 = vld [vmem:[#allocation3 + $0xa8] sm:$0xff] }
 0x1cd   : > { %1318 = vmax.xlane.f32.xlu0 %v1317_v21  ;;  %v4385_v23 = vpop.f32.mrf.mxu1  ;;  %v4478_v21 = vld [vmem:[#allocation3 + $0x30] sm:$0xff] }
 0x1ce   : > { %5368 = vst [vmem:[#allocation21_spill] sm:$0xff] %v4385_v23  ;;  %v1320_v24 = vsel %vm1262_vm5, %v4385_v23, -inf }
 0x1cf   : > { %1321 = vmax.xlane.f32.xlu1 %v1320_v24  ;;  %v4391_v26 = vpop.f32.mrf.mxu1  ;;  %v4547_v24 = vld [vmem:[#allocation3 + $0x68] sm:$0xff] }
 0x1d0   : > { %5369 = vst [vmem:[#allocation22_spill] sm:$0xff] %v4391_v26  ;;  %v1314_v28 = vsel %vm1262_vm5, %v4391_v26, -inf  ;;  %v4622_v26 = vld [vmem:[#allocation3 + $0xd0] sm:$0xff] }
 0x1d1   : > { %1312 = vmax.xlane.f32.xlu0 %v1311_v25  ;;  %v4393_v27 = vpop.f32.mrf.mxu1 }
 0x1d2   : > { %5370 = vst [vmem:[#allocation23_spill] sm:$0xff] %v4393_v27  ;;  %v1329_v29 = vsel %vm1262_vm5, %v4393_v27, -inf  ;;  %v4606_v27 = vld [vmem:[#allocation3 + $0xa0] sm:$0xff] }
 0x1d3   : > { %1315 = vmax.xlane.f32.xlu1 %v1314_v28  ;;  %v4399_v30 = vpop.f32.mrf.mxu1  ;;  %v4486_v28 = vld [vmem:[#allocation3 + $0x38] sm:$0xff] }
 0x1d4   : > { %5371 = vst [vmem:[#allocation24_spill] sm:$0xff] %v4399_v30  ;;  %v1323_v33 = vsel %vm1262_vm5, %v4399_v30, -inf  ;;  %v4597_v30 = vld [vmem:[#allocation3 + $0xb8] sm:$0xff] }
 0x1d5   : > { %v4401_v31 = vpop.f32.mrf.mxu1  ;;  %1330 = vmax.xlane.f32.xlu0 %v1329_v29 }
 0x1d6   : > { %5372 = vst [vmem:[#allocation25_spill] sm:$0xff] %v4401_v31  ;;  %v1332_v32 = vsel %vm1262_vm5, %v4401_v31, -inf }
 0x1d7   : > { %1333 = vmax.xlane.f32.xlu1 %v1332_v32  ;;  %v4407_v34 = vpop.f32.mrf.mxu1 }
 0x1d8   : > { %5373 = vst [vmem:[#allocation26_spill] sm:$0xff] %v4407_v34  ;;  %v1326_v35 = vsel %vm1262_vm5, %v4407_v34, -inf }
 0x1d9   : > { %v4411_v36 = vpop.f32.mrf.mxu1  ;;  %1324 = vmax.xlane.f32.xlu0 %v1323_v33  ;;  %v1234_v33 = vld [vmem:[#allocation3 + $0x20] sm:$0xff] }
 0x1da   : > { %5374 = vst [vmem:[#allocation27_spill] sm:$0xff] %v4411_v36  ;;  %v1341_v37 = vsel %vm1262_vm5, %v4411_v36, -inf  ;;  %v4581_v36 = vld [vmem:[#allocation3 + $0x88] sm:$0xff] }
 0x1db   : > { %1327 = vmax.xlane.f32.xlu1 %v1326_v35  ;;  %v4415_v38 = vpop.f32.mrf.mxu1 }
 0x1dc   : > { %5375 = vst [vmem:[#allocation28_spill] sm:$0xff] %v4415_v38  ;;  %v1335_v41 = vsel %vm1262_vm5, %v4415_v38, -inf  ;;  %v4574_v38 = vld [vmem:[#allocation3 + $0x80] sm:$0xff] }
 0x1dd   : > { %v4417_v39 = vpop.f32.mrf.mxu1  ;;  %1342 = vmax.xlane.f32.xlu0 %v1341_v37 }
 0x1de   : > { %5376 = vst [vmem:[#allocation29_spill] sm:$0xff] %v4417_v39  ;;  %v1344_v40 = vsel %vm1262_vm5, %v4417_v39, -inf }
 0x1df   : > { %1345 = vmax.xlane.f32.xlu1 %v1344_v40  ;;  %v4423_v42 = vpop.f32.mrf.mxu1  ;;  %v1235_v40 = vld [vmem:[#allocation3 + $0x28] sm:$0xff] }
 0x1e0   : > { %5377 = vst [vmem:[#allocation30_spill] sm:$0xff] %v4423_v42  ;;  %v1338_v43 = vsel %vm1262_vm5, %v4423_v42, -inf }
 0x1e1   : > { %v4427_v44 = vpop.f32.mrf.mxu1  ;;  %1336 = vmax.xlane.f32.xlu0 %v1335_v41 }
 0x1e2   : > { %5378 = vst [vmem:[#allocation31_spill] sm:$0xff] %v4427_v44  ;;  %v1353_v45 = vsel %vm1262_vm5, %v4427_v44, -inf }
 0x1e3   : > { %1339 = vmax.xlane.f32.xlu1 %v1338_v43  ;;  %v4431_v46 = vpop.f32.mrf.mxu1  ;;  %v4500_v43 = vld [vmem:[#allocation3 + $0x50] sm:$0xff] }
 0x1e4   : > { %5379 = vst [vmem:[#allocation32_spill] sm:$0xff] %v4431_v46  ;;  %v1347_v49 = vsel %vm1262_vm5, %v4431_v46, -inf }
 0x1e5   : > { %v4433_v58 = vpop.f32.mrf.mxu1  ;;  %1354 = vmax.xlane.f32.xlu0 %v1353_v45 }
 0x1e6   : > { %5380 = vst [vmem:[#allocation33_spill] sm:$0xff] %v4433_v58  ;;  %v1356_v47 = vsel %vm1262_vm5, %v4433_v58, -inf }
 0x1e7   : > { %1357 = vmax.xlane.f32.xlu1 %v1356_v47  ;;  %v4439_v51 = vpop.f32.mrf.mxu1 }
 0x1e8   : > { %5381 = vst [vmem:[#allocation34_spill] sm:$0xff] %v4439_v51  ;;  %v1350_v53 = vsel %vm1262_vm5, %v4439_v51, -inf  ;;  %v4565_v51 = vld [vmem:[#allocation3 + $0x98] sm:$0xff] }
 0x1e9   : > { %1348 = vmax.xlane.f32.xlu0 %v1347_v49 }
 0x1eb   : > { %1351 = vmax.xlane.f32.xlu1 %v1350_v53  ;;  %v4503_v53 = vld [vmem:[#allocation3 + $0x58] sm:$0xff] }
 0x234   : > { %v1271_v60 = vpop.xlane.xlu1 %1270 }
 0x235   : > { %v4448_v63 = vmax.f32 %v4443_v55, %v1271_v60 }
 0x236   : > { %v1265_v1 = vpop.xlane.xlu0 %1264 }
 0x237   : > { %2495 = vst.msk [vmem:[#allocation3 + $0x10] sm:$0xff] %vm770_vm4, %v4448_v63  ;;  %v4457_v7 = vmax.f32 %v4445_v62, %v1265_v1  ;;  %1499 = vperm.xlu1 %3683, %v4448_v63  }
 0x238   : > { %v1274_v8 = vpop.xlane.xlu1 %1273 }
 0x239   : > { %2493 = vst.msk [vmem:[#allocation3] sm:$0xff] %vm770_vm4, %v4457_v7  ;;  %v4467_v13 = vmax.f32 %v4450_v3, %v1274_v8  ;;  %1489 = vperm.xlu0 %3684, %v4457_v7  }
 0x23a   : > { %v1268_v16 = vpop.xlane.xlu0 %1267 }
 0x23b   : > { %2496 = vst.msk [vmem:[#allocation3 + $0x18] sm:$0xff] %vm770_vm4, %v4467_v13  ;;  %v4475_v20 = vmax.f32 %v4460_v11, %v1268_v16  ;;  %1504 = vperm.xlu1 %3683, %v4467_v13   ;;  %v4509_v16 = vld [vmem:[#allocation3 + $0x40] sm:$0xff] }
 0x23d   : > { %2494 = vst.msk [vmem:[#allocation3 + $0x8] sm:$0xff] %vm770_vm4, %v4475_v20  ;;  %2208 = vrot.lane.b32.xlu0 %v4055_v56, %s3921_s11 }
 0x23e   : > { %v1283_v25 = vpop.xlane.xlu0 %1282 }
 0x23f   : > { %v4489_v29 = vmax.f32 %v4478_v21, %v1283_v25  ;;  %1494 = vperm.xlu1 %3683, %v4475_v20  }
 0x240   : > { %v1286_v32 = vpop.xlane.xlu1 %1285 }
 0x241   : > { %2499 = vst.msk [vmem:[#allocation3 + $0x30] sm:$0xff] %vm770_vm4, %v4489_v29  ;;  %v4495_v35 = vmax.f32 %v4486_v28, %v1286_v32 }
 0x242   : > { %v1277_v37 = vpop.xlane.xlu0 %1276 }
 0x243   : > { %2500 = vst.msk [vmem:[#allocation3 + $0x38] sm:$0xff] %vm770_vm4, %v4495_v35  ;;  %v1363_v56 = vmax.f32 %v1234_v33, %v1277_v37  ;;  %1519 = vperm.xlu1 %3683, %v4489_v29  }
 0x244   : > { %v1280_v41 = vpop.xlane.xlu1 %1279 }
 0x245   : > { %v1395_v45 = vsub.f32 %v1234_v33, %v1363_v56  ;;  %2497 = vst.msk [vmem:[#allocation3 + $0x20] sm:$0xff] %vm770_vm4, %v1363_v56  ;;  %v1364_v47 = vmax.f32 %v1235_v40, %v1280_v41  ;;  %v4516_v33 = vld [vmem:[#allocation3 + $0x48] sm:$0xff]  ;;  %v4525_v41 = vld [vmem:[#allocation3 + $0x70] sm:$0xff] }
 0x246   : > { %v1295_v49 = vpop.xlane.xlu0 %1294 }
 0x247   : > { %v1431_v60 = vmul.f32 1.442695, %v1395_v45  ;;  %2498 = vst.msk [vmem:[#allocation3 + $0x28] sm:$0xff] %vm770_vm4, %v1364_v47  ;;  %v4507_v1 = vmax.f32 %v4500_v43, %v1295_v49  ;;  %1509 = vperm.xlu1 %3683, %v1363_v56   ;;  %v1396_v12 = vsub.f32 %v1235_v40, %v1364_v47 }
 0x248   : > { %v1298_v8 = vpop.xlane.xlu1 %1297 }
 0x249   : > { %3705 = vpow2.f32 %v1431_v60  ;;  %2503 = vst.msk [vmem:[#allocation3 + $0x50] sm:$0xff] %vm770_vm4, %v4507_v1  ;;  %v4514_v25 = vmax.f32 %v4503_v53, %v1298_v8  ;;  %v4532_v60 = vld [vmem:[#allocation3 + $0x78] sm:$0xff]  ;;  %v1433_v46 = vmul.f32 1.442695, %v1396_v12 }
 0x24a   : > { %v1289_v32 = vpop.xlane.xlu0 %1288 }
 0x24b   : > { %2504 = vst.msk [vmem:[#allocation3 + $0x58] sm:$0xff] %vm770_vm4, %v4514_v25  ;;  %v4521_v37 = vmax.f32 %v4509_v16, %v1289_v32  ;;  %1544 = vperm.xlu0 %3684, %v4514_v25   ;;  %1524 = vperm.xlu1 %3683, %v4495_v35   ;;  %3707 = vpow2.f32 %v1433_v46 }
 0x24c   : > { %v1292_v56 = vpop.xlane.xlu1 %1291 }
 0x24d   : > { %2501 = vst.msk [vmem:[#allocation3 + $0x40] sm:$0xff] %vm770_vm4, %v4521_v37  ;;  %v4530_v45 = vmax.f32 %v4516_v33, %v1292_v56 }
 0x24e   : > { %v1307_v49 = vpop.xlane.xlu0 %1306 }
 0x24f   : > { %2502 = vst.msk [vmem:[#allocation3 + $0x48] sm:$0xff] %vm770_vm4, %v4530_v45  ;;  %v4537_v8 = vmax.f32 %v4525_v41, %v1307_v49  ;;  %1534 = vperm.xlu0 %3684, %v4530_v45   ;;  %1514 = vperm.xlu1 %3683, %v1364_v47   ;;  %v4556_v47 = vld [vmem:[#allocation3 + $0x90] sm:$0xff] }
 0x250   : > { %v1310_v32 = vpop.xlane.xlu1 %1309 }
 0x251   : > { %2507 = vst.msk [vmem:[#allocation3 + $0x70] sm:$0xff] %vm770_vm4, %v4537_v8  ;;  %v4545_v56 = vmax.f32 %v4532_v60, %v1310_v32 }
 0x252   : > { %v1301_v17 = vpop.xlane.xlu0 %1300 }
 0x253   : > { %2508 = vst.msk [vmem:[#allocation3 + $0x78] sm:$0xff] %vm770_vm4, %v4545_v56  ;;  %v4552_v49 = vmax.f32 %v4540_v4, %v1301_v17  ;;  %1564 = vperm.xlu0 %3684, %v4545_v56   ;;  %1539 = vperm.xlu1 %3683, %v4507_v1  }
 0x254   : > { %v1304_v40 = vpop.xlane.xlu1 %1303 }
 0x255   : > { %2505 = vst.msk [vmem:[#allocation3 + $0x60] sm:$0xff] %vm770_vm4, %v4552_v49  ;;  %v4561_v32 = vmax.f32 %v4547_v24, %v1304_v40 }
 0x256   : > { %v4563_v58 = vpop.eup %3705  ;;  %v1319_v44 = vpop.xlane.xlu0 %1318 }
 0x257   : > { %5382 = vst [vmem:[#allocation35_spill] sm:$0xff] %v4563_v58  ;;  %2506 = vst.msk [vmem:[#allocation3 + $0x68] sm:$0xff] %vm770_vm4, %v4561_v32  ;;  %v4570_v17 = vmax.f32 %v4556_v47, %v1319_v44  ;;  %2022 = vperm.xlu0 %3684, %v4563_v58   ;;  %1529 = vperm.xlu1 %3683, %v4521_v37   ;;  %v4590_v58 = vld [vmem:[#allocation3 + $0xb0] sm:$0xff] }
 0x258   : > { %v1322_v12 = vpop.xlane.xlu1 %1321  ;;  %v4629_v19 = vpop.eup %3707 }
 0x259   : > { %2511 = vst.msk [vmem:[#allocation3 + $0x90] sm:$0xff] %vm770_vm4, %v4570_v17  ;;  %v4579_v40 = vmax.f32 %v4565_v51, %v1322_v12  ;;  %5383 = vst [vmem:[#allocation36_spill] sm:$0xff] %v4629_v19 }
 0x25a   : > { %v1313_v39 = vpop.xlane.xlu0 %1312 }
 0x25b   : > { %2512 = vst.msk [vmem:[#allocation3 + $0x98] sm:$0xff] %vm770_vm4, %v4579_v40  ;;  %v4586_v44 = vmax.f32 %v4574_v38, %v1313_v39  ;;  %1554 = vperm.xlu0 %3684, %v4561_v32   ;;  %1559 = vperm.xlu1 %3683, %v4537_v8  }
 0x25c   : > { %v1316_v46 = vpop.xlane.xlu1 %1315 }
 0x25d   : > { %2509 = vst.msk [vmem:[#allocation3 + $0x80] sm:$0xff] %vm770_vm4, %v4586_v44  ;;  %v4595_v12 = vmax.f32 %v4581_v36, %v1316_v46 }
 0x25e   : > { %v1331_v42 = vpop.xlane.xlu0 %1330 }
 0x25f   : > { %2510 = vst.msk [vmem:[#allocation3 + $0x88] sm:$0xff] %vm770_vm4, %v4595_v12  ;;  %1584 = vperm.xlu0 %3684, %v4579_v40   ;;  %1549 = vperm.xlu1 %3683, %v4552_v49   ;;  %v4604_v39 = vmax.f32 %v4590_v58, %v1331_v42 }
 0x260   : > { %v1334_v31 = vpop.xlane.xlu1 %1333 }
 0x261   : > { %2515 = vst.msk [vmem:[#allocation3 + $0xb0] sm:$0xff] %vm770_vm4, %v4604_v39  ;;  %v4611_v46 = vmax.f32 %v4597_v30, %v1334_v31 }
 0x262   : > { %v1325_v34 = vpop.xlane.xlu0 %1324 }
 0x263   : > { %2516 = vst.msk [vmem:[#allocation3 + $0xb8] sm:$0xff] %vm770_vm4, %v4611_v46  ;;  %1574 = vperm.xlu0 %3684, %v4595_v12   ;;  %1579 = vperm.xlu1 %3683, %v4570_v17   ;;  %v4620_v42 = vmax.f32 %v4606_v27, %v1325_v34 }
 0x264   : > { %v1328_v23 = vpop.xlane.xlu1 %1327 }
 0x265   : > { %2513 = vst.msk [vmem:[#allocation3 + $0xa0] sm:$0xff] %vm770_vm4, %v4620_v42  ;;  %v4627_v31 = vmax.f32 %v4613_v22, %v1328_v23  ;;  %v1398_v23 = vsub.f32 %v4486_v28, %v4495_v35  ;;  %v4658_v35 = vld [vmem:[#allocation3 + $0xf0] sm:$0xff] }
 0x266   : > { %v1343_v14 = vpop.xlane.xlu0 %1342 }
 0x267   : > { %2514 = vst.msk [vmem:[#allocation3 + $0xa8] sm:$0xff] %vm770_vm4, %v4627_v31  ;;  %1604 = vperm.xlu0 %3684, %v4611_v46   ;;  %2027 = vperm.xlu1 %3683, %v4629_v19   ;;  %v4638_v34 = vmax.f32 %v4622_v26, %v1343_v14  ;;  %v1437_v19 = vmul.f32 1.442695, %v1398_v23  ;;  %v4678_v23 = vld [vmem:[#allocation3 + $0xe0] sm:$0xff] }
 0x268   : > { %v1346_v10 = vpop.xlane.xlu1 %1345 }
 0x269   : > { %2519 = vst.msk [vmem:[#allocation3 + $0xd0] sm:$0xff] %vm770_vm4, %v4638_v34  ;;  %v4647_v5 = vmax.f32 %v4631_v15, %v1346_v10  ;;  %v1400_v10 = vsub.f32 %v4516_v33, %v4530_v45  ;;  %v1397_v33 = vsub.f32 %v4478_v21, %v4489_v29  ;;  %3709 = vpow2.f32 %v1437_v19 }
 0x26a   : > { %v1337_v6 = vpop.xlane.xlu0 %1336 }
 0x26b   : > { %2520 = vst.msk [vmem:[#allocation3 + $0xd8] sm:$0xff] %vm770_vm4, %v4647_v5  ;;  %1594 = vperm.xlu0 %3684, %v4627_v31   ;;  %1569 = vperm.xlu1 %3683, %v4586_v44   ;;  %v4656_v14 = vmax.f32 %v4640_v18, %v1337_v6  ;;  %v1441_v59 = vmul.f32 1.442695, %v1400_v10  ;;  %v1435_v29 = vmul.f32 1.442695, %v1397_v33 }
 0x26c   : > { %v1340_v28 = vpop.xlane.xlu1 %1339 }
 0x26d   : > { %2517 = vst.msk [vmem:[#allocation3 + $0xc0] sm:$0xff] %vm770_vm4, %v4656_v14  ;;  %v4665_v9 = vmax.f32 %v4649_v2, %v1340_v28  ;;  %v1402_v28 = vsub.f32 %v4503_v53, %v4514_v25  ;;  %v1399_v53 = vsub.f32 %v4509_v16, %v4521_v37  ;;  %3711 = vpow2.f32 %v1441_v59 }
 0x26e   : > { %v1355_v0 = vpop.xlane.xlu0 %1354  ;;  %3713 = vpow2.f32 %v1435_v29 }
 0x26f   : > { %2518 = vst.msk [vmem:[#allocation3 + $0xc8] sm:$0xff] %vm770_vm4, %v4665_v9  ;;  %1624 = vperm.xlu0 %3684, %v4647_v5   ;;  %1599 = vperm.xlu1 %3683, %v4604_v39   ;;  %v4674_v6 = vmax.f32 %v4658_v35, %v1355_v0  ;;  %v4687_v0 = vld [vmem:[#allocation3 + $0xe8] sm:$0xff]  ;;  %v1445_v10 = vmul.f32 1.442695, %v1402_v28  ;;  %v1439_v59 = vmul.f32 1.442695, %v1399_v53 }
 0x270   : > { %v1358_v45 = vpop.xlane.xlu1 %1357 }
 0x271   : > { %2523 = vst.msk [vmem:[#allocation3 + $0xf0] sm:$0xff] %vm770_vm4, %v4674_v6  ;;  %v4685_v57 = vmax.f32 %v4667_v61, %v1358_v45  ;;  %v1404_v45 = vsub.f32 %v4547_v24, %v4561_v32  ;;  %3715 = vpow2.f32 %v1445_v10  ;;  %v1406_v24 = vsub.f32 %v4532_v60, %v4545_v56 }
 0x272   : > { %v1349_v54 = vpop.xlane.xlu0 %1348  ;;  %3717 = vpow2.f32 %v1439_v59  ;;  %v1403_v32 = vsub.f32 %v4540_v4, %v4552_v49  ;;  %v1405_v60 = vsub.f32 %v4525_v41, %v4537_v8  ;;  %v1410_v4 = vsub.f32 %v4565_v51, %v4579_v40 }
 0x273   : > { %2524 = vst.msk [vmem:[#allocation3 + $0xf8] sm:$0xff] %vm770_vm4, %v4685_v57  ;;  %1614 = vperm.xlu0 %3684, %v4665_v9   ;;  %1589 = vperm.xlu1 %3683, %v4620_v42   ;;  %v4696_v19 = vmax.f32 %v4678_v23, %v1349_v54  ;;  %v1401_v54 = vsub.f32 %v4500_v43, %v4507_v1  ;;  %v1449_v16 = vmul.f32 1.442695, %v1404_v45  ;;  %v1453_v33 = vmul.f32 1.442695, %v1406_v24 }
 0x274   : > { %v1352_v25 = vpop.xlane.xlu1 %1351  ;;  %v1408_v43 = vsub.f32 %v4581_v36, %v4595_v12  ;;  %v1447_v56 = vmul.f32 1.442695, %v1403_v32  ;;  %v1451_v36 = vmul.f32 1.442695, %v1405_v60  ;;  %v1461_v29 = vmul.f32 1.442695, %v1410_v4 }
 0x275   : > { %2521 = vst.msk [vmem:[#allocation3 + $0xe0] sm:$0xff] %vm770_vm4, %v4696_v19  ;;  %v4705_v21 = vmax.f32 %v4687_v0, %v1352_v25  ;;  %v1443_v37 = vmul.f32 1.442695, %v1401_v54  ;;  %3719 = vpow2.f32 %v1449_v16  ;;  %v1407_v41 = vsub.f32 %v4574_v38, %v4586_v44 }
 0x276   : > { %v4721_v1 = vpop.eup %3709  ;;  %v1457_v49 = vmul.f32 1.442695, %v1408_v43  ;;  %v5384_v51 = vsub.f32 %v4460_v11, %v4475_v20  ;;  %v1409_v25 = vsub.f32 %v4556_v47, %v4570_v17  ;;  %v5385_v44 = vsub.f32 %v4450_v3, %v4467_v13 }
 0x277   : > { %2522 = vst.msk [vmem:[#allocation3 + $0xe8] sm:$0xff] %vm770_vm4, %v4705_v21  ;;  %1644 = vperm.xlu0 %3684, %v4685_v57   ;;  %1619 = vperm.xlu1 %3683, %v4638_v34   ;;  %3721 = vpow2.f32 %v1443_v37  ;;  %v1455_v10 = vmul.f32 1.442695, %v1407_v41  ;;  %v1414_v11 = vsub.f32 %v4597_v30, %v4611_v46  ;;  %v1411_v47 = vsub.f32 %v4606_v27, %v4620_v42 }
 0x278   : > { %3723 = vpow2.f32 %v1453_v33  ;;  %v1425_v40 = vmul.f32 1.442695, %v5384_v51  ;;  %v1429_v45 = vmul.f32 1.442695, %v5385_v44  ;;  %v1459_v54 = vmul.f32 1.442695, %v1409_v25 }
 0x279   : > { %3725 = vpow2.f32 %v1447_v56  ;;  %v1413_v3 = vsub.f32 %v4590_v58, %v4604_v39  ;;  %v1469_v13 = vmul.f32 1.442695, %v1414_v11  ;;  %v1463_v30 = vmul.f32 1.442695, %v1411_v47 }
 0x27a   : > { %v4729_v28 = vpop.eup %3711  ;;  %3727 = vpow2.f32 %v1457_v49  ;;  %v1412_v46 = vsub.f32 %v4613_v22, %v4627_v31  ;;  %v1418_v39 = vsub.f32 %v4631_v15, %v4647_v5  ;;  %v5386_v22 = vsub.f32 %v4445_v62, %v4457_v7 }
 0x27b   : > { %1609 = vperm.xlu1 %3683, %v4656_v14   ;;  %1634 = vperm.xlu0 %3684, %v4705_v21   ;;  %v4733_v12 = vpop.eup %3713  ;;  %3729 = vpow2.f32 %v1451_v36  ;;  %v1467_v27 = vmul.f32 1.442695, %v1413_v3  ;;  %v1416_v33 = vsub.f32 %v4649_v2, %v4665_v9  ;;  %v5387_v5 = vsub.f32 %v4443_v55, %v4448_v63 }
 0x27c   : > { %3731 = vpow2.f32 %v1461_v29  ;;  %v1465_v58 = vmul.f32 1.442695, %v1412_v46  ;;  %v1423_v31 = vmul.f32 1.442695, %v5386_v22  ;;  %v1477_v32 = vmul.f32 1.442695, %v1418_v39 }
 0x27d   : > { %3733 = vpow2.f32 %v1425_v40  ;;  %v1427_v15 = vmul.f32 1.442695, %v5387_v5  ;;  %v1417_v62 = vsub.f32 %v4622_v26, %v4638_v34  ;;  %v1473_v60 = vmul.f32 1.442695, %v1416_v33  ;;  %v5388_v46 = vld [vmem:[#allocation6_spill] sm:$0xff]  ;;  %v5390_v33 = vld [vmem:[#allocation8_spill] sm:$0xff] }
 0x27e   : > { %v4737_v8 = vpop.eup %3715  ;;  %3735 = vpow2.f32 %v1455_v10  ;;  %v1420_v2 = vsub.f32 %v4687_v0, %v4705_v21  ;;  %v1415_v26 = vsub.f32 %v4640_v18, %v4656_v14  ;;  %v1421_v4 = vsub.f32 %v4658_v35, %v4674_v6 }
 0x27f   : > { %1639 = vperm.xlu1 %3683, %v4674_v6   ;;  %2037 = vperm.xlu0 %3684, %v4721_v1   ;;  %v4744_v53 = vpop.eup %3717  ;;  %3737 = vpow2.f32 %v1429_v45  ;;  %v1475_v55 = vmul.f32 1.442695, %v1417_v62  ;;  %v1419_v36 = vsub.f32 %v4678_v23, %v4696_v19 }
 0x280   : > { %3739 = vpow2.f32 %v1459_v54  ;;  %v1481_v34 = vmul.f32 1.442695, %v1420_v2  ;;  %v1471_v21 = vmul.f32 1.442695, %v1415_v26  ;;  %v1483_v14 = vmul.f32 1.442695, %v1421_v4 }
 0x281   : > { %3741 = vpow2.f32 %v1469_v13  ;;  %v1479_v6 = vmul.f32 1.442695, %v1419_v36  ;;  %v5392_v36 = vld [vmem:[#allocation10_spill] sm:$0xff] }
 0x282   : > { %v4748_v38 = vpop.eup %3719  ;;  %3743 = vpow2.f32 %v1463_v30 }
 0x283   : > { %1629 = vperm.xlu1 %3683, %v4696_v19   ;;  %2047 = vperm.xlu0 %3684, %v4729_v28   ;;  %3745 = vpow2.f32 %v1467_v27 }
 0x284   : > { %v4757_v20 = vpop.eup %3721  ;;  %3747 = vpow2.f32 %v1465_v58 }
 0x285   : > { %v4761_v17 = vpop.eup %3723  ;;  %3749 = vpow2.f32 %v1423_v31 }
 0x286   : > { %v4767_v59 = vpop.eup %3725  ;;  %3751 = vpow2.f32 %v1477_v32 }
 0x287   : > { %2032 = vperm.xlu1 %3683, %v4733_v12   ;;  %2057 = vperm.xlu0 %3684, %v4737_v8   ;;  %v4771_v24 = vpop.eup %3727  ;;  %3753 = vpow2.f32 %v1427_v15 }
 0x288   : > { %v4775_v42 = vpop.eup %3729  ;;  %3755 = vpow2.f32 %v1473_v60  ;;  %v5391_v60 = vld [vmem:[#allocation9_spill] sm:$0xff] }
 0x289   : > { %v4779_v16 = vpop.eup %3731  ;;  %3757 = vpow2.f32 %v1475_v55 }
 0x28a   : > { %v4786_v37 = vpop.eup %3733  ;;  %3759 = vpow2.f32 %v1481_v34 }
 0x28b   : > { %2042 = vperm.xlu1 %3683, %v4744_v53   ;;  %2067 = vperm.xlu0 %3684, %v4748_v38   ;;  %v4790_v43 = vpop.eup %3735  ;;  %3761 = vpow2.f32 %v1471_v21 }
 0x28c   : > { %v4799_v7 = vpop.eup %3737  ;;  %3763 = vpow2.f32 %v1483_v14 }
 0x28d   : > { %v4803_v9 = vpop.eup %3739  ;;  %3765 = vpow2.f32 %v1479_v6 }
 0x28e   : > { %v4807_v63 = vpop.eup %3741 }
 0x28f   : > { %2052 = vperm.xlu1 %3683, %v4757_v20   ;;  %2077 = vperm.xlu0 %3684, %v4761_v17   ;;  %v4811_v56 = vpop.eup %3743 }
 0x290   : > { %v4815_v0 = vpop.eup %3745 }
 0x291   : > { %v4819_v49 = vpop.eup %3747 }
 0x292   : > { %v4823_v18 = vpop.eup %3749 }
 0x293   : > { %2062 = vperm.xlu1 %3683, %v4767_v59   ;;  %2087 = vperm.xlu0 %3684, %v4771_v24   ;;  %v4827_v29 = vpop.eup %3751 }
 0x294   : > { %v4831_v35 = vpop.eup %3753 }
 0x295   : > { %v4833_v41 = vpop.eup %3755 }
 0x296   : > { %v4837_v51 = vpop.eup %3757 }
 0x297   : > { %2072 = vperm.xlu1 %3683, %v4775_v42   ;;  %2097 = vperm.xlu0 %3684, %v4779_v16   ;;  %v4839_v23 = vpop.eup %3759 }
 0x298   : > { %v4844_v10 = vpop.eup %3761 }
 0x299   : > { %v4849_v3 = vpop.eup %3763 }
 0x29b   : > { %2082 = vperm.xlu1 %3683, %v4790_v43   ;;  %2007 = vperm.xlu0 %3684, %v4786_v37  }
 0x29f   : > { %2092 = vperm.xlu1 %3683, %v4803_v9   ;;  %2017 = vperm.xlu0 %3684, %v4799_v7  }
 0x2a3   : > { %2102 = vperm.xlu1 %3683, %v4811_v56   ;;  %2117 = vperm.xlu0 %3684, %v4807_v63  }
 0x2a7   : > { %2112 = vperm.xlu1 %3683, %v4815_v0   ;;  %2107 = vperm.xlu0 %3684, %v4819_v49  }
 0x2ab   : > { %2002 = vperm.xlu1 %3683, %v4823_v18   ;;  %2137 = vperm.xlu0 %3684, %v4827_v29  }
 0x2af   : > { %2012 = vperm.xlu1 %3683, %v4831_v35   ;;  %2127 = vperm.xlu0 %3684, %v4833_v41  }
 0x2b2   : > { %v1500_v19 = vpop.permute.xlu1 %1499 }
 0x2b3   : > { %2132 = vperm.xlu1 %3683, %v4837_v51   ;;  %2147 = vperm.xlu0 %3684, %v4839_v23   ;;  %v1649_v11 = vsub.f32 %v4181_v48, %v1500_v19  ;;  %v5389_v48 = vld [vmem:[#allocation7_spill] sm:$0xff] }
 0x2b4   : > { %v1490_v40 = vpop.permute.xlu0 %1489 }
 0x2b5   : > { %v1647_v25 = vsub.f32 %v4185_v50, %v1490_v40  ;;  %v1683_v50 = vmul.f32 1.442695, %v1649_v11  ;;  %v5393_v11 = vld [vmem:[#allocation14_spill] sm:$0xff] }
 0x2b6   : > { %v1505_v44 = vpop.permute.xlu1 %1504 }
 0x2b7   : > { %v1650_v45 = vsub.f32 %v4189_v52, %v1505_v44  ;;  %2122 = vperm.xlu1 %3683, %v4844_v10   ;;  %v1679_v47 = vmul.f32 1.442695, %v1647_v25  ;;  %v4853_v52 = vpop.eup %3765 }
 0x2b8   : > { %v2209_v54 = vpop.permute.xlu0 %2208 }
 0x2b9   : > { %3578 = vmatprep.subr.bf16.mxu0 %v2209_v54  ;;  %v1685_v13 = vmul.f32 1.442695, %v1650_v45  ;;  %3767 = vpow2.f32 %v1679_v47 }
 0x2ba   : > { %v1495_v30 = vpop.permute.xlu1 %1494  ;;  %3579 = vmatpush3.bf16.msra.mxu0 %v2209_v54 }
 0x2bb   : > { %v1648_v27 = vsub.f32 %v5388_v46, %v1495_v30  ;;  %2152 = vperm.xlu1 %3683, %v4849_v3   ;;  %3769 = vpow2.f32 %v1685_v13  ;;  %v5394_v30 = vld [vmem:[#allocation11_spill] sm:$0xff] }
 0x2bd   : > { %v1681_v58 = vmul.f32 1.442695, %v1648_v27  ;;  %v5395_v27 = vld [vmem:[#allocation13_spill] sm:$0xff] }
 0x2be   : > { %v1520_v39 = vpop.permute.xlu1 %1519 }
 0x2bf   : > { %3771 = vpow2.f32 %v1681_v58  ;;  %2142 = vperm.xlu1 %3683, %v4853_v52   ;;  %v1653_v22 = vsub.f32 %v5389_v48, %v1520_v39 }
 0x2c0   : > { %3773 = vpow2.f32 %v1683_v50 }
 0x2c1   : > { %v1691_v32 = vmul.f32 1.442695, %v1653_v22 }
 0x2c2   : > { %v1510_v31 = vpop.permute.xlu1 %1509 }
 0x2c3   : > { %v1651_v5 = vsub.f32 %v5390_v33, %v1510_v31  ;;  %3775 = vpow2.f32 %v1691_v32  ;;  %v5396_v32 = vld [vmem:[#allocation12_spill] sm:$0xff] }
 0x2c5   : > { %v1687_v26 = vmul.f32 1.442695, %v1651_v5 }
 0x2c6   : > { %v1545_v15 = vpop.permute.xlu0 %1544  ;;  %v1525_v62 = vpop.permute.xlu1 %1524 }
 0x2c7   : > { %v1654_v2 = vsub.f32 %v5391_v60, %v1525_v62  ;;  %v3768_v55 = vpop.eup %3767  ;;  %3777 = vpow2.f32 %v1687_v26  ;;  %v1658_v50 = vsub.f32 %v5395_v27, %v1545_v15 }
 0x2c8   : > { %v4859_v4 = vpop.eup %3769  ;;  %v1807_v60 = vsel %vm1262_vm5, %v3768_v55, 0.0 }
 0x2c9   : > { %v1693_v14 = vmul.f32 1.442695, %v1654_v2  ;;  %v1701_v5 = vmul.f32 1.442695, %v1658_v50 }
 0x2ca   : > { %v1535_v34 = vpop.permute.xlu0 %1534  ;;  %v1515_v21 = vpop.permute.xlu1 %1514 }
 0x2cb   : > { %v1652_v6 = vsub.f32 %v5392_v36, %v1515_v21  ;;  %v1656_v54 = vsub.f32 %v5393_v11, %v1535_v34  ;;  %3779 = vpow2.f32 %v1693_v14  ;;  %v5397_v34 = vld [vmem:[#allocation18_spill] sm:$0xff]  ;;  %v5398_v14 = vld [vmem:[#allocation15_spill] sm:$0xff] }
 0x2cc   : > { %v4862_v19 = vpop.eup %3771 }
 0x2cd   : > { %v3774_v40 = vpop.eup %3773  ;;  %v1689_v25 = vmul.f32 1.442695, %v1652_v6  ;;  %v2192_v44 = vpack.c.bf16 %v4862_v19, %v3768_v55  ;;  %v1697_v48 = vmul.f32 1.442695, %v1656_v54  ;;  %v5399_v6 = vld [vmem:[#allocation17_spill] sm:$0xff] }
 0x2ce   : > { %v2193_v45 = vpack.c.bf16 %v4859_v4, %v3774_v40  ;;  %v1565_v47 = vpop.permute.xlu0 %1564  ;;  %v1540_v13 = vpop.permute.xlu1 %1539  ;;  %v1813_v39 = vsel %vm1262_vm5, %v3774_v40, 0.0 }
 0x2cf   : > { %v1657_v46 = vsub.f32 %v5394_v30, %v1540_v13  ;;  %3580 = vmatprep.mubr.msk.bf16.mxu0 %vm1262_vm5, %v2192_v44  ;;  %3781 = vpow2.f32 %v1689_v25  ;;  %v1662_v40 = vsub.f32 %v5399_v6, %v1565_v47  ;;  %v5400_v13 = vld [vmem:[#allocation16_spill] sm:$0xff] }
 0x2d0   : > { %3581 = vmatmul.mubr.msk.bf16.vlgmr.msra.gmra.mxu0 %vm1262_vm5, %v2193_v45  ;;  %v3776_v2 = vpop.eup %3775 }
 0x2d1   : > { %v1699_v58 = vmul.f32 1.442695, %v1657_v46  ;;  %v1825_v44 = vsel %vm1262_vm5, %v3776_v2, 0.0  ;;  %v1709_v50 = vmul.f32 1.442695, %v1662_v40  ;;  %v5403_v40 = vld [vmem:[#allocation21_spill] sm:$0xff] }
 0x2d2   : > { %v4872_v22 = vpop.permute.xlu0 %2022  ;;  %1814 = vadd.xlane.f32.xlu0 %v1813_v39  ;;  %v1530_v31 = vpop.permute.xlu1 %1529 }
 0x2d3   : > { %v1655_v33 = vsub.f32 %v5396_v32, %v1530_v31  ;;  %3783 = vpow2.f32 %v1699_v58  ;;  %v5401_v32 = vld [vmem:[#allocation19_spill] sm:$0xff] }
 0x2d4   : > { %3785 = vpow2.f32 %v1697_v48  ;;  %v3778_v55 = vpop.eup %3777 }
 0x2d5   : > { %v1695_v62 = vmul.f32 1.442695, %v1655_v33 }
 0x2d6   : > { %v1555_v26 = vpop.permute.xlu0 %1554  ;;  %1808 = vadd.xlane.f32.xlu0 %v1807_v60  ;;  %v1560_v15 = vpop.permute.xlu1 %1559 }
 0x2d7   : > { %3787 = vpow2.f32 %v1695_v62  ;;  %v1660_v21 = vsub.f32 %v5397_v34, %v1555_v26  ;;  %v1661_v36 = vsub.f32 %v5398_v14, %v1560_v15 }
 0x2d8   : > { %3789 = vpow2.f32 %v1701_v5  ;;  %v4881_v46 = vpop.eup %3779 }
 0x2d9   : > { %v1707_v25 = vmul.f32 1.442695, %v1661_v36  ;;  %v1705_v54 = vmul.f32 1.442695, %v1660_v21  ;;  %v2195_v5 = vpack.c.bf16 %v4881_v46, %v3776_v2  ;;  %v1816_v21 = vsel %vm1262_vm5, %v4859_v4, 0.0  ;;  %v5402_v36 = vld [vmem:[#allocation22_spill] sm:$0xff] }
 0x2da   : > { %v1585_v45 = vpop.permute.xlu0 %1584  ;;  %1826 = vadd.xlane.f32.xlu0 %v1825_v44  ;;  %v1550_v11 = vpop.permute.xlu1 %1549  ;;  %v1810_v4 = vsel %vm1262_vm5, %v4862_v19, 0.0  ;;  %v5405_v19 = vld [vmem:[#allocation26_spill] sm:$0xff] }
 0x2db   : > { %v1659_v30 = vsub.f32 %v5400_v13, %v1550_v11  ;;  %3791 = vpow2.f32 %v1707_v25  ;;  %v1666_v25 = vsub.f32 %v5403_v40, %v1585_v45 }
 0x2dc   : > { %v3782_v27 = vpop.eup %3781  ;;  %3793 = vpow2.f32 %v1705_v54 }
 0x2dd   : > { %v1703_v58 = vmul.f32 1.442695, %v1659_v30  ;;  %v1822_v48 = vsel %vm1262_vm5, %v3782_v27, 0.0  ;;  %v2194_v31 = vpack.c.bf16 %v3782_v27, %v3778_v55  ;;  %v1717_v45 = vmul.f32 1.442695, %v1666_v25 }
 0x2de   : > { %v1575_v39 = vpop.permute.xlu0 %1574  ;;  %v1580_v47 = vpop.permute.xlu1 %1579  ;;  %1823 = vadd.xlane.f32.xlu0 %v1822_v48 }
 0x2df   : > { %v1665_v33 = vsub.f32 %v5401_v32, %v1580_v47  ;;  %3795 = vpow2.f32 %v1703_v58  ;;  %3584 = vmatprep.mubr.msk.bf16.mxu0 %vm1262_vm5, %v2194_v31  ;;  %v1664_v2 = vsub.f32 %v5402_v36, %v1575_v39 }
 0x2e0   : > { %v3784_v62 = vpop.eup %3783  ;;  %3797 = vpow2.f32 %v1709_v50  ;;  %3585 = vmatmul.mubr.msk.bf16.gmra.mxu0 %vm1262_vm5, %v2195_v5  ;;  %v5404_v50 = vld [vmem:[#allocation20_spill] sm:$0xff]  ;;  %v1819_v5 = vsel %vm1262_vm5, %v3778_v55, 0.0 }
 0x2e1   : > { %v1715_v60 = vmul.f32 1.442695, %v1665_v33  ;;  %v1837_v15 = vsel %vm1262_vm5, %v3784_v62, 0.0  ;;  %v4893_v14 = vpop.eup %3785  ;;  %v1713_v27 = vmul.f32 1.442695, %v1664_v2  ;;  %v5407_v2 = vld [vmem:[#allocation25_spill] sm:$0xff] }
 0x2e2   : > { %v1605_v26 = vpop.permute.xlu0 %1604  ;;  %v4889_v34 = vpop.permute.xlu1 %2027  ;;  %1838 = vadd.xlane.f32.xlu0 %v1837_v15  ;;  %v5406_v15 = vld [vmem:[#allocation23_spill] sm:$0xff] }
 0x2e3   : > { %1817 = vadd.xlane.f32.xlu1 %v1816_v21  ;;  %3799 = vpow2.f32 %v1715_v60 }
 0x2e4   : > { %v3788_v6 = vpop.eup %3787  ;;  %3801 = vpow2.f32 %v1713_v27  ;;  %v5408_v27 = vld [vmem:[#allocation24_spill] sm:$0xff] }
 0x2e5   : > { %v1831_v44 = vsel %vm1262_vm5, %v3788_v6, 0.0  ;;  %v2196_v11 = vpack.c.bf16 %v4893_v14, %v3788_v6  ;;  %v3790_v54 = vpop.eup %3789  ;;  %v1670_v6 = vsub.f32 %v5407_v2, %v1605_v26 }
 0x2e6   : > { %v1595_v13 = vpop.permute.xlu0 %1594  ;;  %v1570_v30 = vpop.permute.xlu1 %1569  ;;  %1832 = vadd.xlane.f32.xlu0 %v1831_v44  ;;  %v2197_v39 = vpack.c.bf16 %v3790_v54, %v3784_v62 }
 0x2e7   : > { %v1663_v58 = vsub.f32 %v5404_v50, %v1570_v30  ;;  %1811 = vadd.xlane.f32.xlu1 %v1810_v4  ;;  %3588 = vmatprep.mubr.msk.bf16.mxu0 %vm1262_vm5, %v2196_v11  ;;  %v1668_v60 = vsub.f32 %v5405_v19, %v1595_v13  ;;  %v1828_v13 = vsel %vm1262_vm5, %v4881_v46, 0.0 }
 0x2e8   : > { %v3792_v48 = vpop.eup %3791  ;;  %3589 = vmatmul.mubr.msk.bf16.gmra.mxu0 %vm1262_vm5, %v2197_v39  ;;  %v1725_v39 = vmul.f32 1.442695, %v1670_v6  ;;  %v1834_v6 = vsel %vm1262_vm5, %v4893_v14, 0.0  ;;  %v5414_v14 = vld [vmem:[#allocation31_spill] sm:$0xff] }
 0x2e9   : > { %v1711_v47 = vmul.f32 1.442695, %v1663_v58  ;;  %v1849_v32 = vsel %vm1262_vm5, %v3792_v48, 0.0  ;;  %v4908_v62 = vpop.eup %3793  ;;  %v1721_v4 = vmul.f32 1.442695, %v1668_v60  ;;  %v5410_v60 = vld [vmem:[#allocation27_spill] sm:$0xff] }
 0x2ea   : > { %v1625_v31 = vpop.permute.xlu0 %1624  ;;  %v1600_v33 = vpop.permute.xlu1 %1599  ;;  %1850 = vadd.xlane.f32.xlu0 %v1849_v32 }
 0x2eb   : > { %v1669_v21 = vsub.f32 %v5406_v15, %v1600_v33  ;;  %1820 = vadd.xlane.f32.xlu1 %v1819_v5  ;;  %3803 = vpow2.f32 %v1711_v47  ;;  %v1840_v33 = vsel %vm1262_vm5, %v3790_v54, 0.0  ;;  %v5409_v5 = vld [vmem:[#allocation30_spill] sm:$0xff]  ;;  %v5411_v15 = vld [vmem:[#allocation29_spill] sm:$0xff] }
 0x2ec   : > { %v3796_v36 = vpop.eup %3795  ;;  %3805 = vpow2.f32 %v1717_v45 }
 0x2ed   : > { %v1723_v40 = vmul.f32 1.442695, %v1669_v21  ;;  %v3798_v25 = vpop.eup %3797  ;;  %v1843_v11 = vsel %vm1262_vm5, %v3796_v36, 0.0  ;;  %v2198_v30 = vpack.c.bf16 %v4908_v62, %v3796_v36  ;;  %v1674_v21 = vsub.f32 %v5411_v15, %v1625_v31 }
 0x2ee   : > { %v1615_v44 = vpop.permute.xlu0 %1614  ;;  %v1590_v55 = vpop.permute.xlu1 %1589  ;;  %1844 = vadd.xlane.f32.xlu0 %v1843_v11  ;;  %v2199_v58 = vpack.c.bf16 %v3798_v25, %v3792_v48 }
 0x2ef   : > { %v1667_v50 = vsub.f32 %v5408_v27, %v1590_v55  ;;  %1829 = vadd.xlane.f32.xlu1 %v1828_v13  ;;  %3807 = vpow2.f32 %v1723_v40  ;;  %3592 = vmatprep.mubr.msk.bf16.mxu0 %vm1262_vm5, %v2198_v30  ;;  %v1672_v19 = vsub.f32 %v5409_v5, %v1615_v44  ;;  %v5412_v55 = vld [vmem:[#allocation28_spill] sm:$0xff]  ;;  %v1733_v30 = vmul.f32 1.442695, %v1674_v21 }
 0x2f0   : > { %v3800_v26 = vpop.eup %3799  ;;  %3593 = vmatmul.mubr.msk.bf16.gmra.mxu0 %vm1262_vm5, %v2199_v58  ;;  %3809 = vpow2.f32 %v1721_v4 }
 0x2f1   : > { %v1719_v45 = vmul.f32 1.442695, %v1667_v50  ;;  %v1861_v32 = vsel %vm1262_vm5, %v3800_v26, 0.0  ;;  %v1729_v40 = vmul.f32 1.442695, %v1672_v19  ;;  %v3802_v13 = vpop.eup %3801  ;;  %v5413_v50 = vld [vmem:[#allocation34_spill] sm:$0xff] }
 0x2f2   : > { %v1645_v47 = vpop.permute.xlu0 %1644  ;;  %v1620_v46 = vpop.permute.xlu1 %1619  ;;  %1862 = vadd.xlane.f32.xlu0 %v1861_v32  ;;  %v5415_v19 = vld [vmem:[#allocation33_spill] sm:$0xff] }
 0x2f3   : > { %v1673_v48 = vsub.f32 %v5410_v60, %v1620_v46  ;;  %1841 = vadd.xlane.f32.xlu1 %v1840_v33  ;;  %3811 = vpow2.f32 %v1719_v45  ;;  %v1852_v45 = vsel %vm1262_vm5, %v3798_v25, 0.0  ;;  %v1678_v60 = vsub.f32 %v5415_v19, %v1645_v47 }
 0x2f4   : > { %3813 = vpow2.f32 %v1725_v39 }
 0x2f5   : > { %v1731_v36 = vmul.f32 1.442695, %v1673_v48 }
 0x2f6   : > { %v1610_v2 = vpop.permute.xlu1 %1609  ;;  %v1635_v11 = vpop.permute.xlu0 %1634 }
 0x2f7   : > { %v1671_v54 = vsub.f32 %v5412_v55, %v1610_v2  ;;  %1835 = vadd.xlane.f32.xlu1 %v1834_v6  ;;  %3815 = vpow2.f32 %v1731_v36  ;;  %v1676_v58 = vsub.f32 %v5413_v50, %v1635_v11  ;;  %v1846_v36 = vsel %vm1262_vm5, %v4908_v62, 0.0 }
 0x2f8   : > { %v3804_v44 = vpop.eup %3803  ;;  %3817 = vpow2.f32 %v1729_v40  ;;  %v1741_v11 = vmul.f32 1.442695, %v1678_v60 }
 0x2f9   : > { %v1727_v4 = vmul.f32 1.442695, %v1671_v54  ;;  %v3806_v27 = vpop.eup %3805  ;;  %v1855_v31 = vsel %vm1262_vm5, %v3804_v44, 0.0  ;;  %v2200_v32 = vpack.c.bf16 %v3802_v13, %v3804_v44  ;;  %v1737_v15 = vmul.f32 1.442695, %v1676_v58 }
 0x2fa   : > { %v1640_v39 = vpop.permute.xlu1 %1639  ;;  %1856 = vadd.xlane.f32.xlu0 %v1855_v31  ;;  %v2201_v33 = vpack.c.bf16 %v3806_v27, %v3800_v26  ;;  %v5416_v26 = vld [vmem:[#allocation32_spill] sm:$0xff]  ;;  %v1864_v44 = vsel %vm1262_vm5, %v3806_v27, 0.0  ;;  %v1858_v58 = vsel %vm1262_vm5, %v3802_v13, 0.0  ;;  %v4943_v27 = vpop.permute.xlu0 %2037 }
 0x2fb   : > { %v1677_v46 = vsub.f32 %v5414_v14, %v1640_v39  ;;  %1853 = vadd.xlane.f32.xlu1 %v1852_v45  ;;  %3819 = vpow2.f32 %v1727_v4  ;;  %3596 = vmatprep.mubr.msk.bf16.mxu0 %vm1262_vm5, %v2200_v32 }
 0x2fc   : > { %v3808_v5 = vpop.eup %3807  ;;  %3821 = vpow2.f32 %v1733_v30  ;;  %3597 = vmatmul.mubr.msk.bf16.gmra.mxu0 %vm1262_vm5, %v2201_v33 }
 0x2fd   : > { %v1739_v48 = vmul.f32 1.442695, %v1677_v46  ;;  %v1873_v25 = vsel %vm1262_vm5, %v3808_v5, 0.0  ;;  %v3810_v6 = vpop.eup %3809 }
 0x2fe   : > { %v1630_v21 = vpop.permute.xlu1 %1629  ;;  %1874 = vadd.xlane.f32.xlu0 %v1873_v25  ;;  %v1870_v19 = vsel %vm1262_vm5, %v3810_v6, 0.0 }
 0x2ff   : > { %3823 = vpow2.f32 %v1739_v48  ;;  %v1675_v2 = vsub.f32 %v5416_v26, %v1630_v21  ;;  %1847 = vadd.xlane.f32.xlu1 %v1846_v36  ;;  %v4951_v48 = vpop.permute.xlu0 %2047 }
 0x300   : > { %v3812_v40 = vpop.eup %3811  ;;  %3825 = vpow2.f32 %v1737_v15 }
 0x301   : > { %v1735_v55 = vmul.f32 1.442695, %v1675_v2  ;;  %v3814_v47 = vpop.eup %3813  ;;  %v1867_v54 = vsel %vm1262_vm5, %v3812_v40, 0.0  ;;  %v2202_v30 = vpack.c.bf16 %v3810_v6, %v3812_v40 }
 0x302   : > { %1868 = vadd.xlane.f32.xlu0 %v1867_v54  ;;  %v2203_v62 = vpack.c.bf16 %v3814_v47, %v3808_v5  ;;  %v1876_v14 = vsel %vm1262_vm5, %v3814_v47, 0.0  ;;  %v4955_v40 = vpop.permute.xlu1 %2032 }
 0x303   : > { %3827 = vpow2.f32 %v1735_v55  ;;  %1865 = vadd.xlane.f32.xlu1 %v1864_v44  ;;  %3600 = vmatprep.mubr.msk.bf16.mxu0 %vm1262_vm5, %v2202_v30  ;;  %v4958_v6 = vpop.permute.xlu0 %2057  ;;  %v5417_v55 = vsub.f32 %v4667_v61, %v4685_v57 }
 0x304   : > { %v3816_v4 = vpop.eup %3815  ;;  %3829 = vpow2.f32 %v1741_v11  ;;  %3601 = vmatmul.mubr.msk.bf16.gmra.mxu0 %vm1262_vm5, %v2203_v62 }
 0x305   : > { %v1885_v50 = vsel %vm1262_vm5, %v3816_v4, 0.0  ;;  %v3818_v31 = vpop.eup %3817  ;;  %v1485_v47 = vmul.f32 1.442695, %v5417_v55 }
 0x306   : > { %1886 = vadd.xlane.f32.xlu0 %v1885_v50  ;;  %v1882_v11 = vsel %vm1262_vm5, %v3818_v31, 0.0  ;;  %v4965_v54 = vpop.permute.xlu1 %2042 }
 0x307   : > { %1859 = vadd.xlane.f32.xlu1 %v1858_v58  ;;  %3831 = vpow2.f32 %v1485_v47  ;;  %v4968_v30 = vpop.permute.xlu0 %2067  ;;  %v1743_v47 = vld [vmem:[#allocation4] sm:$0xff] }
 0x308   : > { %v3820_v39 = vpop.eup %3819 }
 0x309   : > { %v3822_v45 = vpop.eup %3821  ;;  %v1879_v32 = vsel %vm1262_vm5, %v3820_v39, 0.0  ;;  %v2204_v46 = vpack.c.bf16 %v3818_v31, %v3820_v39 }
 0x30a   : > { %1880 = vadd.xlane.f32.xlu0 %v1879_v32  ;;  %v2205_v33 = vpack.c.bf16 %v3822_v45, %v3816_v4  ;;  %v1888_v26 = vsel %vm1262_vm5, %v3822_v45, 0.0  ;;  %v4971_v4 = vpop.permute.xlu1 %2052 }
 0x30b   : > { %1877 = vadd.xlane.f32.xlu1 %v1876_v14  ;;  %3604 = vmatprep.mubr.msk.bf16.mxu0 %vm1262_vm5, %v2204_v46  ;;  %v4973_v50 = vpop.permute.xlu0 %2077 }
 0x30c   : > { %v3824_v5 = vpop.eup %3823  ;;  %3605 = vmatmul.mubr.msk.bf16.gmra.mxu0 %vm1262_vm5, %v2205_v33 }
 0x30d   : > { %v1897_v13 = vsel %vm1262_vm5, %v3824_v5, 0.0  ;;  %v3826_v60 = vpop.eup %3825 }
 0x30e   : > { %1898 = vadd.xlane.f32.xlu0 %v1897_v13  ;;  %v1894_v62 = vsel %vm1262_vm5, %v3826_v60, 0.0  ;;  %v4975_v58 = vpop.permute.xlu1 %2062 }
 0x30f   : > { %1871 = vadd.xlane.f32.xlu1 %v1870_v19  ;;  %v4977_v57 = vpop.permute.xlu0 %2087 }
 0x310   : > { %v3828_v15 = vpop.eup %3827 }
 0x311   : > { %v1891_v25 = vsel %vm1262_vm5, %v3828_v15, 0.0  ;;  %v2206_v21 = vpack.c.bf16 %v3826_v60, %v3828_v15  ;;  %v3830_v36 = vpop.eup %3829 }
 0x312   : > { %1892 = vadd.xlane.f32.xlu0 %v1891_v25  ;;  %v2207_v2 = vpack.c.bf16 %v3830_v36, %v3824_v5  ;;  %v1900_v44 = vsel %vm1262_vm5, %v3830_v36, 0.0  ;;  %v4982_v31 = vpop.permute.xlu1 %2072 }
 0x313   : > { %1889 = vadd.xlane.f32.xlu1 %v1888_v26  ;;  %3608 = vmatprep.mubr.msk.bf16.mxu0 %vm1262_vm5, %v2206_v21  ;;  %v4984_v39 = vpop.permute.xlu0 %2097 }
 0x314   : > { %3609 = vmatmul.mubr.msk.bf16.gmra.mxu0 %vm1262_vm5, %v2207_v2  ;;  %v4979_v61 = vpop.eup %3831  ;;  %v1745_v2 = vld [vmem:[#allocation4 + $0x10] sm:$0xff] }
 0x316   : > { %v4986_v45 = vpop.permute.xlu1 %2082 }
 0x317   : > { %1883 = vadd.xlane.f32.xlu1 %v1882_v11  ;;  %v4988_v32 = vpop.permute.xlu0 %2007  ;;  %v1777_v11 = vmul.f32 %v4831_v35, %v1745_v2  ;;  %v1749_v2 = vld [vmem:[#allocation4 + $0x30] sm:$0xff] }
 0x31a   : > { %v4990_v14 = vpop.permute.xlu1 %2092 }
 0x31b   : > { %1901 = vadd.xlane.f32.xlu1 %v1900_v44  ;;  %v4992_v46 = vpop.permute.xlu0 %2017 }
 0x31e   : > { %v4994_v33 = vpop.permute.xlu1 %2102 }
 0x31f   : > { %1895 = vadd.xlane.f32.xlu1 %v1894_v62  ;;  %5418 = vst [vmem:[#allocation6_spill] sm:$0xff] %v4994_v33  ;;  %v4996_v5 = vpop.permute.xlu0 %2117 }
 0x320   : > { %5419 = vst [vmem:[#allocation7_spill] sm:$0xff] %v4996_v5  ;;  %v1748_v5 = vld [vmem:[#allocation4 + $0x28] sm:$0xff] }
 0x322   : > { %v4998_v13 = vpop.permute.xlu1 %2112 }
 0x323   : > { %5420 = vst [vmem:[#allocation8_spill] sm:$0xff] %v4998_v13  ;;  %v5000_v19 = vpop.permute.xlu0 %2107 }
 0x324   : > { %5421 = vst [vmem:[#allocation9_spill] sm:$0xff] %v5000_v19 }
 0x326   : > { %v5002_v60 = vpop.permute.xlu1 %2002 }
 0x327   : > { %v5004_v15 = vpop.permute.xlu0 %2137 }
 0x328   : > { %2157 = vperm.xlu0 %3684, %v4979_v61   ;;  %5422 = vst [vmem:[#allocation10_spill] sm:$0xff] %v5004_v15  ;;  %v2832_v15 = vld [vmem:[%s5319_s4] sm:$0x1] }
 0x329   : > { %3654 = vmatprep.subr.msk.bf16.mxu1 %vm2888_vm6, %v2832_v15  ;;  %v2890_v19 = vsel %vm2888_vm6, %v2832_v15, 0  ;;  %3653 = vmatprep.subr.msk.bf16.mxu0 %vm2888_vm6, %v2832_v15  ;;  %v5427_v15 = vld [vmem:[#allocation36_spill] sm:$0xff] }
 0x32a   : > { %v5006_v25 = vpop.permute.xlu1 %2012  ;;  %3647 = vmatpush3.bf16.msra.mxu1 %v2890_v19  ;;  %3613 = vmatpush3.bf16.msra.mxu0 %v2890_v19  ;;  %v1753_v19 = vld [vmem:[#allocation4 + $0x50] sm:$0xff] }
 0x32b   : > { %v5008_v21 = vpop.permute.xlu0 %2127 }
 0x32c   : > { %5423 = vst [vmem:[#allocation14_spill] sm:$0xff] %v5008_v21 }
 0x32e   : > { %v5010_v36 = vpop.permute.xlu1 %2132 }
 0x32f   : > { %5424 = vst [vmem:[#allocation11_spill] sm:$0xff] %v5010_v36  ;;  %v5012_v26 = vpop.permute.xlu0 %2147 }
 0x330   : > { %5425 = vst [vmem:[#allocation13_spill] sm:$0xff] %v5012_v26  ;;  %v1775_v26 = vmul.f32 %v4823_v18, %v1743_v47  ;;  %v1746_v47 = vld [vmem:[#allocation4 + $0x18] sm:$0xff] }
 0x332   : > { %v5015_v44 = vpop.permute.xlu1 %2122 }
 0x333   : > { %5426 = vst [vmem:[#allocation12_spill] sm:$0xff] %v5015_v44 }
 0x336   : > { %v5022_v36 = vpop.permute.xlu1 %2152 }
 0x33a   : > { %v5028_v33 = vpop.permute.xlu1 %2142 }
 0x35b   : > { %v1815_v55 = vpop.xlane.xlu0 %1814 }
 0x35c   : > { %v1905_v62 = vadd.f32 %v1815_v55, %v1777_v11  ;;  %v1781_v11 = vmul.f32 %v4733_v12, %v1749_v2  ;;  %v1778_v12 = vmul.f32 %v4799_v7, %v1746_v47  ;;  %v1747_v7 = vld [vmem:[#allocation4 + $0x20] sm:$0xff] }
 0x35e   : > { %1938 = vst.msk [vmem:[#allocation4 + $0x10] sm:$0xff] %vm770_vm4, %v1905_v62  ;;  %v1780_v62 = vmul.f32 %v5427_v15, %v1748_v5 }
 0x35f   : > { %v1809_v35 = vpop.xlane.xlu0 %1808 }
 0x360   : > { %v1903_v21 = vadd.f32 %v1809_v35, %v1775_v26 }
 0x362   : > { %1936 = vst.msk [vmem:[#allocation4] sm:$0xff] %vm770_vm4, %v1903_v21  ;;  %v1785_v21 = vmul.f32 %v4757_v20, %v1753_v19  ;;  %v1757_v19 = vld [vmem:[#allocation4 + $0x70] sm:$0xff] }
 0x363   : > { %v1827_v55 = vpop.xlane.xlu0 %1826 }
 0x364   : > { %v1909_v44 = vadd.f32 %v1827_v55, %v1781_v11  ;;  %v1751_v11 = vld [vmem:[#allocation4 + $0x40] sm:$0xff] }
 0x366   : > { %1942 = vst.msk [vmem:[#allocation4 + $0x30] sm:$0xff] %vm770_vm4, %v1909_v44  ;;  %v1744_v44 = vld [vmem:[#allocation4 + $0x8] sm:$0xff] }
 0x367   : > { %v1824_v18 = vpop.xlane.xlu0 %1823 }
 0x368   : > { %v1908_v26 = vadd.f32 %v1824_v18, %v1780_v62  ;;  %v1776_v62 = vmul.f32 %v4786_v37, %v1744_v44 }
 0x369   : > { %v2560_v13 = vld [vmem:[#allocation4] sm:$0xff] }
 0x36a   : > { %3833 = vrcp.f32 %v2560_v13  ;;  %1941 = vst.msk [vmem:[#allocation4 + $0x28] sm:$0xff] %vm770_vm4, %v1908_v26  ;;  %v1783_v13 = vmul.f32 %v4744_v53, %v1751_v11  ;;  %v1750_v53 = vld [vmem:[#allocation4 + $0x38] sm:$0xff] }
 0x36b   : > { %v1839_v35 = vpop.xlane.xlu0 %1838 }
 0x36c   : > { %v1818_v2 = vpop.xlane.xlu1 %1817  ;;  %v1913_v5 = vadd.f32 %v1839_v35, %v1785_v21  ;;  %v1789_v21 = vmul.f32 %v4775_v42, %v1757_v19 }
 0x36d   : > { %v2566_v55 = vld [vmem:[#allocation4 + $0x30] sm:$0xff]  ;;  %v1906_v15 = vadd.f32 %v1818_v2, %v1778_v12  ;;  %v5428_v12 = vld [vmem:[#allocation35_spill] sm:$0xff] }
 0x36e   : > { %3835 = vrcp.f32 %v2566_v55  ;;  %1946 = vst.msk [vmem:[#allocation4 + $0x50] sm:$0xff] %vm770_vm4, %v1913_v5  ;;  %v1779_v35 = vmul.f32 %v5428_v12, %v1747_v7  ;;  %v1755_v5 = vld [vmem:[#allocation4 + $0x60] sm:$0xff] }
 0x36f   : > { %1939 = vst.msk [vmem:[#allocation4 + $0x18] sm:$0xff] %vm770_vm4, %v1906_v15  ;;  %v1833_v18 = vpop.xlane.xlu0 %1832  ;;  %v1787_v15 = vmul.f32 %v4767_v59, %v1755_v5 }
 0x370   : > { %v1812_v20 = vpop.xlane.xlu1 %1811  ;;  %v1911_v47 = vadd.f32 %v1833_v18, %v1783_v13  ;;  %v1782_v13 = vmul.f32 %v4721_v1, %v1750_v53  ;;  %v1761_v18 = vld [vmem:[#allocation4 + $0x90] sm:$0xff] }
 0x371   : > { %v1904_v26 = vadd.f32 %v1812_v20, %v1776_v62  ;;  %v1754_v20 = vld [vmem:[#allocation4 + $0x58] sm:$0xff] }
 0x372   : > { %1944 = vst.msk [vmem:[#allocation4 + $0x40] sm:$0xff] %vm770_vm4, %v1911_v47  ;;  %v1786_v12 = vmul.f32 %v4737_v8, %v1754_v20 }
 0x373   : > { %1937 = vst.msk [vmem:[#allocation4 + $0x8] sm:$0xff] %vm770_vm4, %v1904_v26  ;;  %v1851_v2 = vpop.xlane.xlu0 %1850 }
 0x374   : > { %v1821_v55 = vpop.xlane.xlu1 %1820  ;;  %v1917_v11 = vadd.f32 %v1851_v2, %v1789_v21  ;;  %v1793_v21 = vmul.f32 %v4803_v9, %v1761_v18  ;;  %v1759_v9 = vld [vmem:[#allocation4 + $0x80] sm:$0xff] }
 0x375   : > { %v1907_v37 = vadd.f32 %v1821_v55, %v1779_v35  ;;  %v1752_v35 = vld [vmem:[#allocation4 + $0x48] sm:$0xff] }
 0x376   : > { %1950 = vst.msk [vmem:[#allocation4 + $0x70] sm:$0xff] %vm770_vm4, %v1917_v11  ;;  %v1784_v53 = vmul.f32 %v4729_v28, %v1752_v35  ;;  %v2570_v11 = vld [vmem:[#allocation4 + $0x50] sm:$0xff]  ;;  %v1756_v28 = vld [vmem:[#allocation4 + $0x68] sm:$0xff]  ;;  %v1762_v35 = vld [vmem:[#allocation4 + $0x98] sm:$0xff] }
 0x377   : > { %v3834_v44 = vpop.eup %3833  ;;  %1940 = vst.msk [vmem:[#allocation4 + $0x20] sm:$0xff] %vm770_vm4, %v1907_v37  ;;  %v1845_v62 = vpop.xlane.xlu0 %1844 }
 0x378   : > { %2626 = vperm.xlu1 %3683, %v3834_v44   ;;  %v1830_v42 = vpop.xlane.xlu1 %1829  ;;  %v1915_v19 = vadd.f32 %v1845_v62, %v1787_v15  ;;  %v1758_v44 = vld [vmem:[#allocation4 + $0x78] sm:$0xff] }
 0x379   : > { %v1910_v7 = vadd.f32 %v1830_v42, %v1782_v13  ;;  %v1791_v13 = vmul.f32 %v4790_v43, %v1759_v9  ;;  %v1790_v62 = vmul.f32 %v4761_v17, %v1758_v44  ;;  %v2565_v42 = vld [vmem:[#allocation4 + $0x28] sm:$0xff]  ;;  %v1788_v43 = vmul.f32 %v4748_v38, %v1756_v28  ;;  %v1971_v28 = vld [vmem:[#allocation5 + $0x18] sm:$0xff] }
 0x37a   : > { %v2561_v47 = vld [vmem:[#allocation4 + $0x8] sm:$0xff]  ;;  %1948 = vst.msk [vmem:[#allocation4 + $0x60] sm:$0xff] %vm770_vm4, %v1915_v19  ;;  %v1765_v19 = vld [vmem:[#allocation4 + $0xb0] sm:$0xff]  ;;  %v1794_v38 = vmul.f32 %v4779_v16, %v1762_v35 }
 0x37b   : > { %v3836_v26 = vpop.eup %3835  ;;  %1943 = vst.msk [vmem:[#allocation4 + $0x38] sm:$0xff] %vm770_vm4, %v1910_v7  ;;  %3837 = vrcp.f32 %v2561_v47  ;;  %v1863_v59 = vpop.xlane.xlu0 %1862  ;;  %v2568_v7 = vld [vmem:[#allocation4 + $0x40] sm:$0xff] }
 0x37c   : > { %2656 = vperm.xlu1 %3683, %v3836_v26   ;;  %v1842_v1 = vpop.xlane.xlu1 %1841  ;;  %v1921_v2 = vadd.f32 %v1863_v59, %v1793_v21  ;;  %v1797_v21 = vmul.f32 %v4815_v0, %v1765_v19 }
 0x37d   : > { %v1914_v55 = vadd.f32 %v1842_v1, %v1786_v12  ;;  %v2574_v17 = vld [vmem:[#allocation4 + $0x70] sm:$0xff]  ;;  %v1763_v1 = vld [vmem:[#allocation4 + $0xa0] sm:$0xff] }
 0x37e   : > { %v2564_v5 = vld [vmem:[#allocation4 + $0x20] sm:$0xff]  ;;  %1954 = vst.msk [vmem:[#allocation4 + $0x90] sm:$0xff] %vm770_vm4, %v1921_v2  ;;  %v1795_v0 = vmul.f32 %v4811_v56, %v1763_v1 }
 0x37f   : > { %1947 = vst.msk [vmem:[#allocation4 + $0x58] sm:$0xff] %vm770_vm4, %v1914_v55  ;;  %3839 = vrcp.f32 %v2564_v5 }
 0x380   : > { %v1836_v37 = vpop.xlane.xlu1 %1835  ;;  %3841 = vrcp.f32 %v2570_v11  ;;  %v1970_v11 = vld [vmem:[#allocation5 + $0x10] sm:$0xff] }
 0x381   : > { %v1912_v8 = vadd.f32 %v1836_v37, %v1784_v53  ;;  %v2572_v37 = vld [vmem:[#allocation4 + $0x60] sm:$0xff]  ;;  %v2162_v19 = vmul.f32 %v5006_v25, %v1970_v11 }
 0x382   : > { %v2567_v15 = vld [vmem:[#allocation4 + $0x38] sm:$0xff] }
 0x383   : > { %1945 = vst.msk [vmem:[#allocation4 + $0x48] sm:$0xff] %vm770_vm4, %v1912_v8  ;;  %3843 = vrcp.f32 %v2567_v15  ;;  %v1857_v18 = vpop.xlane.xlu0 %1856  ;;  %v1769_v8 = vld [vmem:[#allocation4 + $0xd0] sm:$0xff] }
 0x384   : > { %v1854_v20 = vpop.xlane.xlu1 %1853  ;;  %v1919_v47 = vadd.f32 %v1857_v18, %v1791_v13  ;;  %3845 = vrcp.f32 %v2565_v42  ;;  %v1760_v18 = vld [vmem:[#allocation4 + $0x88] sm:$0xff]  ;;  %v1801_v16 = vmul.f32 %v4837_v51, %v1769_v8 }
 0x385   : > { %v1918_v26 = vadd.f32 %v1854_v20, %v1790_v62  ;;  %3847 = vrcp.f32 %v2568_v7  ;;  %v1968_v20 = vld [vmem:[#allocation5] sm:$0xff]  ;;  %v2578_v7 = vld [vmem:[#allocation4 + $0x90] sm:$0xff] }
 0x386   : > { %1952 = vst.msk [vmem:[#allocation4 + $0x80] sm:$0xff] %vm770_vm4, %v1919_v47  ;;  %v2571_v55 = vld [vmem:[#allocation4 + $0x58] sm:$0xff]  ;;  %3849 = vrcp.f32 %v2574_v17 }
 0x387   : > { %1951 = vst.msk [vmem:[#allocation4 + $0x78] sm:$0xff] %vm770_vm4, %v1918_v26  ;;  %v1875_v12 = vpop.xlane.xlu0 %1874  ;;  %3851 = vrcp.f32 %v2571_v55  ;;  %v1969_v55 = vld [vmem:[#allocation5 + $0x8] sm:$0xff] }
 0x388   : > { %v1848_v59 = vpop.xlane.xlu1 %1847  ;;  %v3838_v2 = vpop.eup %3837  ;;  %v1925_v5 = vadd.f32 %v1875_v12, %v1797_v21  ;;  %3853 = vrcp.f32 %v2572_v37  ;;  %v1792_v21 = vmul.f32 %v4771_v24, %v1760_v18  ;;  %v2160_v12 = vmul.f32 %v5002_v60, %v1968_v20 }
 0x389   : > { %v1916_v53 = vadd.f32 %v1848_v59, %v1788_v43  ;;  %2631 = vperm.xlu0 %3684, %v3838_v2   ;;  %v1767_v43 = vld [vmem:[#allocation4 + $0xc0] sm:$0xff]  ;;  %v1766_v2 = vld [vmem:[#allocation4 + $0xb8] sm:$0xff] }
 0x38a   : > { %1958 = vst.msk [vmem:[#allocation4 + $0xb0] sm:$0xff] %vm770_vm4, %v1925_v5  ;;  %v2569_v13 = vld [vmem:[#allocation4 + $0x48] sm:$0xff]  ;;  %v1799_v60 = vmul.f32 %v4844_v10, %v1767_v43 }
 0x38b   : > { %1949 = vst.msk [vmem:[#allocation4 + $0x68] sm:$0xff] %vm770_vm4, %v1916_v53  ;;  %v1869_v9 = vpop.xlane.xlu0 %1868  ;;  %3855 = vrcp.f32 %v2569_v13  ;;  %v2163_v53 = vmul.f32 %v4992_v46, %v1971_v28  ;;  %v2161_v46 = vmul.f32 %v4988_v32, %v1969_v55  ;;  %v1764_v10 = vld [vmem:[#allocation4 + $0xa8] sm:$0xff] }
 0x38c   : > { %v1866_v44 = vpop.xlane.xlu1 %1865  ;;  %v3840_v15 = vpop.eup %3839  ;;  %v1923_v62 = vadd.f32 %v1869_v9, %v1795_v0  ;;  %3857 = vrcp.f32 %v2578_v7  ;;  %v1798_v9 = vmul.f32 %v4807_v63, %v1766_v2  ;;  %v1796_v28 = vmul.f32 %v4819_v49, %v1764_v10  ;;  %v1771_v7 = vld [vmem:[#allocation4 + $0xe0] sm:$0xff]  ;;  %v1974_v2 = vld [vmem:[#allocation5 + $0x30] sm:$0xff] }
 0x38d   : > { %v1922_v42 = vadd.f32 %v1866_v44, %v1794_v38  ;;  %2646 = vperm.xlu1 %3683, %v3840_v15   ;;  %v3842_v56 = vpop.eup %3841  ;;  %v2576_v38 = vld [vmem:[#allocation4 + $0x80] sm:$0xff]  ;;  %v1773_v44 = vld [vmem:[#allocation4 + $0xf0] sm:$0xff] }
 0x38e   : > { %1956 = vst.msk [vmem:[#allocation4 + $0xa0] sm:$0xff] %vm770_vm4, %v1923_v62  ;;  %v2575_v25 = vld [vmem:[#allocation4 + $0x78] sm:$0xff] }
 0x38f   : > { %1955 = vst.msk [vmem:[#allocation4 + $0x98] sm:$0xff] %vm770_vm4, %v1922_v42  ;;  %v1887_v47 = vpop.xlane.xlu0 %1886  ;;  %3859 = vrcp.f32 %v2575_v25 }
 0x390   : > { %v3582_v26 = vpop.f32.mrf.mxu0  ;;  %v3844_v17 = vpop.eup %3843  ;;  %v1929_v59 = vadd.f32 %v1887_v47, %v1801_v16  ;;  %3861 = vrcp.f32 %v2576_v38 }
 0x391   : > { %v2431_v1 = vadd.f32 %v3582_v26, %v2162_v19  ;;  %v1860_v35 = vpop.xlane.xlu1 %1859  ;;  %2676 = vperm.xlu1 %3683, %v3842_v56   ;;  %2661 = vperm.xlu0 %3684, %v3844_v17   ;;  %v3846_v0 = vpop.eup %3845  ;;  %v1805_v19 = vmul.f32 %v4849_v3, %v1773_v44  ;;  %v2582_v16 = vld [vmem:[#allocation4 + $0xb0] sm:$0xff]  ;;  %v1770_v17 = vld [vmem:[#allocation4 + $0xd8] sm:$0xff]  ;;  %v1803_v3 = vmul.f32 %v4853_v52, %v1771_v7 }
 0x392   : > { %v1920_v5 = vadd.f32 %v1860_v35, %v1792_v21  ;;  %v2302_v51 = vpop.f32.mrf.mxu0  ;;  %1962 = vst.msk [vmem:[#allocation4 + $0xd0] sm:$0xff] %vm770_vm4, %v1929_v59  ;;  %v3848_v8 = vpop.eup %3847  ;;  %v2573_v15 = vld [vmem:[#allocation4 + $0x68] sm:$0xff] }
 0x393   : > { %2463 = vst.msk [vmem:[#allocation5 + $0x10] sm:$0xff] %vm835_vm2, %v2431_v1  ;;  %v2429_v24 = vadd.f32 %v2302_v51, %v2160_v12  ;;  %v1881_v11 = vpop.xlane.xlu0 %1880  ;;  %v3850_v32 = vpop.eup %3849  ;;  %3863 = vrcp.f32 %v2573_v15  ;;  %v1802_v1 = vmul.f32 %v4827_v29, %v1770_v17  ;;  %v2562_v17 = vld [vmem:[#allocation4 + $0x10] sm:$0xff] }
 0x394   : > { %1953 = vst.msk [vmem:[#allocation4 + $0x88] sm:$0xff] %vm770_vm4, %v1920_v5  ;;  %v3583_v37 = vpop.f32.mrf.mxu0  ;;  %v1927_v13 = vadd.f32 %v1881_v11, %v1799_v60  ;;  %v3852_v47 = vpop.eup %3851  ;;  %3865 = vrcp.f32 %v2582_v16  ;;  %v1972_v60 = vld [vmem:[#allocation5 + $0x20] sm:$0xff] }
 0x395   : > { %2461 = vst.msk [vmem:[#allocation5] sm:$0xff] %vm835_vm2, %v2429_v24  ;;  %v2432_v62 = vadd.f32 %v3583_v37, %v2163_v53  ;;  %v1878_v42 = vpop.xlane.xlu1 %1877  ;;  %2666 = vperm.xlu1 %3683, %v3848_v8   ;;  %2651 = vperm.xlu0 %3684, %v3846_v0   ;;  %v3854_v25 = vpop.eup %3853  ;;  %v2580_v59 = vld [vmem:[#allocation4 + $0xa0] sm:$0xff]  ;;  %v1768_v53 = vld [vmem:[#allocation4 + $0xc8] sm:$0xff]  ;;  %v2166_v0 = vmul.f32 %v4955_v40, %v1974_v2  ;;  %v1975_v37 = vld [vmem:[#allocation5 + $0x38] sm:$0xff] }
 0x396   : > { %v1926_v18 = vadd.f32 %v1878_v42, %v1798_v9  ;;  %v2305_v20 = vpop.f32.mrf.mxu0  ;;  %1960 = vst.msk [vmem:[#allocation4 + $0xc0] sm:$0xff] %vm770_vm4, %v1927_v13  ;;  %v2579_v26 = vld [vmem:[#allocation4 + $0x98] sm:$0xff]  ;;  %v1800_v29 = vmul.f32 %v4833_v41, %v1768_v53  ;;  %v2164_v15 = vmul.f32 %v4872_v22, %v1972_v60  ;;  %v1973_v42 = vld [vmem:[#allocation5 + $0x28] sm:$0xff]  ;;  %v1982_v60 = vld [vmem:[#allocation5 + $0x70] sm:$0xff] }
 0x397   : > { %2464 = vst.msk [vmem:[#allocation5 + $0x18] sm:$0xff] %vm835_vm2, %v2432_v62  ;;  %v2430_v63 = vadd.f32 %v2305_v20, %v2161_v46  ;;  %v1899_v56 = vpop.xlane.xlu0 %1898  ;;  %3867 = vrcp.f32 %v2579_v26  ;;  %v1774_v46 = vld [vmem:[#allocation4 + $0xf8] sm:$0xff]  ;;  %v2165_v7 = vmul.f32 %v4889_v34, %v1973_v42  ;;  %v1976_v26 = vld [vmem:[#allocation5 + $0x40] sm:$0xff] }
 0x398   : > { %1959 = vst.msk [vmem:[#allocation4 + $0xb8] sm:$0xff] %vm770_vm4, %v1926_v18  ;;  %v1933_v21 = vadd.f32 %v1899_v56, %v1805_v19  ;;  %v3856_v35 = vpop.eup %3855  ;;  %3869 = vrcp.f32 %v2580_v59  ;;  %v2167_v18 = vmul.f32 %v4943_v27, %v1975_v37  ;;  %v1978_v19 = vld [vmem:[#allocation5 + $0x50] sm:$0xff] }
 0x399   : > { %2462 = vst.msk [vmem:[#allocation5 + $0x8] sm:$0xff] %vm835_vm2, %v2430_v63  ;;  %v1872_v43 = vpop.xlane.xlu1 %1871  ;;  %2696 = vperm.xlu1 %3683, %v3850_v32   ;;  %2681 = vperm.xlu0 %3684, %v3852_v47   ;;  %v3858_v52 = vpop.eup %3857  ;;  %v2586_v38 = vld [vmem:[#allocation4 + $0xd0] sm:$0xff]  ;;  %v1806_v63 = vmul.f32 %v4979_v61, %v1774_v46  ;;  %v2170_v61 = vmul.f32 %v4971_v4, %v1978_v19 }
 0x39a   : > { %v1924_v12 = vadd.f32 %v1872_v43, %v1796_v28  ;;  %1966 = vst.msk [vmem:[#allocation4 + $0xf0] sm:$0xff] %vm770_vm4, %v1933_v21  ;;  %v1772_v28 = vld [vmem:[#allocation4 + $0xe8] sm:$0xff] }
 0x39b   : > { %v1893_v49 = vpop.xlane.xlu0 %1892  ;;  %v2577_v55 = vld [vmem:[#allocation4 + $0x88] sm:$0xff]  ;;  %v1804_v34 = vmul.f32 %v4839_v23, %v1772_v28  ;;  %v1986_v28 = vld [vmem:[#allocation5 + $0x90] sm:$0xff] }
 0x39c   : > { %1957 = vst.msk [vmem:[#allocation4 + $0xa8] sm:$0xff] %vm770_vm4, %v1924_v12  ;;  %v1931_v5 = vadd.f32 %v1893_v49, %v1803_v3  ;;  %3871 = vrcp.f32 %v2577_v55  ;;  %v3860_v11 = vpop.eup %3859  ;;  %v1977_v55 = vld [vmem:[#allocation5 + $0x48] sm:$0xff] }
 0x39d   : > { %v1890_v51 = vpop.xlane.xlu1 %1889  ;;  %2686 = vperm.xlu1 %3683, %v3854_v25   ;;  %2671 = vperm.xlu0 %3684, %v3856_v35   ;;  %3873 = vrcp.f32 %v2586_v38  ;;  %v3862_v10 = vpop.eup %3861  ;;  %v2584_v20 = vld [vmem:[#allocation4 + $0xc0] sm:$0xff]  ;;  %v1979_v25 = vld [vmem:[#allocation5 + $0x58] sm:$0xff]  ;;  %v2168_v35 = vmul.f32 %v4965_v54, %v1976_v26  ;;  %v2169_v38 = vmul.f32 %v4951_v48, %v1977_v55  ;;  %v5429_v55 = vld [vmem:[#allocation8_spill] sm:$0xff] }
 0x39e   : > { %v1930_v24 = vadd.f32 %v1890_v51, %v1802_v1  ;;  %1964 = vst.msk [vmem:[#allocation4 + $0xe0] sm:$0xff] %vm770_vm4, %v1931_v5  ;;  %v2171_v53 = vmul.f32 %v4958_v6, %v1979_v25 }
 0x39f   : > { %v2583_v9 = vld [vmem:[#allocation4 + $0xb8] sm:$0xff] }
 0x3a0   : > { %1963 = vst.msk [vmem:[#allocation4 + $0xd8] sm:$0xff] %vm770_vm4, %v1930_v24  ;;  %v3586_v44 = vpop.f32.mrf.mxu0  ;;  %3875 = vrcp.f32 %v2583_v9  ;;  %v3864_v22 = vpop.eup %3863  ;;  %v2174_v9 = vmul.f32 %v4982_v31, %v1982_v60  ;;  %v1989_v60 = vld [vmem:[#allocation5 + $0xa8] sm:$0xff] }
 0x3a1   : > { %v1884_v8 = vpop.xlane.xlu1 %1883  ;;  %v2435_v13 = vadd.f32 %v3586_v44, %v2166_v0  ;;  %2716 = vperm.xlu1 %3683, %v3858_v52   ;;  %2701 = vperm.xlu0 %3684, %v3860_v11   ;;  %3877 = vrcp.f32 %v2584_v20  ;;  %v3866_v43 = vpop.eup %3865  ;;  %v1980_v11 = vld [vmem:[#allocation5 + $0x60] sm:$0xff]  ;;  %v2563_v44 = vld [vmem:[#allocation4 + $0x18] sm:$0xff] }
 0x3a2   : > { %v1928_v62 = vadd.f32 %v1884_v8, %v1800_v29  ;;  %v2318_v40 = vpop.f32.mrf.mxu0 }
 0x3a3   : > { %2467 = vst.msk [vmem:[#allocation5 + $0x30] sm:$0xff] %vm835_vm2, %v2435_v13  ;;  %v2433_v41 = vadd.f32 %v2318_v40, %v2164_v15  ;;  %v2581_v32 = vld [vmem:[#allocation4 + $0xa8] sm:$0xff]  ;;  %v1983_v15 = vld [vmem:[#allocation5 + $0x78] sm:$0xff]  ;;  %v2590_v13 = vld [vmem:[#allocation4 + $0xf0] sm:$0xff] }
 0x3a4   : > { %1961 = vst.msk [vmem:[#allocation4 + $0xc8] sm:$0xff] %vm770_vm4, %v1928_v62  ;;  %v3587_v16 = vpop.f32.mrf.mxu0  ;;  %3879 = vrcp.f32 %v2581_v32  ;;  %v3868_v3 = vpop.eup %3867  ;;  %v2172_v62 = vmul.f32 %v4975_v58, %v1980_v11  ;;  %v1981_v40 = vld [vmem:[#allocation5 + $0x68] sm:$0xff] }
 0x3a5   : > { %v1902_v56 = vpop.xlane.xlu1 %1901  ;;  %2465 = vst.msk [vmem:[#allocation5 + $0x20] sm:$0xff] %vm835_vm2, %v2433_v41  ;;  %v2436_v27 = vadd.f32 %v3587_v16, %v2167_v18  ;;  %2706 = vperm.xlu1 %3683, %v3862_v10   ;;  %2691 = vperm.xlu0 %3684, %v3864_v22   ;;  %3881 = vrcp.f32 %v2562_v17  ;;  %v3870_v51 = vpop.eup %3869  ;;  %v2588_v23 = vld [vmem:[#allocation4 + $0xe0] sm:$0xff]  ;;  %v2175_v18 = vmul.f32 %v4973_v50, %v1983_v15 }
 0x3a6   : > { %v1934_v47 = vadd.f32 %v1902_v56, %v1806_v63  ;;  %v2321_v21 = vpop.f32.mrf.mxu0  ;;  %v2173_v58 = vmul.f32 %v4968_v30, %v1981_v40 }
 0x3a7   : > { %2468 = vst.msk [vmem:[#allocation5 + $0x38] sm:$0xff] %vm835_vm2, %v2436_v27  ;;  %v2434_v12 = vadd.f32 %v2321_v21, %v2165_v7  ;;  %v2587_v59 = vld [vmem:[#allocation4 + $0xd8] sm:$0xff]  ;;  %v1984_v27 = vld [vmem:[#allocation5 + $0x80] sm:$0xff] }
 0x3a8   : > { %1967 = vst.msk [vmem:[#allocation4 + $0xf8] sm:$0xff] %vm770_vm4, %v1934_v47  ;;  %v3590_v49 = vpop.f32.mrf.mxu0  ;;  %3883 = vrcp.f32 %v2587_v59  ;;  %v2178_v47 = vmul.f32 %v4990_v14, %v1986_v28  ;;  %v1987_v21 = vld [vmem:[#allocation5 + $0x98] sm:$0xff]  ;;  %v1996_v28 = vld [vmem:[#allocation5 + $0xe0] sm:$0xff] }
 0x3a9   : > { %v1896_v1 = vpop.xlane.xlu1 %1895  ;;  %2466 = vst.msk [vmem:[#allocation5 + $0x28] sm:$0xff] %vm835_vm2, %v2434_v12  ;;  %v2439_v2 = vadd.f32 %v3590_v49, %v2170_v61  ;;  %2736 = vperm.xlu1 %3683, %v3866_v43   ;;  %2721 = vperm.xlu0 %3684, %v3868_v3   ;;  %v3872_v54 = vpop.eup %3871  ;;  %3885 = vrcp.f32 %v2588_v23  ;;  %v2176_v61 = vmul.f32 %v4986_v45, %v1984_v27  ;;  %v1985_v12 = vld [vmem:[#allocation5 + $0x88] sm:$0xff]  ;;  %v1988_v45 = vld [vmem:[#allocation5 + $0xa0] sm:$0xff] }
 0x3aa   : > { %v1932_v4 = vadd.f32 %v1896_v1, %v1804_v34  ;;  %v2334_v5 = vpop.f32.mrf.mxu0  ;;  %v3874_v37 = vpop.eup %3873  ;;  %v2179_v25 = vmul.f32 %v4984_v39, %v1987_v21  ;;  %v1990_v1 = vld [vmem:[#allocation5 + $0xb0] sm:$0xff] }
 0x3ab   : > { %2471 = vst.msk [vmem:[#allocation5 + $0x50] sm:$0xff] %vm835_vm2, %v2439_v2  ;;  %v2437_v24 = vadd.f32 %v2334_v5, %v2168_v35  ;;  %v2585_v52 = vld [vmem:[#allocation4 + $0xc8] sm:$0xff]  ;;  %v2177_v35 = vmul.f32 %v4977_v57, %v1985_v12  ;;  %v2182_v5 = vmul.f32 %v5429_v55, %v1990_v1 }
 0x3ac   : > { %1965 = vst.msk [vmem:[#allocation4 + $0xe8] sm:$0xff] %vm770_vm4, %v1932_v4  ;;  %v3591_v0 = vpop.f32.mrf.mxu0  ;;  %3887 = vrcp.f32 %v2585_v52 }
 0x3ad   : > { %2469 = vst.msk [vmem:[#allocation5 + $0x40] sm:$0xff] %vm835_vm2, %v2437_v24  ;;  %v2440_v29 = vadd.f32 %v3591_v0, %v2171_v53  ;;  %2726 = vperm.xlu1 %3683, %v3870_v51   ;;  %2711 = vperm.xlu0 %3684, %v3872_v54   ;;  %v3876_v46 = vpop.eup %3875  ;;  %3889 = vrcp.f32 %v2563_v44  ;;  %v1991_v53 = vld [vmem:[#allocation5 + $0xb8] sm:$0xff]  ;;  %v5430_v24 = vld [vmem:[#allocation6_spill] sm:$0xff]  ;;  %v5431_v0 = vld [vmem:[#allocation7_spill] sm:$0xff] }
 0x3ae   : > { %v2337_v6 = vpop.f32.mrf.mxu0  ;;  %v3878_v31 = vpop.eup %3877  ;;  %3891 = vrcp.f32 %v2590_v13  ;;  %v2180_v54 = vmul.f32 %v5430_v24, %v1988_v45  ;;  %v5433_v13 = vld [vmem:[#allocation11_spill] sm:$0xff]  ;;  %v2535_v24 = vld [vmem:[#allocation5 + $0x38] sm:$0xff] }
 0x3af   : > { %2472 = vst.msk [vmem:[#allocation5 + $0x58] sm:$0xff] %vm835_vm2, %v2440_v29  ;;  %v2438_v8 = vadd.f32 %v2337_v6, %v2169_v38  ;;  %v2591_v7 = vld [vmem:[#allocation4 + $0xf8] sm:$0xff]  ;;  %v2183_v38 = vmul.f32 %v5431_v0, %v1991_v53  ;;  %v1994_v6 = vld [vmem:[#allocation5 + $0xd0] sm:$0xff]  ;;  %v2529_v45 = vld [vmem:[#allocation5 + $0x8] sm:$0xff] }
 0x3b0   : > { %v3594_v48 = vpop.f32.mrf.mxu0 }
 0x3b1   : > { %2470 = vst.msk [vmem:[#allocation5 + $0x48] sm:$0xff] %vm835_vm2, %v2438_v8  ;;  %v2443_v42 = vadd.f32 %v3594_v48, %v2174_v9  ;;  %2756 = vperm.xlu1 %3683, %v3874_v37   ;;  %2741 = vperm.xlu0 %3684, %v3876_v46   ;;  %v3880_v41 = vpop.eup %3879  ;;  %v5432_v9 = vld [vmem:[#allocation9_spill] sm:$0xff]  ;;  %v1992_v46 = vld [vmem:[#allocation5 + $0xc0] sm:$0xff]  ;;  %v2186_v48 = vmul.f32 %v5433_v13, %v1994_v6 }
 0x3b2   : > { %v2350_v10 = vpop.f32.mrf.mxu0  ;;  %v3882_v16 = vpop.eup %3881  ;;  %v2181_v44 = vmul.f32 %v5432_v9, %v1989_v60  ;;  %v2533_v60 = vld [vmem:[#allocation5 + $0x28] sm:$0xff] }
 0x3b3   : > { %2475 = vst.msk [vmem:[#allocation5 + $0x70] sm:$0xff] %vm835_vm2, %v2443_v42  ;;  %v2441_v20 = vadd.f32 %v2350_v10, %v2172_v62  ;;  %v2589_v63 = vld [vmem:[#allocation4 + $0xe8] sm:$0xff]  ;;  %v1995_v42 = vld [vmem:[#allocation5 + $0xd8] sm:$0xff]  ;;  %v5434_v10 = vld [vmem:[#allocation12_spill] sm:$0xff] }
 0x3b4   : > { %v3595_v22 = vpop.f32.mrf.mxu0  ;;  %3893 = vrcp.f32 %v2589_v63  ;;  %v5435_v63 = vld [vmem:[#allocation10_spill] sm:$0xff] }
 0x3b5   : > { %2473 = vst.msk [vmem:[#allocation5 + $0x60] sm:$0xff] %vm835_vm2, %v2441_v20  ;;  %v2444_v19 = vadd.f32 %v3595_v22, %v2175_v18  ;;  %2746 = vperm.xlu1 %3683, %v3878_v31   ;;  %2731 = vperm.xlu0 %3684, %v3880_v41   ;;  %v3884_v56 = vpop.eup %3883  ;;  %3895 = vrcp.f32 %v2591_v7  ;;  %v2184_v31 = vmul.f32 %v5434_v10, %v1992_v46  ;;  %v1993_v20 = vld [vmem:[#allocation5 + $0xc8] sm:$0xff] }
 0x3b6   : > { %v2353_v32 = vpop.f32.mrf.mxu0  ;;  %v3886_v30 = vpop.eup %3885  ;;  %v2187_v22 = vmul.f32 %v5435_v63, %v1995_v42  ;;  %v2539_v46 = vld [vmem:[#allocation5 + $0x58] sm:$0xff] }
 0x3b7   : > { %2476 = vst.msk [vmem:[#allocation5 + $0x78] sm:$0xff] %vm835_vm2, %v2444_v19  ;;  %v2442_v50 = vadd.f32 %v2353_v32, %v2173_v58  ;;  %v1998_v19 = vld [vmem:[#allocation5 + $0xf0] sm:$0xff] }
 0x3b8   : > { %v2190_v27 = vmul.f32 %v5022_v36, %v1998_v19 }
 0x3b9   : > { %2474 = vst.msk [vmem:[#allocation5 + $0x68] sm:$0xff] %vm835_vm2, %v2442_v50  ;;  %2636 = vperm.xlu1 %3683, %v3882_v16   ;;  %2761 = vperm.xlu0 %3684, %v3884_v56   ;;  %v3888_v26 = vpop.eup %3887  ;;  %v5436_v16 = vld [vmem:[#allocation14_spill] sm:$0xff] }
 0x3ba   : > { %v3890_v3 = vpop.eup %3889  ;;  %v2185_v50 = vmul.f32 %v5436_v16, %v1993_v20 }
 0x3bb   : > { %v3892_v49 = vpop.eup %3891 }
 0x3bc   : > { %v3598_v43 = vpop.f32.mrf.mxu0  ;;  %v2540_v19 = vld [vmem:[#allocation5 + $0x60] sm:$0xff] }
 0x3bd   : > { %v2447_v17 = vadd.f32 %v3598_v43, %v2178_v47  ;;  %2766 = vperm.xlu1 %3683, %v3886_v30   ;;  %2751 = vperm.xlu0 %3684, %v3888_v26   ;;  %v1999_v47 = vld [vmem:[#allocation5 + $0xf8] sm:$0xff]  ;;  %v2158_v26 = vpop.permute.xlu0 %2157  ;;  %v2188_v43 = vmul.f32 %v5028_v33, %v1996_v28  ;;  %v2542_v28 = vld [vmem:[#allocation5 + $0x70] sm:$0xff] }
 0x3be   : > { %v2366_v34 = vpop.f32.mrf.mxu0 }
 0x3bf   : > { %2479 = vst.msk [vmem:[#allocation5 + $0x90] sm:$0xff] %vm835_vm2, %v2447_v17  ;;  %v2445_v59 = vadd.f32 %v2366_v34, %v2176_v61  ;;  %v1997_v17 = vld [vmem:[#allocation5 + $0xe8] sm:$0xff]  ;;  %v2191_v34 = vmul.f32 %v2158_v26, %v1999_v47 }
 0x3c0   : > { %v3599_v14 = vpop.f32.mrf.mxu0  ;;  %v2541_v16 = vld [vmem:[#allocation5 + $0x68] sm:$0xff] }
 0x3c1   : > { %2477 = vst.msk [vmem:[#allocation5 + $0x80] sm:$0xff] %vm835_vm2, %v2445_v59  ;;  %v2448_v2 = vadd.f32 %v3599_v14, %v2179_v25  ;;  %2776 = vperm.xlu1 %3683, %v3892_v49   ;;  %2641 = vperm.xlu0 %3684, %v3890_v3   ;;  %v3894_v51 = vpop.eup %3893  ;;  %v5437_v59 = vld [vmem:[#allocation13_spill] sm:$0xff] }
 0x3c2   : > { %v2369_v4 = vpop.f32.mrf.mxu0  ;;  %v3896_v11 = vpop.eup %3895  ;;  %v2189_v36 = vmul.f32 %v5437_v59, %v1997_v17 }
 0x3c3   : > { %2480 = vst.msk [vmem:[#allocation5 + $0x98] sm:$0xff] %vm835_vm2, %v2448_v2  ;;  %v2446_v39 = vadd.f32 %v2369_v4, %v2177_v35  ;;  %v2528_v35 = vld [vmem:[#allocation5] sm:$0xff] }
 0x3c4   : > { %v3602_v23 = vpop.f32.mrf.mxu0 }
 0x3c5   : > { %2478 = vst.msk [vmem:[#allocation5 + $0x88] sm:$0xff] %vm835_vm2, %v2446_v39  ;;  %v2451_v57 = vadd.f32 %v3602_v23, %v2182_v5  ;;  %2771 = vperm.xlu0 %3684, %v3894_v51  }
 0x3c6   : > { %v2382_v52 = vpop.f32.mrf.mxu0  ;;  %v2546_v59 = vld [vmem:[#allocation5 + $0x90] sm:$0xff] }
 0x3c7   : > { %2483 = vst.msk [vmem:[#allocation5 + $0xb0] sm:$0xff] %vm835_vm2, %v2451_v57  ;;  %v2449_v29 = vadd.f32 %v2382_v52, %v2180_v54  ;;  %v2532_v54 = vld [vmem:[#allocation5 + $0x20] sm:$0xff] }
 0x3c8   : > { %v3603_v37 = vpop.f32.mrf.mxu0  ;;  %v2544_v17 = vld [vmem:[#allocation5 + $0x80] sm:$0xff] }
 0x3c9   : > { %2481 = vst.msk [vmem:[#allocation5 + $0xa0] sm:$0xff] %vm835_vm2, %v2449_v29  ;;  %v2452_v8 = vadd.f32 %v3603_v37, %v2183_v38  ;;  %2781 = vperm.xlu0 %3684, %v3896_v11   ;;  %v2534_v38 = vld [vmem:[#allocation5 + $0x30] sm:$0xff] }
 0x3ca   : > { %v2385_v15 = vpop.f32.mrf.mxu0 }
 0x3cb   : > { %2484 = vst.msk [vmem:[#allocation5 + $0xb8] sm:$0xff] %vm835_vm2, %v2452_v8  ;;  %v2450_v62 = vadd.f32 %v2385_v15, %v2181_v44  ;;  %v2536_v15 = vld [vmem:[#allocation5 + $0x40] sm:$0xff] }
 0x3cc   : > { %v3606_v40 = vpop.f32.mrf.mxu0 }
 0x3cd   : > { %2482 = vst.msk [vmem:[#allocation5 + $0xa8] sm:$0xff] %vm835_vm2, %v2450_v62  ;;  %v2455_v18 = vadd.f32 %v3606_v40, %v2186_v48  ;;  %v2537_v48 = vld [vmem:[#allocation5 + $0x48] sm:$0xff]  ;;  %v2538_v40 = vld [vmem:[#allocation5 + $0x50] sm:$0xff] }
 0x3ce   : > { %v2398_v41 = vpop.f32.mrf.mxu0 }
 0x3cf   : > { %2487 = vst.msk [vmem:[#allocation5 + $0xd0] sm:$0xff] %vm835_vm2, %v2455_v18  ;;  %v2453_v58 = vadd.f32 %v2398_v41, %v2184_v31 }
 0x3d0   : > { %v3607_v32 = vpop.f32.mrf.mxu0 }
 0x3d1   : > { %2485 = vst.msk [vmem:[#allocation5 + $0xc0] sm:$0xff] %vm835_vm2, %v2453_v58  ;;  %v2456_v56 = vadd.f32 %v3607_v32, %v2187_v22  ;;  %v2543_v58 = vld [vmem:[#allocation5 + $0x78] sm:$0xff] }
 0x3d2   : > { %v2401_v7 = vpop.f32.mrf.mxu0 }
 0x3d3   : > { %2488 = vst.msk [vmem:[#allocation5 + $0xd8] sm:$0xff] %vm835_vm2, %v2456_v56  ;;  %v2454_v30 = vadd.f32 %v2401_v7, %v2185_v50 }
 0x3d4   : > { %v3610_v21 = vpop.f32.mrf.mxu0 }
 0x3d5   : > { %2486 = vst.msk [vmem:[#allocation5 + $0xc8] sm:$0xff] %vm835_vm2, %v2454_v30  ;;  %v2459_v61 = vadd.f32 %v3610_v21, %v2190_v27 }
 0x3d6   : > { %v2414_v12 = vpop.f32.mrf.mxu0 }
 0x3d7   : > { %2491 = vst.msk [vmem:[#allocation5 + $0xf0] sm:$0xff] %vm835_vm2, %v2459_v61  ;;  %v2457_v3 = vadd.f32 %v2414_v12, %v2188_v43  ;;  %v2547_v61 = vld [vmem:[#allocation5 + $0x98] sm:$0xff] }
 0x3d8   : > { %v3611_v25 = vpop.f32.mrf.mxu0 }
 0x3d9   : > { %2489 = vst.msk [vmem:[#allocation5 + $0xe0] sm:$0xff] %vm835_vm2, %v2457_v3  ;;  %v2460_v49 = vadd.f32 %v3611_v25, %v2191_v34  ;;  %v2545_v34 = vld [vmem:[#allocation5 + $0x88] sm:$0xff] }
 0x3da   : > { %v2417_v1 = vpop.f32.mrf.mxu0 }
 0x3db   : > { %2492 = vst.msk [vmem:[#allocation5 + $0xf8] sm:$0xff] %vm835_vm2, %v2460_v49  ;;  %v2458_v14 = vadd.f32 %v2417_v1, %v2189_v36 }
 0x3dd   : > { %2490 = vst.msk [vmem:[#allocation5 + $0xe8] sm:$0xff] %vm835_vm2, %v2458_v14 }
 0x3f3   : > { %v2627_v33 = vpop.permute.xlu1 %2626 }
 0x3f4   : > { %v2784_v55 = vmul.f32 %v2627_v33, %v2528_v35 }
 0x3f7   : > { %v2657_v2 = vpop.permute.xlu1 %2656 }
 0x3f8   : > { %v2790_v6 = vmul.f32 %v2657_v2, %v2534_v38  ;;  %v2555_v38 = vld [vmem:[#allocation5 + $0xd8] sm:$0xff] }
 0x404   : > { %v2632_v4 = vpop.permute.xlu0 %2631 }
 0x405   : > { %v2785_v5 = vmul.f32 %v2632_v4, %v2529_v45  ;;  %v2551_v45 = vld [vmem:[#allocation5 + $0xb8] sm:$0xff]  ;;  %v2548_v4 = vld [vmem:[#allocation5 + $0xa0] sm:$0xff] }
 0x407   : > { %v2816_v39 = vpack.c.bf16 %v2785_v5, %v2784_v55  ;;  %v2549_v5 = vld [vmem:[#allocation5 + $0xa8] sm:$0xff] }
 0x408   : > { %v2647_v51 = vpop.permute.xlu1 %2646 }
 0x409   : > { %3614 = vmatprep.mubr.msk.bf16.mxu0 %vm835_vm2, %v2816_v39  ;;  %v2788_v29 = vmul.f32 %v2647_v51, %v2532_v54 }
 0x40c   : > { %v2662_v53 = vpop.permute.xlu0 %2661  ;;  %v2677_v23 = vpop.permute.xlu1 %2676 }
 0x40d   : > { %v2791_v57 = vmul.f32 %v2662_v53, %v2535_v24  ;;  %v2794_v18 = vmul.f32 %v2677_v23, %v2538_v40  ;;  %v2550_v53 = vld [vmem:[#allocation5 + $0xb0] sm:$0xff] }
 0x40f   : > { %v2819_v9 = vpack.c.bf16 %v2791_v57, %v2790_v6  ;;  %v2553_v6 = vld [vmem:[#allocation5 + $0xc8] sm:$0xff] }
 0x410   : > { %v2652_v52 = vpop.permute.xlu0 %2651  ;;  %v2667_v0 = vpop.permute.xlu1 %2666 }
 0x411   : > { %v2789_v11 = vmul.f32 %v2652_v52, %v2533_v60  ;;  %v2792_v10 = vmul.f32 %v2667_v0, %v2536_v15 }
 0x413   : > { %v2818_v37 = vpack.c.bf16 %v2789_v11, %v2788_v29  ;;  %v2552_v29 = vld [vmem:[#allocation5 + $0xc0] sm:$0xff] }
 0x414   : > { %v2682_v44 = vpop.permute.xlu0 %2681  ;;  %v2697_v8 = vpop.permute.xlu1 %2696 }
 0x415   : > { %3618 = vmatprep.mubr.msk.bf16.mxu1 %vm835_vm2, %v2818_v37  ;;  %v2795_v13 = vmul.f32 %v2682_v44, %v2539_v46  ;;  %v2798_v30 = vmul.f32 %v2697_v8, %v2542_v28 }
 0x416   : > { %3619 = vmatmul.mubr.msk.bf16.vlgmr.msra.gmra.mxu1 %vm835_vm2, %v2819_v9  ;;  %v2554_v9 = vld [vmem:[#allocation5 + $0xd0] sm:$0xff] }
 0x417   : > { %v2821_v41 = vpack.c.bf16 %v2795_v13, %v2794_v18 }
 0x418   : > { %v2672_v62 = vpop.permute.xlu0 %2671  ;;  %v2687_v42 = vpop.permute.xlu1 %2686 }
 0x419   : > { %v2793_v31 = vmul.f32 %v2672_v62, %v2537_v48  ;;  %v2796_v7 = vmul.f32 %v2687_v42, %v2540_v19  ;;  %v2530_v48 = vld [vmem:[#allocation5 + $0x10] sm:$0xff]  ;;  %v2531_v42 = vld [vmem:[#allocation5 + $0x18] sm:$0xff] }
 0x41b   : > { %v2820_v20 = vpack.c.bf16 %v2793_v31, %v2792_v10 }
 0x41c   : > { %v2702_v63 = vpop.permute.xlu0 %2701  ;;  %v2717_v22 = vpop.permute.xlu1 %2716 }
 0x41d   : > { %3622 = vmatprep.mubr.msk.bf16.mxu1 %vm835_vm2, %v2820_v20  ;;  %v2799_v32 = vmul.f32 %v2702_v63, %v2543_v58  ;;  %v2802_v1 = vmul.f32 %v2717_v22, %v2546_v59  ;;  %v2556_v20 = vld [vmem:[#allocation5 + $0xe0] sm:$0xff] }
 0x41e   : > { %3623 = vmatmul.mubr.msk.bf16.gmra.mxu1 %vm835_vm2, %v2821_v41  ;;  %v2557_v41 = vld [vmem:[#allocation5 + $0xe8] sm:$0xff] }
 0x41f   : > { %v2823_v26 = vpack.c.bf16 %v2799_v32, %v2798_v30  ;;  %v5169_v30 = vld [vmem:[%s5320_s5] ss:$0 sm:$0xff] }
 0x420   : > { %v2692_v50 = vpop.permute.xlu0 %2691  ;;  %v2707_v56 = vpop.permute.xlu1 %2706 }
 0x421   : > { %v2797_v27 = vmul.f32 %v2692_v50, %v2541_v16  ;;  %v2800_v36 = vmul.f32 %v2707_v56, %v2544_v17  ;;  %v2558_v16 = vld [vmem:[#allocation5 + $0xf0] sm:$0xff]  ;;  %v2559_v50 = vld [vmem:[#allocation5 + $0xf8] sm:$0xff] }
 0x423   : > { %v2822_v47 = vpack.c.bf16 %v2797_v27, %v2796_v7 }
 0x424   : > { %v2722_v21 = vpop.permute.xlu0 %2721  ;;  %v2737_v43 = vpop.permute.xlu1 %2736 }
 0x425   : > { %3626 = vmatprep.mubr.msk.bf16.mxu1 %vm835_vm2, %v2822_v47  ;;  %v2803_v12 = vmul.f32 %v2722_v21, %v2547_v61  ;;  %v2806_v54 = vmul.f32 %v2737_v43, %v2550_v53  ;;  %v3057_v61 = vld [vmem:[%s3989_s30 + $0x20] sm:$0xff]  ;;  %v3064_v53 = vld [vmem:[%s3989_s30 + $0x58] sm:$0xff] }
 0x426   : > { %3627 = vmatmul.mubr.msk.bf16.gmra.mxu1 %vm835_vm2, %v2823_v26  ;;  %v3059_v26 = vld [vmem:[%s3989_s30 + $0x30] sm:$0xff] }
 0x427   : > { %v2825_v33 = vpack.c.bf16 %v2803_v12, %v2802_v1 }
 0x428   : > { %v2712_v3 = vpop.permute.xlu0 %2711  ;;  %v2727_v25 = vpop.permute.xlu1 %2726 }
 0x429   : > { %v2801_v49 = vmul.f32 %v2712_v3, %v2545_v34  ;;  %v2804_v23 = vmul.f32 %v2727_v25, %v2548_v4  ;;  %v3060_v3 = vld [vmem:[%s3989_s30 + $0x38] sm:$0xff] }
 0x42b   : > { %v2824_v14 = vpack.c.bf16 %v2801_v49, %v2800_v36  ;;  %v3058_v49 = vld [vmem:[%s3989_s30 + $0x28] sm:$0xff] }
 0x42c   : > { %v2742_v35 = vpop.permute.xlu0 %2741  ;;  %v2757_v2 = vpop.permute.xlu1 %2756 }
 0x42d   : > { %3630 = vmatprep.mubr.msk.bf16.mxu1 %vm835_vm2, %v2824_v14  ;;  %v2807_v55 = vmul.f32 %v2742_v35, %v2551_v45  ;;  %v2810_v46 = vmul.f32 %v2757_v2, %v2554_v9  ;;  %v3063_v35 = vld [vmem:[%s3989_s30 + $0x50] sm:$0xff] }
 0x42e   : > { %3631 = vmatmul.mubr.msk.bf16.gmra.mxu1 %vm835_vm2, %v2825_v33 }
 0x42f   : > { %v2827_v60 = vpack.c.bf16 %v2807_v55, %v2806_v54  ;;  %v3061_v55 = vld [vmem:[%s3989_s30 + $0x40] sm:$0xff] }
 0x430   : > { %v2732_v39 = vpop.permute.xlu0 %2731  ;;  %v2747_v51 = vpop.permute.xlu1 %2746 }
 0x431   : > { %v2805_v24 = vmul.f32 %v2732_v39, %v2549_v5  ;;  %v2808_v44 = vmul.f32 %v2747_v51, %v2552_v29 }
 0x433   : > { %v2826_v57 = vpack.c.bf16 %v2805_v24, %v2804_v23 }
 0x434   : > { %v2762_v52 = vpop.permute.xlu0 %2761  ;;  %v2637_v0 = vpop.permute.xlu1 %2636 }
 0x435   : > { %3634 = vmatprep.mubr.msk.bf16.mxu1 %vm835_vm2, %v2826_v57  ;;  %v2811_v11 = vmul.f32 %v2762_v52, %v2555_v38  ;;  %v2786_v10 = vmul.f32 %v2637_v0, %v2530_v48  ;;  %v3062_v57 = vld [vmem:[%s3989_s30 + $0x48] sm:$0xff]  ;;  %v3067_v38 = vld [vmem:[%s3989_s30 + $0x70] sm:$0xff] }
 0x436   : > { %3635 = vmatmul.mubr.msk.bf16.gmra.mxu1 %vm835_vm2, %v2827_v60 }
 0x437   : > { %v2829_v13 = vpack.c.bf16 %v2811_v11, %v2810_v46  ;;  %v3068_v46 = vld [vmem:[%s3989_s30 + $0x78] sm:$0xff] }
 0x438   : > { %v2752_v37 = vpop.permute.xlu0 %2751  ;;  %v2767_v62 = vpop.permute.xlu1 %2766 }
 0x439   : > { %v2809_v8 = vmul.f32 %v2752_v37, %v2553_v6  ;;  %v2812_v22 = vmul.f32 %v2767_v62, %v2556_v20  ;;  %v3065_v37 = vld [vmem:[%s3989_s30 + $0x60] sm:$0xff]  ;;  %v3066_v62 = vld [vmem:[%s3989_s30 + $0x68] sm:$0xff] }
 0x43b   : > { %v2828_v15 = vpack.c.bf16 %v2809_v8, %v2808_v44 }
 0x43c   : > { %v2642_v40 = vpop.permute.xlu0 %2641  ;;  %v2777_v19 = vpop.permute.xlu1 %2776 }
 0x43d   : > { %v2787_v31 = vmul.f32 %v2642_v40, %v2531_v42  ;;  %3638 = vmatprep.mubr.msk.bf16.mxu1 %vm835_vm2, %v2828_v15  ;;  %v2814_v28 = vmul.f32 %v2777_v19, %v2558_v16 }
 0x43e   : > { %3639 = vmatmul.mubr.msk.bf16.gmra.mxu1 %vm835_vm2, %v2829_v13 }
 0x43f   : > { %v2817_v18 = vpack.c.bf16 %v2787_v31, %v2786_v10  ;;  %v3071_v31 = vld [vmem:[%s3989_s30 + $0x90] sm:$0xff] }
 0x440   : > { %v2772_v63 = vpop.permute.xlu0 %2771 }
 0x441   : > { %v2813_v58 = vmul.f32 %v2772_v63, %v2557_v41  ;;  %3615 = vmatmul.mubr.msk.bf16.vlgmr.msra.gmra.mxu0 %vm835_vm2, %v2817_v18  ;;  %v3069_v63 = vld [vmem:[%s3989_s30 + $0x80] sm:$0xff] }
 0x443   : > { %v2830_v32 = vpack.c.bf16 %v2813_v58, %v2812_v22 }
 0x444   : > { %v2782_v56 = vpop.permute.xlu0 %2781 }
 0x445   : > { %v2815_v7 = vmul.f32 %v2782_v56, %v2559_v50  ;;  %3642 = vmatprep.mubr.msk.bf16.mxu1 %vm835_vm2, %v2830_v32  ;;  %v3072_v32 = vld [vmem:[%s3989_s30 + $0x98] sm:$0xff] }
 0x447   : > { %v2831_v27 = vpack.c.bf16 %v2815_v7, %v2814_v28  ;;  %v3070_v28 = vld [vmem:[%s3989_s30 + $0x88] sm:$0xff] }
 0x449   : > { %3643 = vmatmul.mubr.msk.bf16.gmra.mxu1 %vm835_vm2, %v2831_v27 }
 0x4d6   : > { %v3620_v47 = vpop.f32.mrf.mxu1 }
 0x4d7   : > { %v2951_v21 = vadd.f32 %v3620_v47, %v5169_v30 }
 0x4d8   : > { %v2942_v43 = vpop.f32.mrf.mxu1 }
 0x4d9   : > { %v3091_v17 = vadd.f32 %v3059_v26, %v2951_v21  ;;  %v2943_v12 = vadd.f32 %v5169_v30, %v2942_v43  ;;  %v3075_v26 = vld [vmem:[%s3989_s30 + $0xb0] sm:$0xff] }
 0x4da   : > { %v3621_v34 = vpop.f32.mrf.mxu1 }
 0x4db   : > { %3124 = vst.msk [vmem:[%s5178_s20 + $0x30] sm:$0xff] %vm395_vm1, %v3091_v17  ;;  %v3089_v25 = vadd.f32 %v3057_v61, %v2943_v12  ;;  %v2954_v59 = vadd.f32 %v3621_v34, %v5169_v30  ;;  %v3073_v17 = vld [vmem:[%s3989_s30 + $0xa0] sm:$0xff] }
 0x4dc   : > { %v2945_v36 = vpop.f32.mrf.mxu1 }
 0x4dd   : > { %3122 = vst.msk [vmem:[%s5178_s20 + $0x20] sm:$0xff] %vm395_vm1, %v3089_v25  ;;  %v3092_v1 = vadd.f32 %v3060_v3, %v2954_v59  ;;  %v2946_v14 = vadd.f32 %v5169_v30, %v2945_v36  ;;  %v3076_v25 = vld [vmem:[%s3989_s30 + $0xb8] sm:$0xff] }
 0x4de   : > { %v3624_v33 = vpop.f32.mrf.mxu1 }
 0x4df   : > { %3125 = vst.msk [vmem:[%s5178_s20 + $0x38] sm:$0xff] %vm395_vm1, %v3092_v1  ;;  %v3090_v2 = vadd.f32 %v3058_v49, %v2946_v14  ;;  %v2967_v45 = vadd.f32 %v3624_v33, %v5169_v30  ;;  %v3074_v1 = vld [vmem:[%s3989_s30 + $0xa8] sm:$0xff] }
 0x4e0   : > { %v2958_v4 = vpop.f32.mrf.mxu1 }
 0x4e1   : > { %3123 = vst.msk [vmem:[%s5178_s20 + $0x28] sm:$0xff] %vm395_vm1, %v3090_v2  ;;  %v3095_v5 = vadd.f32 %v3063_v35, %v2967_v45  ;;  %v2959_v39 = vadd.f32 %v5169_v30, %v2958_v4  ;;  %v3079_v2 = vld [vmem:[%s3989_s30 + $0xd0] sm:$0xff] }
 0x4e2   : > { %v3625_v51 = vpop.f32.mrf.mxu1 }
 0x4e3   : > { %3128 = vst.msk [vmem:[%s5178_s20 + $0x50] sm:$0xff] %vm395_vm1, %v3095_v5  ;;  %v3093_v23 = vadd.f32 %v3061_v55, %v2959_v39  ;;  %v2970_v24 = vadd.f32 %v3625_v51, %v5169_v30  ;;  %v3077_v5 = vld [vmem:[%s3989_s30 + $0xc0] sm:$0xff] }
 0x4e4   : > { %v2961_v54 = vpop.f32.mrf.mxu1 }
 0x4e5   : > { %3126 = vst.msk [vmem:[%s5178_s20 + $0x40] sm:$0xff] %vm395_vm1, %v3093_v23  ;;  %v3096_v60 = vadd.f32 %v3064_v53, %v2970_v24  ;;  %v2962_v52 = vadd.f32 %v5169_v30, %v2961_v54  ;;  %v3055_v23 = vld [vmem:[%s3989_s30 + $0x10] sm:$0xff] }
 0x4e6   : > { %v3628_v0 = vpop.f32.mrf.mxu1 }
 0x4e7   : > { %3129 = vst.msk [vmem:[%s5178_s20 + $0x58] sm:$0xff] %vm395_vm1, %v3096_v60  ;;  %v3094_v29 = vadd.f32 %v3062_v57, %v2962_v52  ;;  %v2983_v11 = vadd.f32 %v3628_v0, %v5169_v30  ;;  %v3080_v57 = vld [vmem:[%s3989_s30 + $0xd8] sm:$0xff] }
 0x4e8   : > { %v2974_v6 = vpop.f32.mrf.mxu1 }
 0x4e9   : > { %3127 = vst.msk [vmem:[%s5178_s20 + $0x48] sm:$0xff] %vm395_vm1, %v3094_v29  ;;  %v3099_v9 = vadd.f32 %v3067_v38, %v2983_v11  ;;  %v2975_v44 = vadd.f32 %v5169_v30, %v2974_v6  ;;  %v3053_v38 = vld [vmem:[%s3989_s30] sm:$0xff] }
 0x4ea   : > { %v3629_v8 = vpop.f32.mrf.mxu1 }
 0x4eb   : > { %3132 = vst.msk [vmem:[%s5178_s20 + $0x70] sm:$0xff] %vm395_vm1, %v3099_v9  ;;  %v3097_v15 = vadd.f32 %v3065_v37, %v2975_v44  ;;  %v2986_v13 = vadd.f32 %v3629_v8, %v5169_v30  ;;  %v3078_v37 = vld [vmem:[%s3989_s30 + $0xc8] sm:$0xff] }
 0x4ec   : > { %v2977_v48 = vpop.f32.mrf.mxu1 }
 0x4ed   : > { %3130 = vst.msk [vmem:[%s5178_s20 + $0x60] sm:$0xff] %vm395_vm1, %v3097_v15  ;;  %v3100_v42 = vadd.f32 %v3068_v46, %v2986_v13  ;;  %v2978_v40 = vadd.f32 %v5169_v30, %v2977_v48  ;;  %v3056_v46 = vld [vmem:[%s3989_s30 + $0x18] sm:$0xff] }
 0x4ee   : > { %v3632_v10 = vpop.f32.mrf.mxu1 }
 0x4ef   : > { %3133 = vst.msk [vmem:[%s5178_s20 + $0x78] sm:$0xff] %vm395_vm1, %v3100_v42  ;;  %v3098_v18 = vadd.f32 %v3066_v62, %v2978_v40  ;;  %v2999_v20 = vadd.f32 %v3632_v10, %v5169_v30  ;;  %v3054_v42 = vld [vmem:[%s3989_s30 + $0x8] sm:$0xff] }
 0x4f0   : > { %v2990_v41 = vpop.f32.mrf.mxu1 }
 0x4f1   : > { %3131 = vst.msk [vmem:[%s5178_s20 + $0x68] sm:$0xff] %vm395_vm1, %v3098_v18  ;;  %v3103_v22 = vadd.f32 %v3071_v31, %v2999_v20  ;;  %v2991_v58 = vadd.f32 %v5169_v30, %v2990_v41  ;;  %v3083_v18 = vld [vmem:[%s3989_s30 + $0xf0] sm:$0xff] }
 0x4f2   : > { %v3633_v19 = vpop.f32.mrf.mxu1 }
 0x4f3   : > { %3136 = vst.msk [vmem:[%s5178_s20 + $0x90] sm:$0xff] %vm395_vm1, %v3103_v22  ;;  %v3101_v16 = vadd.f32 %v3069_v63, %v2991_v58  ;;  %v3002_v50 = vadd.f32 %v3633_v19, %v5169_v30  ;;  %v3081_v22 = vld [vmem:[%s3989_s30 + $0xe0] sm:$0xff] }
 0x4f4   : > { %v2993_v56 = vpop.f32.mrf.mxu1 }
 0x4f5   : > { %3134 = vst.msk [vmem:[%s5178_s20 + $0x80] sm:$0xff] %vm395_vm1, %v3101_v16  ;;  %v3104_v7 = vadd.f32 %v3072_v32, %v3002_v50  ;;  %v2994_v27 = vadd.f32 %v5169_v30, %v2993_v56  ;;  %v3084_v16 = vld [vmem:[%s3989_s30 + $0xf8] sm:$0xff] }
 0x4f6   : > { %v3636_v47 = vpop.f32.mrf.mxu1 }
 0x4f7   : > { %3137 = vst.msk [vmem:[%s5178_s20 + $0x98] sm:$0xff] %vm395_vm1, %v3104_v7  ;;  %v3102_v21 = vadd.f32 %v3070_v28, %v2994_v27  ;;  %v3015_v43 = vadd.f32 %v3636_v47, %v5169_v30  ;;  %v3082_v7 = vld [vmem:[%s3989_s30 + $0xe8] sm:$0xff] }
 0x4f8   : > { %v3006_v61 = vpop.f32.mrf.mxu1 }
 0x4f9   : > { %3135 = vst.msk [vmem:[%s5178_s20 + $0x88] sm:$0xff] %vm395_vm1, %v3102_v21  ;;  %v3107_v12 = vadd.f32 %v3075_v26, %v3015_v43  ;;  %v3007_v34 = vadd.f32 %v5169_v30, %v3006_v61 }
 0x4fa   : > { %v3637_v3 = vpop.f32.mrf.mxu1 }
 0x4fb   : > { %3140 = vst.msk [vmem:[%s5178_s20 + $0xb0] sm:$0xff] %vm395_vm1, %v3107_v12  ;;  %v3105_v59 = vadd.f32 %v3073_v17, %v3007_v34  ;;  %v3018_v36 = vadd.f32 %v3637_v3, %v5169_v30 }
 0x4fc   : > { %v3009_v49 = vpop.f32.mrf.mxu1 }
 0x4fd   : > { %3138 = vst.msk [vmem:[%s5178_s20 + $0xa0] sm:$0xff] %vm395_vm1, %v3105_v59  ;;  %v3108_v14 = vadd.f32 %v3076_v25, %v3018_v36  ;;  %v3010_v33 = vadd.f32 %v5169_v30, %v3009_v49 }
 0x4fe   : > { %v3640_v35 = vpop.f32.mrf.mxu1 }
 0x4ff   : > { %3141 = vst.msk [vmem:[%s5178_s20 + $0xb8] sm:$0xff] %vm395_vm1, %v3108_v14  ;;  %v3106_v45 = vadd.f32 %v3074_v1, %v3010_v33  ;;  %v3031_v4 = vadd.f32 %v3640_v35, %v5169_v30 }
 0x500   : > { %v3022_v55 = vpop.f32.mrf.mxu1 }
 0x501   : > { %3139 = vst.msk [vmem:[%s5178_s20 + $0xa8] sm:$0xff] %vm395_vm1, %v3106_v45  ;;  %v3111_v39 = vadd.f32 %v3079_v2, %v3031_v4  ;;  %v3023_v51 = vadd.f32 %v5169_v30, %v3022_v55  ;;  %v3616_v53 = vpop.f32.mrf.mxu0 }
 0x502   : > { %v2935_v24 = vadd.f32 %v3616_v53, %v5169_v30  ;;  %v3641_v54 = vpop.f32.mrf.mxu1 }
 0x503   : > { %3144 = vst.msk [vmem:[%s5178_s20 + $0xd0] sm:$0xff] %vm395_vm1, %v3111_v39  ;;  %v3109_v60 = vadd.f32 %v3077_v5, %v3023_v51  ;;  %v3034_v52 = vadd.f32 %v3641_v54, %v5169_v30  ;;  %v2926_v0 = vpop.f32.mrf.mxu0 }
 0x504   : > { %v3087_v29 = vadd.f32 %v3055_v23, %v2935_v24  ;;  %v2927_v11 = vadd.f32 %v5169_v30, %v2926_v0  ;;  %v3025_v6 = vpop.f32.mrf.mxu1 }
 0x505   : > { %3142 = vst.msk [vmem:[%s5178_s20 + $0xc0] sm:$0xff] %vm395_vm1, %v3109_v60  ;;  %v3112_v9 = vadd.f32 %v3080_v57, %v3034_v52  ;;  %v3026_v44 = vadd.f32 %v5169_v30, %v3025_v6  ;;  %v3617_v8 = vpop.f32.mrf.mxu0 }
 0x506   : > { %3120 = vst.msk [vmem:[%s5178_s20 + $0x10] sm:$0xff] %vm395_vm1, %v3087_v29  ;;  %v3085_v15 = vadd.f32 %v3053_v38, %v2927_v11  ;;  %v2938_v13 = vadd.f32 %v3617_v8, %v5169_v30 }
 0x507   : > { %3145 = vst.msk [vmem:[%s5178_s20 + $0xd8] sm:$0xff] %vm395_vm1, %v3112_v9  ;;  %v3110_v48 = vadd.f32 %v3078_v37, %v3026_v44  ;;  %v2929_v62 = vpop.f32.mrf.mxu0 }
 0x508   : > { %3118 = vst.msk [vmem:[%s5178_s20] sm:$0xff] %vm395_vm1, %v3085_v15  ;;  %v3088_v40 = vadd.f32 %v3056_v46, %v2938_v13  ;;  %v2930_v10 = vadd.f32 %v5169_v30, %v2929_v62 }
 0x509   : > { %3143 = vst.msk [vmem:[%s5178_s20 + $0xc8] sm:$0xff] %vm395_vm1, %v3110_v48  ;;  %v3644_v31 = vpop.f32.mrf.mxu1 }
 0x50a   : > { %3121 = vst.msk [vmem:[%s5178_s20 + $0x18] sm:$0xff] %vm395_vm1, %v3088_v40  ;;  %v3086_v20 = vadd.f32 %v3054_v42, %v2930_v10  ;;  %v3047_v41 = vadd.f32 %v3644_v31, %v5169_v30 }
 0x50b   : > { %v3038_v63 = vpop.f32.mrf.mxu1 }
 0x50c   : > { %3119 = vst.msk [vmem:[%s5178_s20 + $0x8] sm:$0xff] %vm395_vm1, %v3086_v20  ;;  %v3115_v58 = vadd.f32 %v3083_v18, %v3047_v41  ;;  %v3039_v19 = vadd.f32 %v5169_v30, %v3038_v63 }
 0x50d   : > { %v3645_v32 = vpop.f32.mrf.mxu1 }
 0x50e   : > { %3148 = vst.msk [vmem:[%s5178_s20 + $0xf0] sm:$0xff] %vm395_vm1, %v3115_v58  ;;  %v3113_v50 = vadd.f32 %v3081_v22, %v3039_v19  ;;  %v3050_v56 = vadd.f32 %v3645_v32, %v5169_v30 }
 0x50f   : > { %v3041_v28 = vpop.f32.mrf.mxu1 }
 0x510   : > { %3146 = vst.msk [vmem:[%s5178_s20 + $0xe0] sm:$0xff] %vm395_vm1, %v3113_v50  ;;  %v3116_v27 = vadd.f32 %v3084_v16, %v3050_v56  ;;  %v3042_v47 = vadd.f32 %v5169_v30, %v3041_v28 }
 0x512   : > { %3149 = vst.msk [vmem:[%s5178_s20 + $0xf8] sm:$0xff] %vm395_vm1, %v3116_v27  ;;  %v3114_v26 = vadd.f32 %v3082_v7, %v3042_v47 }
 0x514   : > { %3147 = vst.msk [vmem:[%s5178_s20 + $0xe8] sm:$0xff] %vm395_vm1, %v3114_v26 }
 0x515 PF: > { %s16_s23 = sadd.s32 1, %s3919_s23   ;;  %s5438_s21 = smov %s3915_s22 }
 0x516   : > { %p13_p5 = scmp.ge.s32.totalorder %s16_s23, 4   ;;  %s5439_s22 = smov %s5441_s24 }
 0x518   :  { %15 = sbr.rel (!%p13_p5) target bundleno = 2 (0x2), region = 85 }

</bundles_post_ra>
